<compile_context>
chip_gen: v7x
topology: tpu7x:2x2x1
jax: 0.10.0
libtpu: 0.0.40
codegen_flags: <defaults>
</compile_context>

<pallas_src>
import math
from types import SimpleNamespace

import numpy as np
import jax
import jax.numpy as jnp
from jax.experimental import pallas as pl
from jax.experimental.pallas import tpu as pltpu

EMB_IN = 350          # raw utterance embedding size (sliced to 300 in forward, as in the module)
D = 300               # logical input_size == state_size
D_PAD = 384           # 3 * 128, lane-dense padded feature size
NUM_REL = 10          # self.relationship_number
FFN_H = 2 * D         # logical feed-forward hidden size (synthetic choice)
FFN_PAD = 768         # 6 * 128
LN_EPS = 1e-5

# transpose-free "A @ B^T": contract the last dim of both operands
_NT = (((1,), (1,)), ((), ()))


# ----------------------------------------------------------------------------- Pallas kernel
def rat_layer_kernel(x_ref, r_ref,
                     wqkv_ref, wo_ref,
                     ek_ref, ev_ref,
                     ln1_g_ref, ln1_b_ref,
                     w1_ref, b1_ref, w2_ref, b2_ref,
                     ln2_g_ref, ln2_b_ref,
                     out_ref):
    """Relation-aware self-attention + FFN transformer layer, single head, one example per grid step.

    x_ref   : [1, L, D_PAD]   token states (utterance ++ schema), padded lanes (300:384) are zero
    r_ref   : [1, L, T, L]    binary relation indicators, bf16, layout rel[i, t, j]
    wqkv    : [D_PAD, 3*D_PAD] bf16 fused Q|K|V projection (weight-resident across the grid)
    ek      : [T, D_PAD]      bf16 relation-key embeddings (lane-dense)
    ev      : [T, D_PAD]      bf16 relation-value embeddings
    """
    x = x_ref[0]                                                     # [L, Dp] f32
    rel = r_ref[0]                                                   # [L, T, L] bf16 (binary -> exact)
    scale = 1.0 / math.sqrt(float(D))                                # logical D

    # Fused Q/K/V projection: one wide bf16 MXU pass, f32 accumulation.
    x_bf = x.astype(jnp.bfloat16)
    qkv = jnp.dot(x_bf, wqkv_ref[...], preferred_element_type=jnp.float32)   # [L, 3*Dp]
    q = qkv[:, :D_PAD].astype(jnp.bfloat16)
    k = qkv[:, D_PAD:2 * D_PAD].astype(jnp.bfloat16)
    v = qkv[:, 2 * D_PAD:].astype(jnp.bfloat16)

    # content-content scores: transpose-free bf16 NT matmul, f32 accumulation
    s = jax.lax.dot_general(q, k, _NT, preferred_element_type=jnp.float32)   # [L, L]

    # relation-key bias: s[i,j] += sum_t rel[i,t,j] * (q_i . e_k[t]); ek lane-dense [T, Dp]
    qe = jax.lax.dot_general(q, ek_ref[...], _NT,
                             preferred_element_type=jnp.float32)             # [L, T]
    qe_b = qe.astype(jnp.bfloat16)
    s = s + jnp.sum((rel * qe_b[:, :, None]).astype(jnp.float32), axis=1)    # [L, L]

    # TODO(synk): scale applied to (content + relation bias) as in Shaw/RAT-SQL;
    # verify against the unavailable RATTransoformer reference.
    s = s * scale

    # softmax over keys (f32, max-subtracted; reciprocal on the EUP)
    s = s - jnp.max(s, axis=-1, keepdims=True)
    p = jnp.exp(s)
    a = p * pl.reciprocal(jnp.sum(p, axis=-1, keepdims=True), approx=True)   # [L, L]
    a_b = a.astype(jnp.bfloat16)

    # content values + relation-value augmentation (both bf16 MXU passes, f32 accumulation)
    z = jnp.dot(a_b, v, preferred_element_type=jnp.float32)                  # [L, Dp]
    rel_sum = jnp.sum((rel * a_b[:, None, :]).astype(jnp.float32), axis=-1)  # [L, T]
    z = z + jnp.dot(rel_sum.astype(jnp.bfloat16), ev_ref[...],
                    preferred_element_type=jnp.float32)

    attn = jnp.dot(z.astype(jnp.bfloat16), wo_ref[...],
                   preferred_element_type=jnp.float32)                       # [L, Dp]

    def layer_norm(h, g, b):
        # Padded lanes of h are exactly zero, so sums over D_PAD equal sums over D.
        # Centered two-pass variance (no E[x^2]-mu^2 cancellation); the (D_PAD - D) pad lanes
        # contribute exactly mu^2 each to sum((h - mu)^2), which is subtracted back out.
        mu = jnp.sum(h, axis=-1, keepdims=True) * (1.0 / D)
        d = h - mu
        var = (jnp.sum(d * d, axis=-1, keepdims=True)
               - float(D_PAD - D) * mu * mu) * (1.0 / D)
        # g, b are zero in the pad lanes -> output pad lanes stay zero.
        return d * jax.lax.rsqrt(var + LN_EPS) * g + b

    h1 = layer_norm(x + attn, ln1_g_ref[...], ln1_b_ref[...])                # [L, Dp]

    # feed-forward (bf16 MXU operands, f32 accumulation / elementwise)
    f = jnp.dot(h1.astype(jnp.bfloat16), w1_ref[...],
                preferred_element_type=jnp.float32) + b1_ref[...]
    f = jnp.maximum(f, 0.0)
    f = jnp.dot(f.astype(jnp.bfloat16), w2_ref[...],
                preferred_element_type=jnp.float32) + b2_ref[...]

    out_ref[0] = layer_norm(h1 + f, ln2_g_ref[...], ln2_b_ref[...]).astype(out_ref.dtype)


def rat_transformer_layer_batch(x_pad, rel_ltl, params):
    """x_pad: [B, L, D_PAD] f32 (pad lanes zero), rel_ltl: [B, L, T, L] bf16 -> [B, L, D_PAD] f32."""
    B, L, _ = x_pad.shape

    def data_spec(shape):
        nd = len(shape)
        return pl.BlockSpec((1,) + tuple(shape[1:]),
                            lambda b, _n=nd: (b,) + (0,) * (_n - 1))

    def weight_spec(arr):
        nd = arr.ndim
        # constant block index across the grid -> DMA'd once, stays VMEM-resident
        return pl.BlockSpec(arr.shape, lambda b, _n=nd: (0,) * _n)

    weights = (params["wqkv"], params["wo"],
               params["ek"], params["ev"],
               params["ln1_g"], params["ln1_b"],
               params["w1"], params["b1"], params["w2"], params["b2"],
               params["ln2_g"], params["ln2_b"])

    in_specs = [data_spec(x_pad.shape), data_spec(rel_ltl.shape)]
    in_specs += [weight_spec(w) for w in weights]

    return pl.pallas_call(
        rat_layer_kernel,
        out_shape=jax.ShapeDtypeStruct((B, L, D_PAD), jnp.float32),
        grid=(B,),
        in_specs=in_specs,
        out_specs=pl.BlockSpec((1, L, D_PAD), lambda b: (b, 0, 0)),
        compiler_params=pltpu.CompilerParams(
            dimension_semantics=("parallel",),      # split the batch across TCs on v7x
            vmem_limit_bytes=32 * 1024 * 1024),
    )(x_pad, rel_ltl, *weights)


# ------------------------------------------------------------ relationship matrix (pure Python glue)
def build_relationship_matrix(input_sequence, input_schema, schema):
    utterance_len = len(input_sequence)
    schema_len = len(input_schema.column_names_surface_form)
    L = utterance_len + schema_len
    rel = np.zeros((L, L, NUM_REL), dtype=np.float32)

    def get_name(s):
        if s == '*':
            return ('', '')
        table_name, column_num = s.split('.')
        if column_num == '*':
            column_num = ''
        return (table_name, column_num)

    def is_ngram_match(s1, s2, n):
        vis = set()
        for i in range(len(s1) - n + 1):
            vis.add(s1[i:i + n])
        for i in range(len(s2) - n + 1):
            if s2[i:i + n] in vis:
                return True
        return False

    # 0: same table
    for i in range(schema_len):
        table_i, _ = get_name(input_schema.column_names_surface_form[i])
        idx = i + utterance_len
        for j in range(schema_len):
            table_j, _ = get_name(input_schema.column_names_surface_form[j])
            jdx = j + utterance_len
            if table_i == table_j:
                rel[idx][jdx][0] = 1
    # 1: foreign key
    for i, j in schema['foreign_keys']:
        idx = i + utterance_len
        jdx = j + utterance_len
        rel[idx][jdx][1] = 1
        rel[jdx][idx][1] = 1
    # 2-9: word/table & word/column matches (exact semantics of the PyTorch module, incl. no_math quirk)
    for i in range(schema_len):
        table, column = get_name(input_schema.column_names_surface_form[i])
        idx = i + utterance_len
        for j in range(utterance_len):
            word = input_sequence[j].lower()
            jdx = j
            no_math = True
            if word == table:
                rel[idx][jdx][2] = 1
                rel[jdx][idx][2] = 1
            for n in [5, 4, 3]:
                if no_math and is_ngram_match(word, table, n):
                    rel[idx][jdx][n] = 1
                    rel[jdx][idx][n] = 1
            no_math = True
            if word == column:
                rel[idx][jdx][6] = 1
                rel[jdx][idx][6] = 1
            for n in [5, 4, 3]:
                if no_math and is_ngram_match(word, column, n):
                    rel[idx][jdx][4 + n] = 1
                    rel[jdx][idx][4 + n] = 1
    return rel  # [L, L, T]


# ------------------------------------------------------------ module forward (glue in JAX/Python)
def prepare_example(utterance_states, schema_states, input_sequence, input_schema, schema):
    assert utterance_states.shape[1] == EMB_IN
    utterance_states = utterance_states[:, :D]

    utterance_len = utterance_states.shape[0]
    schema_len = schema_states.shape[0]
    assert len(input_sequence) == utterance_len
    assert len(input_schema.column_names_surface_form) == schema_len

    rel = build_relationship_matrix(input_sequence, input_schema, schema)       # [L, L, T]
    # relation-tensor in [i, t, j] layout (keys on the lane axis), bf16 (binary -> exact)
    rel_ltl = jnp.asarray(np.ascontiguousarray(np.transpose(rel, (0, 2, 1))),
                          dtype=jnp.bfloat16)                                    # [L, T, L]

    x = jnp.concatenate([utterance_states, schema_states], axis=0)               # [L, D]
    x_pad = jnp.pad(x, ((0, 0), (0, D_PAD - D)))                                 # [L, D_PAD]
    return x_pad, rel_ltl, utterance_len


def transformer_attention_forward_batch(examples, params):
    """examples: list of (utterance_states, schema_states, input_sequence, input_schema, schema).
    All examples must share the same total token count L (see TODO about ragged batches)."""
    prepped = [prepare_example(*ex) for ex in examples]
    L = prepped[0][0].shape[0]
    assert all(p[0].shape[0] == L for p in prepped)

    x_b = jnp.stack([p[0] for p in prepped], axis=0)     # [B, L, D_PAD]
    r_b = jnp.stack([p[1] for p in prepped], axis=0)     # [B, L, T, L]

    y_b = rat_transformer_layer_batch(x_b, r_b, params)[:, :, :D]   # [B, L, D]

    outs = []
    for bi, (_, _, utterance_len) in enumerate(prepped):
        y = y_b[bi]
        outs.append((y[:utterance_len, :].T,             # [D, utterance_len]
                     y[utterance_len:, :].T))            # [D, schema_len]
    return outs


def transformer_attention_forward(utterance_states, schema_states,
                                  input_sequence, input_schema, schema, params):
    return transformer_attention_forward_batch(
        [(utterance_states, schema_states, input_sequence, input_schema, schema)], params)[0]


def init_params(key):
    ks = jax.random.split(key, 8)
    scale = 0.02

    def pad2(w, rows, cols):
        return jnp.pad(w, ((0, rows - w.shape[0]), (0, cols - w.shape[1])))

    wq = scale * jax.random.normal(ks[0], (D, D), jnp.float32)
    wk = scale * jax.random.normal(ks[1], (D, D), jnp.float32)
    wv = scale * jax.random.normal(ks[2], (D, D), jnp.float32)
    wo = scale * jax.random.normal(ks[3], (D, D), jnp.float32)
    ek = scale * jax.random.normal(ks[4], (NUM_REL, D), jnp.float32)
    ev = scale * jax.random.normal(ks[5], (NUM_REL, D), jnp.float32)
    w1 = scale * jax.random.normal(ks[6], (D, FFN_H), jnp.float32)
    w2 = scale * jax.random.normal(ks[7], (FFN_H, D), jnp.float32)

    wqkv = jnp.concatenate(
        [pad2(wq, D_PAD, D_PAD), pad2(wk, D_PAD, D_PAD), pad2(wv, D_PAD, D_PAD)],
        axis=1)                                                              # [D_PAD, 3*D_PAD]

    return {
        "wqkv": wqkv.astype(jnp.bfloat16),
        "wo": pad2(wo, D_PAD, D_PAD).astype(jnp.bfloat16),
        "ek": pad2(ek, NUM_REL, D_PAD).astype(jnp.bfloat16),                 # [T, D_PAD] lane-dense
        "ev": pad2(ev, NUM_REL, D_PAD).astype(jnp.bfloat16),                 # [T, D_PAD]
        "ln1_g": pad2(jnp.ones((1, D), jnp.float32), 1, D_PAD),
        "ln1_b": jnp.zeros((1, D_PAD), jnp.float32),
        "w1": pad2(w1, D_PAD, FFN_PAD).astype(jnp.bfloat16),
        "b1": jnp.zeros((1, FFN_PAD), jnp.float32),
        "w2": pad2(w2, FFN_PAD, D_PAD).astype(jnp.bfloat16),
        "b2": jnp.zeros((1, D_PAD), jnp.float32),
        "ln2_g": pad2(jnp.ones((1, D), jnp.float32), 1, D_PAD),
        "ln2_b": jnp.zeros((1, D_PAD), jnp.float32),
    }


if __name__ == "__main__":
    key = jax.random.PRNGKey(0)
    k_u1, k_s1, k_u2, k_s2, k_p = jax.random.split(key, 5)

    input_schema = SimpleNamespace(column_names_surface_form=[
        "*", "singer.name", "singer.age", "singer.*", "concert.name", "concert.year",
    ])
    schema = {"foreign_keys": [[1, 4], [2, 5]]}

    input_sequence_1 = ["show", "me", "the", "name", "of", "all", "concert", "singers"]
    input_sequence_2 = ["what", "is", "the", "average", "age", "of", "the", "singer"]

    utterance_len = len(input_sequence_1)                     # 8
    schema_len = len(input_schema.column_names_surface_form)  # 6

    utterance_states_1 = jax.random.normal(k_u1, (utterance_len, EMB_IN), jnp.float32)
    schema_states_1 = jax.random.normal(k_s1, (schema_len, D), jnp.float32)
    utterance_states_2 = jax.random.normal(k_u2, (utterance_len, EMB_IN), jnp.float32)
    schema_states_2 = jax.random.normal(k_s2, (schema_len, D), jnp.float32)

    params = init_params(k_p)

    # Batched path: one pallas_call, grid over B=2 examples, weights VMEM-resident across the grid.
    outs = transformer_attention_forward_batch(
        [(utterance_states_1, schema_states_1, input_sequence_1, input_schema, schema),
         (utterance_states_2, schema_states_2, input_sequence_2, input_schema, schema)],
        params)

    ok = True
    for utt_out, sch_out in outs:
        utt_out = jax.block_until_ready(utt_out)
        sch_out = jax.block_until_ready(sch_out)
        assert utt_out.shape == (D, utterance_len), utt_out.shape
        assert sch_out.shape == (D, schema_len), sch_out.shape
        ok = ok and bool(jnp.all(jnp.isfinite(utt_out))) and bool(jnp.all(jnp.isfinite(sch_out)))

    assert ok
    print("KERNEL_OK")
</pallas_src>

<mosaic_0001>
module attributes {stable_mosaic.version = 11 : i64} {
  func.func @rat_layer_kernel(%arg0: i32, %arg1: memref<1x14x384xf32, #tpu.memory_space<vmem>>, %arg2: memref<1x14x10x14xbf16, #tpu.memory_space<vmem>>, %arg3: memref<384x1152xbf16, #tpu.memory_space<vmem>>, %arg4: memref<384x384xbf16, #tpu.memory_space<vmem>>, %arg5: memref<10x384xbf16, #tpu.memory_space<vmem>>, %arg6: memref<10x384xbf16, #tpu.memory_space<vmem>>, %arg7: memref<1x384xf32, #tpu.memory_space<vmem>>, %arg8: memref<1x384xf32, #tpu.memory_space<vmem>>, %arg9: memref<384x768xbf16, #tpu.memory_space<vmem>>, %arg10: memref<1x768xf32, #tpu.memory_space<vmem>>, %arg11: memref<768x384xbf16, #tpu.memory_space<vmem>>, %arg12: memref<1x384xf32, #tpu.memory_space<vmem>>, %arg13: memref<1x384xf32, #tpu.memory_space<vmem>>, %arg14: memref<1x384xf32, #tpu.memory_space<vmem>>, %arg15: memref<1x14x384xf32, #tpu.memory_space<vmem>>) attributes {dimension_semantics = [#tpu.dimension_semantics<parallel>], iteration_bounds = array<i64: 2>, scalar_prefetch = 0 : i64, scratch_operands = 0 : i64, tpu.core_type = #tpu.core_type<tc>, window_params = [{transform_indices = @transform_0, window_bounds = array<i64: 1, 14, 384>}, {transform_indices = @transform_1, window_bounds = array<i64: 1, 14, 10, 14>}, {pipeline_mode = #tpu.pipeline_mode<synchronous>, transform_indices = @transform_2, window_bounds = array<i64: 384, 1152>}, {pipeline_mode = #tpu.pipeline_mode<synchronous>, transform_indices = @transform_3, window_bounds = array<i64: 384, 384>}, {pipeline_mode = #tpu.pipeline_mode<synchronous>, transform_indices = @transform_4, window_bounds = array<i64: 10, 384>}, {pipeline_mode = #tpu.pipeline_mode<synchronous>, transform_indices = @transform_5, window_bounds = array<i64: 10, 384>}, {pipeline_mode = #tpu.pipeline_mode<synchronous>, transform_indices = @transform_6, window_bounds = array<i64: 1, 384>}, {pipeline_mode = #tpu.pipeline_mode<synchronous>, transform_indices = @transform_7, window_bounds = array<i64: 1, 384>}, {pipeline_mode = #tpu.pipeline_mode<synchronous>, transform_indices = @transform_8, window_bounds = array<i64: 384, 768>}, {pipeline_mode = #tpu.pipeline_mode<synchronous>, transform_indices = @transform_9, window_bounds = array<i64: 1, 768>}, {pipeline_mode = #tpu.pipeline_mode<synchronous>, transform_indices = @transform_10, window_bounds = array<i64: 768, 384>}, {pipeline_mode = #tpu.pipeline_mode<synchronous>, transform_indices = @transform_11, window_bounds = array<i64: 1, 384>}, {pipeline_mode = #tpu.pipeline_mode<synchronous>, transform_indices = @transform_12, window_bounds = array<i64: 1, 384>}, {pipeline_mode = #tpu.pipeline_mode<synchronous>, transform_indices = @transform_13, window_bounds = array<i64: 1, 384>}, {transform_indices = @transform_14, window_bounds = array<i64: 1, 14, 384>}]} {
    %c0 = arith.constant 0 : index
    %c0_0 = arith.constant 0 : index
    %c0_1 = arith.constant 0 : index
    %0 = vector.load %arg1[%c0, %c0_0, %c0_1] : memref<1x14x384xf32, #tpu.memory_space<vmem>>, vector<1x14x384xf32>
    %1 = vector.shape_cast %0 : vector<1x14x384xf32> to vector<14x384xf32>
    %c0_2 = arith.constant 0 : index
    %c0_3 = arith.constant 0 : index
    %c0_4 = arith.constant 0 : index
    %c0_5 = arith.constant 0 : index
    %2 = vector.load %arg2[%c0_2, %c0_3, %c0_4, %c0_5] : memref<1x14x10x14xbf16, #tpu.memory_space<vmem>>, vector<1x14x10x14xbf16>
    %3 = vector.shape_cast %2 : vector<1x14x10x14xbf16> to vector<14x10x14xbf16>
    %4 = arith.truncf %1 : vector<14x384xf32> to vector<14x384xbf16>
    %c0_6 = arith.constant 0 : index
    %c0_7 = arith.constant 0 : index
    %5 = vector.load %arg3[%c0_6, %c0_7] : memref<384x1152xbf16, #tpu.memory_space<vmem>>, vector<384x1152xbf16>
    %cst = arith.constant dense<0.000000e+00> : vector<14x1152xf32>
    %6 = tpu.matmul %4, %5, %cst {dimension_numbers = #tpu.dot_dimension_numbers<[1], [0], [0], [1], [0, 0, 1, 1], [], []>} : vector<14x384xbf16>, vector<384x1152xbf16>, vector<14x1152xf32> -> vector<14x1152xf32>
    %7 = vector.extract_strided_slice %6 {offsets = [0, 0], sizes = [14, 384], strides = [1, 1]} : vector<14x1152xf32> to vector<14x384xf32>
    %8 = arith.truncf %7 : vector<14x384xf32> to vector<14x384xbf16>
    %9 = vector.extract_strided_slice %6 {offsets = [0, 384], sizes = [14, 384], strides = [1, 1]} : vector<14x1152xf32> to vector<14x384xf32>
    %10 = arith.truncf %9 : vector<14x384xf32> to vector<14x384xbf16>
    %11 = vector.extract_strided_slice %6 {offsets = [0, 768], sizes = [14, 384], strides = [1, 1]} : vector<14x1152xf32> to vector<14x384xf32>
    %12 = arith.truncf %11 : vector<14x384xf32> to vector<14x384xbf16>
    %cst_8 = arith.constant dense<0.000000e+00> : vector<14x14xf32>
    %13 = tpu.matmul %8, %10, %cst_8 {dimension_numbers = #tpu.dot_dimension_numbers<[1], [1], [0], [0], [0, 0, 1, 0], [], []>} : vector<14x384xbf16>, vector<14x384xbf16>, vector<14x14xf32> -> vector<14x14xf32>
    %c0_9 = arith.constant 0 : index
    %c0_10 = arith.constant 0 : index
    %14 = vector.load %arg5[%c0_9, %c0_10] : memref<10x384xbf16, #tpu.memory_space<vmem>>, vector<10x384xbf16>
    %cst_11 = arith.constant dense<0.000000e+00> : vector<14x10xf32>
    %15 = tpu.matmul %8, %14, %cst_11 {dimension_numbers = #tpu.dot_dimension_numbers<[1], [1], [0], [0], [0, 0, 1, 0], [], []>} : vector<14x384xbf16>, vector<10x384xbf16>, vector<14x10xf32> -> vector<14x10xf32>
    %16 = arith.truncf %15 : vector<14x10xf32> to vector<14x10xbf16>
    %17 = vector.shape_cast %16 : vector<14x10xbf16> to vector<14x10x1xbf16>
    %18 = vector.broadcast %17 : vector<14x10x1xbf16> to vector<14x10x14xbf16>
    %19 = arith.mulf %3, %18 : vector<14x10x14xbf16>
    %20 = arith.extf %19 : vector<14x10x14xbf16> to vector<14x10x14xf32>
    %cst_12 = arith.constant dense<0.000000e+00> : vector<14x14xf32>
    %21 = vector.multi_reduction <add>, %20, %cst_12 [1] : vector<14x10x14xf32> to vector<14x14xf32>
    %22 = arith.addf %13, %21 : vector<14x14xf32>
    %cst_13 = arith.constant 0.0577350259 : f32
    %23 = vector.broadcast %cst_13 : f32 to vector<14x14xf32>
    %24 = arith.mulf %22, %23 : vector<14x14xf32>
    %cst_14 = arith.constant dense<0xFF800000> : vector<14xf32>
    %25 = vector.multi_reduction <maximumf>, %24, %cst_14 [1] : vector<14x14xf32> to vector<14xf32>
    %26 = vector.shape_cast %25 : vector<14xf32> to vector<14x1xf32>
    %27 = vector.broadcast %26 : vector<14x1xf32> to vector<14x14xf32>
    %28 = arith.subf %24, %27 : vector<14x14xf32>
    %29 = math.exp %28 : vector<14x14xf32>
    %cst_15 = arith.constant dense<0.000000e+00> : vector<14xf32>
    %30 = vector.multi_reduction <add>, %29, %cst_15 [1] : vector<14x14xf32> to vector<14xf32>
    %31 = vector.shape_cast %30 : vector<14xf32> to vector<14x1xf32>
    %32 = tpu.reciprocal %31 {approx = true} : vector<14x1xf32> -> vector<14x1xf32>
    %33 = vector.broadcast %32 : vector<14x1xf32> to vector<14x14xf32>
    %34 = arith.mulf %29, %33 : vector<14x14xf32>
    %35 = arith.truncf %34 : vector<14x14xf32> to vector<14x14xbf16>
    %cst_16 = arith.constant dense<0.000000e+00> : vector<14x384xf32>
    %36 = tpu.matmul %35, %12, %cst_16 {dimension_numbers = #tpu.dot_dimension_numbers<[1], [0], [0], [1], [0, 0, 1, 1], [], []>} : vector<14x14xbf16>, vector<14x384xbf16>, vector<14x384xf32> -> vector<14x384xf32>
    %37 = vector.shape_cast %35 : vector<14x14xbf16> to vector<14x1x14xbf16>
    %38 = vector.broadcast %37 : vector<14x1x14xbf16> to vector<14x10x14xbf16>
    %39 = arith.mulf %3, %38 : vector<14x10x14xbf16>
    %40 = arith.extf %39 : vector<14x10x14xbf16> to vector<14x10x14xf32>
    %cst_17 = arith.constant dense<0.000000e+00> : vector<14x10xf32>
    %41 = vector.multi_reduction <add>, %40, %cst_17 [2] : vector<14x10x14xf32> to vector<14x10xf32>
    %42 = arith.truncf %41 : vector<14x10xf32> to vector<14x10xbf16>
    %c0_18 = arith.constant 0 : index
    %c0_19 = arith.constant 0 : index
    %43 = vector.load %arg6[%c0_18, %c0_19] : memref<10x384xbf16, #tpu.memory_space<vmem>>, vector<10x384xbf16>
    %cst_20 = arith.constant dense<0.000000e+00> : vector<14x384xf32>
    %44 = tpu.matmul %42, %43, %cst_20 {dimension_numbers = #tpu.dot_dimension_numbers<[1], [0], [0], [1], [0, 0, 1, 1], [], []>} : vector<14x10xbf16>, vector<10x384xbf16>, vector<14x384xf32> -> vector<14x384xf32>
    %45 = arith.addf %36, %44 : vector<14x384xf32>
    %46 = arith.truncf %45 : vector<14x384xf32> to vector<14x384xbf16>
    %c0_21 = arith.constant 0 : index
    %c0_22 = arith.constant 0 : index
    %47 = vector.load %arg4[%c0_21, %c0_22] : memref<384x384xbf16, #tpu.memory_space<vmem>>, vector<384x384xbf16>
    %cst_23 = arith.constant dense<0.000000e+00> : vector<14x384xf32>
    %48 = tpu.matmul %46, %47, %cst_23 {dimension_numbers = #tpu.dot_dimension_numbers<[1], [0], [0], [1], [0, 0, 1, 1], [], []>} : vector<14x384xbf16>, vector<384x384xbf16>, vector<14x384xf32> -> vector<14x384xf32>
    %49 = arith.addf %1, %48 : vector<14x384xf32>
    %c0_24 = arith.constant 0 : index
    %c0_25 = arith.constant 0 : index
    %50 = vector.load %arg7[%c0_24, %c0_25] : memref<1x384xf32, #tpu.memory_space<vmem>>, vector<1x384xf32>
    %c0_26 = arith.constant 0 : index
    %c0_27 = arith.constant 0 : index
    %51 = vector.load %arg8[%c0_26, %c0_27] : memref<1x384xf32, #tpu.memory_space<vmem>>, vector<1x384xf32>
    %cst_28 = arith.constant dense<0.000000e+00> : vector<14xf32>
    %52 = vector.multi_reduction <add>, %49, %cst_28 [1] : vector<14x384xf32> to vector<14xf32>
    %53 = vector.shape_cast %52 : vector<14xf32> to vector<14x1xf32>
    %cst_29 = arith.constant 0.00333333341 : f32
    %54 = vector.broadcast %cst_29 : f32 to vector<14x1xf32>
    %55 = arith.mulf %53, %54 : vector<14x1xf32>
    %56 = vector.broadcast %55 : vector<14x1xf32> to vector<14x384xf32>
    %57 = arith.subf %49, %56 : vector<14x384xf32>
    %58 = arith.mulf %57, %57 : vector<14x384xf32>
    %cst_30 = arith.constant dense<0.000000e+00> : vector<14xf32>
    %59 = vector.multi_reduction <add>, %58, %cst_30 [1] : vector<14x384xf32> to vector<14xf32>
    %60 = vector.shape_cast %59 : vector<14xf32> to vector<14x1xf32>
    %cst_31 = arith.constant 8.400000e+01 : f32
    %61 = vector.broadcast %cst_31 : f32 to vector<14x1xf32>
    %62 = arith.mulf %61, %55 : vector<14x1xf32>
    %63 = arith.mulf %62, %55 : vector<14x1xf32>
    %64 = arith.subf %60, %63 : vector<14x1xf32>
    %cst_32 = arith.constant 0.00333333341 : f32
    %65 = vector.broadcast %cst_32 : f32 to vector<14x1xf32>
    %66 = arith.mulf %64, %65 : vector<14x1xf32>
    %cst_33 = arith.constant 9.99999974E-6 : f32
    %67 = vector.broadcast %cst_33 : f32 to vector<14x1xf32>
    %68 = arith.addf %66, %67 : vector<14x1xf32>
    %69 = math.rsqrt %68 : vector<14x1xf32>
    %70 = vector.broadcast %69 : vector<14x1xf32> to vector<14x384xf32>
    %71 = arith.mulf %57, %70 : vector<14x384xf32>
    %72 = vector.broadcast %50 : vector<1x384xf32> to vector<14x384xf32>
    %73 = arith.mulf %71, %72 : vector<14x384xf32>
    %74 = vector.broadcast %51 : vector<1x384xf32> to vector<14x384xf32>
    %75 = arith.addf %73, %74 : vector<14x384xf32>
    %76 = arith.truncf %75 : vector<14x384xf32> to vector<14x384xbf16>
    %c0_34 = arith.constant 0 : index
    %c0_35 = arith.constant 0 : index
    %77 = vector.load %arg9[%c0_34, %c0_35] : memref<384x768xbf16, #tpu.memory_space<vmem>>, vector<384x768xbf16>
    %cst_36 = arith.constant dense<0.000000e+00> : vector<14x768xf32>
    %78 = tpu.matmul %76, %77, %cst_36 {dimension_numbers = #tpu.dot_dimension_numbers<[1], [0], [0], [1], [0, 0, 1, 1], [], []>} : vector<14x384xbf16>, vector<384x768xbf16>, vector<14x768xf32> -> vector<14x768xf32>
    %c0_37 = arith.constant 0 : index
    %c0_38 = arith.constant 0 : index
    %79 = vector.load %arg10[%c0_37, %c0_38] : memref<1x768xf32, #tpu.memory_space<vmem>>, vector<1x768xf32>
    %80 = vector.broadcast %79 : vector<1x768xf32> to vector<14x768xf32>
    %81 = arith.addf %78, %80 : vector<14x768xf32>
    %cst_39 = arith.constant 0.000000e+00 : f32
    %82 = vector.broadcast %cst_39 : f32 to vector<14x768xf32>
    %83 = arith.maximumf %81, %82 : vector<14x768xf32>
    %84 = arith.truncf %83 : vector<14x768xf32> to vector<14x768xbf16>
    %c0_40 = arith.constant 0 : index
    %c0_41 = arith.constant 0 : index
    %85 = vector.load %arg11[%c0_40, %c0_41] : memref<768x384xbf16, #tpu.memory_space<vmem>>, vector<768x384xbf16>
    %cst_42 = arith.constant dense<0.000000e+00> : vector<14x384xf32>
    %86 = tpu.matmul %84, %85, %cst_42 {dimension_numbers = #tpu.dot_dimension_numbers<[1], [0], [0], [1], [0, 0, 1, 1], [], []>} : vector<14x768xbf16>, vector<768x384xbf16>, vector<14x384xf32> -> vector<14x384xf32>
    %c0_43 = arith.constant 0 : index
    %c0_44 = arith.constant 0 : index
    %87 = vector.load %arg12[%c0_43, %c0_44] : memref<1x384xf32, #tpu.memory_space<vmem>>, vector<1x384xf32>
    %88 = vector.broadcast %87 : vector<1x384xf32> to vector<14x384xf32>
    %89 = arith.addf %86, %88 : vector<14x384xf32>
    %90 = arith.addf %75, %89 : vector<14x384xf32>
    %c0_45 = arith.constant 0 : index
    %c0_46 = arith.constant 0 : index
    %91 = vector.load %arg13[%c0_45, %c0_46] : memref<1x384xf32, #tpu.memory_space<vmem>>, vector<1x384xf32>
    %c0_47 = arith.constant 0 : index
    %c0_48 = arith.constant 0 : index
    %92 = vector.load %arg14[%c0_47, %c0_48] : memref<1x384xf32, #tpu.memory_space<vmem>>, vector<1x384xf32>
    %cst_49 = arith.constant dense<0.000000e+00> : vector<14xf32>
    %93 = vector.multi_reduction <add>, %90, %cst_49 [1] : vector<14x384xf32> to vector<14xf32>
    %94 = vector.shape_cast %93 : vector<14xf32> to vector<14x1xf32>
    %cst_50 = arith.constant 0.00333333341 : f32
    %95 = vector.broadcast %cst_50 : f32 to vector<14x1xf32>
    %96 = arith.mulf %94, %95 : vector<14x1xf32>
    %97 = vector.broadcast %96 : vector<14x1xf32> to vector<14x384xf32>
    %98 = arith.subf %90, %97 : vector<14x384xf32>
    %99 = arith.mulf %98, %98 : vector<14x384xf32>
    %cst_51 = arith.constant dense<0.000000e+00> : vector<14xf32>
    %100 = vector.multi_reduction <add>, %99, %cst_51 [1] : vector<14x384xf32> to vector<14xf32>
    %101 = vector.shape_cast %100 : vector<14xf32> to vector<14x1xf32>
    %cst_52 = arith.constant 8.400000e+01 : f32
    %102 = vector.broadcast %cst_52 : f32 to vector<14x1xf32>
    %103 = arith.mulf %102, %96 : vector<14x1xf32>
    %104 = arith.mulf %103, %96 : vector<14x1xf32>
    %105 = arith.subf %101, %104 : vector<14x1xf32>
    %cst_53 = arith.constant 0.00333333341 : f32
    %106 = vector.broadcast %cst_53 : f32 to vector<14x1xf32>
    %107 = arith.mulf %105, %106 : vector<14x1xf32>
    %cst_54 = arith.constant 9.99999974E-6 : f32
    %108 = vector.broadcast %cst_54 : f32 to vector<14x1xf32>
    %109 = arith.addf %107, %108 : vector<14x1xf32>
    %110 = math.rsqrt %109 : vector<14x1xf32>
    %111 = vector.broadcast %110 : vector<14x1xf32> to vector<14x384xf32>
    %112 = arith.mulf %98, %111 : vector<14x384xf32>
    %113 = vector.broadcast %91 : vector<1x384xf32> to vector<14x384xf32>
    %114 = arith.mulf %112, %113 : vector<14x384xf32>
    %115 = vector.broadcast %92 : vector<1x384xf32> to vector<14x384xf32>
    %116 = arith.addf %114, %115 : vector<14x384xf32>
    %c0_55 = arith.constant 0 : index
    %c0_56 = arith.constant 0 : index
    %c0_57 = arith.constant 0 : index
    %117 = vector.load %arg15[%c0_55, %c0_56, %c0_57] : memref<1x14x384xf32, #tpu.memory_space<vmem>>, vector<1x14x384xf32>
    %118 = vector.shape_cast %117 : vector<1x14x384xf32> to vector<14x384xf32>
    %119 = vector.shape_cast %116 : vector<14x384xf32> to vector<1x14x384xf32>
    tpu.vector_store %arg15[%c0_55, %c0_56, %c0_57], %119 {strides = array<i32>} : memref<1x14x384xf32, #tpu.memory_space<vmem>>, vector<1x14x384xf32>,
    return
  }
  func.func @transform_0(%arg0: i32) -> (i32, i32, i32) {
    %c0_i32 = arith.constant 0 : i32
    %c0_i32_0 = arith.constant 0 : i32
    %c0_i32_1 = arith.constant 0 : i32
    return %arg0, %c0_i32, %c0_i32_0 : i32, i32, i32
  }
  func.func @transform_1(%arg0: i32) -> (i32, i32, i32, i32) {
    %c0_i32 = arith.constant 0 : i32
    %c0_i32_0 = arith.constant 0 : i32
    %c0_i32_1 = arith.constant 0 : i32
    %c0_i32_2 = arith.constant 0 : i32
    return %arg0, %c0_i32, %c0_i32_0, %c0_i32_1 : i32, i32, i32, i32
  }
  func.func @transform_2(%arg0: i32) -> (i32, i32) {
    %c0_i32 = arith.constant 0 : i32
    %c0_i32_0 = arith.constant 0 : i32
    %c0_i32_1 = arith.constant 0 : i32
    return %c0_i32, %c0_i32_0 : i32, i32
  }
  func.func @transform_3(%arg0: i32) -> (i32, i32) {
    %c0_i32 = arith.constant 0 : i32
    %c0_i32_0 = arith.constant 0 : i32
    %c0_i32_1 = arith.constant 0 : i32
    return %c0_i32, %c0_i32_0 : i32, i32
  }
  func.func @transform_4(%arg0: i32) -> (i32, i32) {
    %c0_i32 = arith.constant 0 : i32
    %c0_i32_0 = arith.constant 0 : i32
    %c0_i32_1 = arith.constant 0 : i32
    return %c0_i32, %c0_i32_0 : i32, i32
  }
  func.func @transform_5(%arg0: i32) -> (i32, i32) {
    %c0_i32 = arith.constant 0 : i32
    %c0_i32_0 = arith.constant 0 : i32
    %c0_i32_1 = arith.constant 0 : i32
    return %c0_i32, %c0_i32_0 : i32, i32
  }
  func.func @transform_6(%arg0: i32) -> (i32, i32) {
    %c0_i32 = arith.constant 0 : i32
    %c0_i32_0 = arith.constant 0 : i32
    %c0_i32_1 = arith.constant 0 : i32
    return %c0_i32, %c0_i32_0 : i32, i32
  }
  func.func @transform_7(%arg0: i32) -> (i32, i32) {
    %c0_i32 = arith.constant 0 : i32
    %c0_i32_0 = arith.constant 0 : i32
    %c0_i32_1 = arith.constant 0 : i32
    return %c0_i32, %c0_i32_0 : i32, i32
  }
  func.func @transform_8(%arg0: i32) -> (i32, i32) {
    %c0_i32 = arith.constant 0 : i32
    %c0_i32_0 = arith.constant 0 : i32
    %c0_i32_1 = arith.constant 0 : i32
    return %c0_i32, %c0_i32_0 : i32, i32
  }
  func.func @transform_9(%arg0: i32) -> (i32, i32) {
    %c0_i32 = arith.constant 0 : i32
    %c0_i32_0 = arith.constant 0 : i32
    %c0_i32_1 = arith.constant 0 : i32
    return %c0_i32, %c0_i32_0 : i32, i32
  }
  func.func @transform_10(%arg0: i32) -> (i32, i32) {
    %c0_i32 = arith.constant 0 : i32
    %c0_i32_0 = arith.constant 0 : i32
    %c0_i32_1 = arith.constant 0 : i32
    return %c0_i32, %c0_i32_0 : i32, i32
  }
  func.func @transform_11(%arg0: i32) -> (i32, i32) {
    %c0_i32 = arith.constant 0 : i32
    %c0_i32_0 = arith.constant 0 : i32
    %c0_i32_1 = arith.constant 0 : i32
    return %c0_i32, %c0_i32_0 : i32, i32
  }
  func.func @transform_12(%arg0: i32) -> (i32, i32) {
    %c0_i32 = arith.constant 0 : i32
    %c0_i32_0 = arith.constant 0 : i32
    %c0_i32_1 = arith.constant 0 : i32
    return %c0_i32, %c0_i32_0 : i32, i32
  }
  func.func @transform_13(%arg0: i32) -> (i32, i32) {
    %c0_i32 = arith.constant 0 : i32
    %c0_i32_0 = arith.constant 0 : i32
    %c0_i32_1 = arith.constant 0 : i32
    return %c0_i32, %c0_i32_0 : i32, i32
  }
  func.func @transform_14(%arg0: i32) -> (i32, i32, i32) {
    %c0_i32 = arith.constant 0 : i32
    %c0_i32_0 = arith.constant 0 : i32
    %c0_i32_1 = arith.constant 0 : i32
    return %arg0, %c0_i32, %c0_i32_0 : i32, i32, i32
  }
}

</mosaic_0001>

<bundles_post_ra>
// kernel: tpu_custom_call.1
= control target key start
LH: loop header
LB: loop body
LE: loop exit
PB: predicated region body
PF: predicated region fallthrough
CT: control target
= control target key end

     0   :  { %s10297_s0 = inlined_call_operand.vmem [shape: f32[2,14,384], index: 0, kind: input, shape index: {}]   ;;  %s10298_s1 = inlined_call_operand.vmem [shape: bf16[2,14,10,14], index: 1, kind: input, shape index: {}]   ;;  %s10299_s2 = inlined_call_operand.hbm [shape: bf16[384,1152], index: 2, kind: input, shape index: {}]   ;;  %s10300_s3 = inlined_call_operand.hbm [shape: bf16[384,384], index: 3, kind: input, shape index: {}]   ;;  %s10301_s4 = inlined_call_operand.vmem [shape: bf16[10,384], index: 4, kind: input, shape index: {}]   ;;  %s10302_s5 = inlined_call_operand.vmem [shape: bf16[10,384], index: 5, kind: input, shape index: {}]   ;;  %s10303_s6 = inlined_call_operand.vmem [shape: f32[1,384], index: 6, kind: input, shape index: {}]   ;;  %s10304_s7 = inlined_call_operand.vmem [shape: f32[1,384], index: 7, kind: input, shape index: {}]   ;;  %s10305_s8 = inlined_call_operand.hbm [shape: bf16[384,768], index: 8, kind: input, shape index: {}]   ;;  %s10306_s9 = inlined_call_operand.vmem [shape: f32[1,768], index: 9, kind: input, shape index: {}]   ;;  %s10307_s10 = inlined_call_operand.hbm [shape: bf16[768,384], index: 10, kind: input, shape index: {}]   ;;  %s10308_s11 = inlined_call_operand.vmem [shape: f32[1,384], index: 11, kind: input, shape index: {}]   ;;  %s10309_s12 = inlined_call_operand.vmem [shape: f32[1,384], index: 12, kind: input, shape index: {}]   ;;  %s10310_s13 = inlined_call_operand.vmem [shape: f32[1,384], index: 13, kind: input, shape index: {}]   ;;  %s10311_s14 = inlined_call_operand.vmem [shape: f32[2,14,384], index: 14, kind: output, shape index: {}]  }
   0x1   :  { %10332 = sst [smem:[#allocation23_spill]] %s10310_s13 }
   0x2   :  { %10333 = sst [smem:[#allocation24_spill]] %s10311_s14 }
   0x3   :  { %19 = vsyncpa [#allocation3], 0 }
   0x4   :  { %20 = vsyncpa [#allocation5], 0 }
   0x5   :  { %21 = vsyncpa [#allocation8], 0  ;;  %s9390_s29 = smov 0  }
   0x6 LB: > { %10334 = sst [smem:[#allocation12_spill]] %s9297_s29  ;;  %s9299_s30 = smov [#allocation4]   ;;  %s9297_s29 = sphi %s9390_s29, %s27_s29  }
   0x7   : > { %s387_s15 = sshll.u32 %s9299_s30, 4  ;;  %s9396_s16 = sadd.s32 4294967295, %s9297_s29   ;;  %s9401_s15 = int_to_ptr.vmem [resolvable:$true] %s387_s15 }
   0x8   : > { %p7358_p0 = scmp.ge.s32.totalorder %s9297_s29, 1  ;;  %p362_p1 = scmp.lt.s32.totalorder %s9297_s29, 3 }
   0x9   : > { %p10314_p2 = scmp.eq.s32.totalorder %s9396_s16, 0  ;;  %s9300_s18 = smov [#allocation2]  }
   0xa   : > { %p9403_p3 = pnand %p7358_p0, %p362_p1  ;;  %s374_s19 = sshll.u32 %s9300_s18, 4  ;;  %s9409_s19 = int_to_ptr.vmem [resolvable:$true] %s374_s19 }
   0xb   : > { %s9301_s21 = smov [#allocation6]   ;;  %s9167_s25 = scalar_lea.hbm %s10300_s3, 9216 }
   0xc   : > { %s10335_s17 = scalar_select %p9403_p3, 1, 0 }
   0xd   : > { %p8276_p4 = pneg %p9403_p3  ;;  %s9417_s22 = sshll.u32 %s9301_s21, 4  ;;  %s413_s22 = int_to_ptr.vmem [resolvable:$true] %s9417_s22 }
   0xe   : > { %p9168_p6 = scmp.ne.s32.totalorder %s10300_s3, %s9167_s25  ;;  %p9174_p10 = scmp.lt.u32.totalorder %s9167_s25, %s10300_s3 }
   0xf   : > { %p9413_p5 = pnand %p10314_p2, %p8276_p4 }
  0x11   : > { %p9427_p7 = pneg %p9413_p5 }
  0x13   : > { %p9170_p8 = pnand %p9427_p7, %p9168_p6 }
  0x15   : > { %p9171_p9 = pneg %p9170_p8 }
  0x17   : > { %p9176_p11 = pnand %p9174_p10, %p9171_p9 }
  0x19   : > { %9179 = shalt.err (!%p9176_p11)
}
  0x1a   : > { %s9180_s21 = scalar_lea.vmem %s9401_s15, 9216  ;;  %p9188_p1 = scmp.lt.s32.totalorder %s9401_s15, %s9401_s15 }
  0x1b   : > { %p9181_p12 = scmp.ne.s32.totalorder %s9401_s15, %s9180_s21  ;;  %p9189_p4 = scmp.lt.s32.totalorder %s9180_s21, %s9180_s21 }
  0x1d   : > { %p9183_p13 = pnand %p9181_p12, %p9427_p7  ;;  %p9190_p6 = por %p9189_p4, %p9188_p1 }
  0x1f   : > { %p9184_p0 = pneg %p9183_p13 }
  0x21   : > { %p9191_p8 = pnand %p9190_p6, %p9184_p0 }
  0x23   : > { %9194 = shalt.err (!%p9191_p8)
}
  0x24   : > { %s10313_s23 = smov 192   ;;  %s10316_s24 = smov 12  }
  0x25   : > { %8282 = dma.hbm_to_vmem [thread:$0]  (!%p9413_p5), %s10300_s3, 9216, %s9401_s15, [#allocation5], %s10313_s23, %s10313_s23, %s10316_s24  }
  0x26   : > { %s9195_s18 = scalar_lea.hbm %s10299_s2, 27648 }
  0x27   : > { %p9196_p9 = scmp.ne.s32.totalorder %s10299_s2, %s9195_s18  ;;  %p9202_p12 = scmp.lt.u32.totalorder %s9195_s18, %s10299_s2 }
  0x29   : > { %p9198_p10 = pnand %p9196_p9, %p9427_p7 }
  0x2b   : > { %p9199_p11 = pneg %p9198_p10 }
  0x2d   : > { %p9204_p13 = pnand %p9202_p12, %p9199_p11 }
  0x2f   : > { %9207 = shalt.err (!%p9204_p13)
}
  0x30   : > { %s9208_s15 = scalar_lea.vmem %s9409_s19, 27648  ;;  %p9216_p6 = scmp.lt.s32.totalorder %s9409_s19, %s9409_s19 }
  0x31   : > { %p9209_p0 = scmp.ne.s32.totalorder %s9409_s19, %s9208_s15  ;;  %p9217_p8 = scmp.lt.s32.totalorder %s9208_s15, %s9208_s15 }
  0x33   : > { %p9211_p1 = pnand %p9209_p0, %p9427_p7  ;;  %p9218_p9 = por %p9217_p8, %p9216_p6 }
  0x35   : > { %p9212_p4 = pneg %p9211_p1 }
  0x37   : > { %p9219_p10 = pnand %p9218_p9, %p9212_p4 }
  0x39   : > { %9222 = shalt.err (!%p9219_p10)
}
  0x3a   : > { %s9304_s29 = smov 576   ;;  %s9305_s13 = smov 36  }
  0x3b   : > { %8279 = dma.hbm_to_vmem [thread:$0]  (!%p9413_p5), %s10299_s2, 27648, %s9409_s19, [#allocation3], %s9304_s29, %s9304_s29, %s9305_s13  }
  0x3c   : > { %s9223_s30 = scalar_lea.hbm %s10305_s8, 18432 }
  0x3d   : > { %p9224_p11 = scmp.ne.s32.totalorder %s10305_s8, %s9223_s30  ;;  %p9230_p0 = scmp.lt.u32.totalorder %s9223_s30, %s10305_s8 }
  0x3f   : > { %p9226_p12 = pnand %p9224_p11, %p9427_p7 }
  0x41   : > { %p9227_p13 = pneg %p9226_p12 }
  0x43   : > { %p9232_p1 = pnand %p9230_p0, %p9227_p13 }
  0x45   : > { %9235 = shalt.err (!%p9232_p1)
}
  0x46   : > { %s9236_s14 = scalar_lea.vmem %s413_s22, 18432  ;;  %p9244_p9 = scmp.lt.s32.totalorder %s413_s22, %s413_s22 }
  0x47   : > { %p9237_p4 = scmp.ne.s32.totalorder %s413_s22, %s9236_s14  ;;  %p9245_p10 = scmp.lt.s32.totalorder %s9236_s14, %s9236_s14 }
  0x49   : > { %p9239_p6 = pnand %p9237_p4, %p9427_p7  ;;  %p9246_p2 = por %p9245_p10, %p9244_p9 }
  0x4b   : > { %p9240_p8 = pneg %p9239_p6 }
  0x4d   : > { %p9247_p3 = pnand %p9246_p2, %p9240_p8 }
  0x4f   : > { %9250 = shalt.err (!%p9247_p3)
}
  0x50   : > { %s9306_s19 = smov 384   ;;  %s9307_s29 = smov 24  }
  0x51   : > { %8285 = dma.hbm_to_vmem [thread:$0]  (!%p9413_p5), %s10305_s8, 18432, %s413_s22, [#allocation5], %s9306_s19, %s9306_s19, %s9307_s29  }
  0x52   : > { %s9308_s25 = smov [#allocation7]   ;;  %s9251_s18 = scalar_lea.hbm %s10307_s10, 18432 }
  0x53   : > { %s428_s26 = sshll.u32 %s9308_s25, 4  ;;  %p9252_p2 = scmp.ne.s32.totalorder %s10307_s10, %s9251_s18  ;;  %s429_s26 = int_to_ptr.vmem [resolvable:$true] %s428_s26 }
  0x54   : > { %p9258_p12 = scmp.lt.u32.totalorder %s9251_s18, %s10307_s10 }
  0x55   : > { %p9254_p3 = pnand %p9252_p2, %p9427_p7 }
  0x57   : > { %p9255_p11 = pneg %p9254_p3 }
  0x59   : > { %p9260_p13 = pnand %p9258_p12, %p9255_p11 }
  0x5b   : > { %9263 = shalt.err (!%p9260_p13)
}
  0x5c   : > { %s9264_s22 = scalar_lea.vmem %s429_s26, 18432  ;;  %p9272_p6 = scmp.lt.s32.totalorder %s429_s26, %s429_s26 }
  0x5d   : > { %p9265_p0 = scmp.ne.s32.totalorder %s429_s26, %s9264_s22  ;;  %p9273_p8 = scmp.lt.s32.totalorder %s9264_s22, %s9264_s22 }
  0x5f   : > { %p9267_p1 = pnand %p9265_p0, %p9427_p7  ;;  %p9274_p9 = por %p9273_p8, %p9272_p6 }
  0x61   : > { %p9268_p4 = pneg %p9267_p1 }
  0x63   : > { %p9275_p10 = pnand %p9274_p9, %p9268_p4 }
  0x65   : > { %9278 = shalt.err (!%p9275_p10)
}
  0x66   : > { %s10338_s19 = smov 12   ;;  %s10339_s29 = smov 192  }
  0x67   : > { %8288 = dma.hbm_to_vmem [thread:$0]  (!%p9413_p5), %s10307_s10, 18432, %s429_s26, [#allocation8], %s10339_s29, %s10339_s29, %s10338_s19  }
  0x68   : > { %p10340_p2 = scmp.ne.s32.totalorder %s10335_s17, 0 }
  0x6a   : > { %469 = sbr.rel (%p10340_p2) target bundleno = 3126 (0xc36), region = 76 }
  0x71   : > { %p10341_p7 = scmp.eq.s32.totalorder %s9396_s16, 0 }
  0x73   : > { %9284 = dma.done.wait (%p10341_p7), [#allocation3], 27648   ;;  %p10342_p3 = pmov %p10341_p7 }
  0x75   : > { %9286 = vsyncadd (%p10342_p3), [#allocation3], 4294939648  ;;  %p10343_p11 = pmov %p10342_p3 }
  0x76   : > { %p10344_p12 = pmov %p10342_p3 }
  0x77   : > { %9288 = dma.done.wait (%p10343_p11), [#allocation5], 27648  }
  0x78   : > { %9290 = vsyncadd (%p10344_p12), [#allocation5], 4294939648  ;;  %p10345_p13 = pmov %p10342_p3 }
  0x79   : > { %p10346_p5 = pmov %p10342_p3 }
  0x7a   : > { %9292 = dma.done.wait (%p10345_p13), [#allocation8], 18432  }
  0x7b   : > { %9294 = vsyncadd (%p10346_p5), [#allocation8], 4294948864  ;;  %v8321_v0 = vld [vmem:[#allocation2 + $0x4] ss:$36 sps:$4 sm:$0xff]   ;;  %v8323_v1 = vld [vmem:[#allocation2 + $0xc] ss:$36 sps:$4 sm:$0xff]  }
  0x7c   : > { %1929 = vmatprep.subr.bf16.mxu0 %v8321_v0  ;;  %v8325_v2 = vld [vmem:[#allocation2] ss:$36 sps:$4 sm:$0xff]   ;;  %v8326_v3 = vld [vmem:[#allocation2 + $0x8] ss:$36 sps:$4 sm:$0xff]   ;;  %2015 = vmatprep.subr.bf16.mxu1 %v8323_v1  ;;  %v8329_v5 = vld [vmem:[#allocation2 + $0x54] ss:$36 sps:$4 sm:$0xff]  }
  0x7d   : > { %v8327_v4 = vld [vmem:[#allocation2 + $0x4c] ss:$36 sps:$4 sm:$0xff]   ;;  %1930 = vmatpush1.bf16.msra.mxu0 %v8325_v2  ;;  %2016 = vmatpush1.bf16.msra.mxu1 %v8326_v3  ;;  %v8333_v8 = vld [vmem:[#allocation2 + $0x94] ss:$36 sps:$4 sm:$0xff]   ;;  %v8335_v9 = vld [vmem:[#allocation2 + $0x9c] ss:$36 sps:$4 sm:$0xff]  }
  0x7e   : > { %v8331_v6 = vld [vmem:[#allocation2 + $0x48] ss:$36 sps:$4 sm:$0xff]   ;;  %1931 = vmatprep.subr.bf16.mxu0 %v8327_v4  ;;  %v8332_v7 = vld [vmem:[#allocation2 + $0x50] ss:$36 sps:$4 sm:$0xff]   ;;  %2017 = vmatprep.subr.bf16.mxu1 %v8329_v5  ;;  %v8338_v11 = vld [vmem:[#allocation2 + $0x98] ss:$36 sps:$4 sm:$0xff]  }
  0x7f   : > { %v8337_v10 = vld [vmem:[#allocation2 + $0x90] ss:$36 sps:$4 sm:$0xff]   ;;  %v8339_v12 = vld [vmem:[#allocation2 + $0xdc] ss:$36 sps:$4 sm:$0xff]   ;;  %v8341_v13 = vld [vmem:[#allocation2 + $0xe4] ss:$36 sps:$4 sm:$0xff]  }
  0x80   : > { %v8343_v14 = vld [vmem:[#allocation2 + $0xd8] ss:$36 sps:$4 sm:$0xff]   ;;  %v8344_v15 = vld [vmem:[#allocation2 + $0xe0] ss:$36 sps:$4 sm:$0xff]   ;;  %v8347_v17 = vld [vmem:[#allocation2 + $0x12c] ss:$36 sps:$4 sm:$0xff]  }
  0x81   : > { %1932 = vmatpush1.bf16.msra.mxu0 %v8331_v6  ;;  %2018 = vmatpush1.bf16.msra.mxu1 %v8332_v7  ;;  %v8345_v16 = vld [vmem:[#allocation2 + $0x124] ss:$36 sps:$4 sm:$0xff]   ;;  %v8351_v20 = vld [vmem:[#allocation2 + $0x16c] ss:$36 sps:$4 sm:$0xff]   ;;  %v8353_v21 = vld [vmem:[#allocation2 + $0x174] ss:$36 sps:$4 sm:$0xff]  }
  0x82   : > { %1933 = vmatprep.subr.bf16.mxu0 %v8333_v8  ;;  %2019 = vmatprep.subr.bf16.mxu1 %v8335_v9  ;;  %v8349_v18 = vld [vmem:[#allocation2 + $0x120] ss:$36 sps:$4 sm:$0xff]   ;;  %v8350_v19 = vld [vmem:[#allocation2 + $0x128] ss:$36 sps:$4 sm:$0xff]   ;;  %v8356_v23 = vld [vmem:[#allocation2 + $0x170] ss:$36 sps:$4 sm:$0xff]  }
  0x83   : > { %v8355_v22 = vld [vmem:[#allocation2 + $0x168] ss:$36 sps:$4 sm:$0xff]   ;;  %v8357_v24 = vld [vmem:[#allocation2 + $0x1b4] ss:$36 sps:$4 sm:$0xff]   ;;  %v8359_v25 = vld [vmem:[#allocation2 + $0x1bc] ss:$36 sps:$4 sm:$0xff]  }
  0x84   : > { %v8361_v26 = vld [vmem:[#allocation2 + $0x1b0] ss:$36 sps:$4 sm:$0xff]   ;;  %v8362_v27 = vld [vmem:[#allocation2 + $0x1b8] ss:$36 sps:$4 sm:$0xff]   ;;  %v8365_v29 = vld [vmem:[#allocation2 + $0x204] ss:$36 sps:$4 sm:$0xff]  }
  0x85   : > { %1934 = vmatpush1.bf16.msra.mxu0 %v8337_v10  ;;  %2020 = vmatpush1.bf16.msra.mxu1 %v8338_v11  ;;  %v8363_v28 = vld [vmem:[#allocation2 + $0x1fc] ss:$36 sps:$4 sm:$0xff]   ;;  %p532_p0 = scmp.lt.s32.totalorder %s9396_s16, 1  ;;  %v8369_v32 = vld [vmem:[#allocation2 + $0x244] ss:$36 sps:$4 sm:$0xff]   ;;  %vm9311_vm0 = vmmov 0  }
  0x86   : > { %1935 = vmatprep.subr.bf16.mxu0 %v8339_v12  ;;  %2021 = vmatprep.subr.bf16.mxu1 %v8341_v13  ;;  %v8367_v30 = vld [vmem:[#allocation2 + $0x1f8] ss:$36 sps:$4 sm:$0xff]   ;;  %v8368_v31 = vld [vmem:[#allocation2 + $0x200] ss:$36 sps:$4 sm:$0xff]   ;;  %v8371_v33 = vld [vmem:[#allocation2 + $0x24c] ss:$36 sps:$4 sm:$0xff]  }
  0x87   : > { %v8373_v34 = vld [vmem:[#allocation2 + $0x240] ss:$36 sps:$4 sm:$0xff]   ;;  %v8374_v35 = vld [vmem:[#allocation2 + $0x248] ss:$36 sps:$4 sm:$0xff]   ;;  %s10377_s16 = smov (!%p532_p0, %s9396_s16), 1  ;;  %vm3783_vm1 = vcmask 1044480  }
  0x88   : > { %v8375_v36 = vld [vmem:[#allocation2 + $0x28c] ss:$36 sps:$4 sm:$0xff]   ;;  %v8377_v37 = vld [vmem:[#allocation2 + $0x294] ss:$36 sps:$4 sm:$0xff]   ;;  %s8258_s17 = smul.u32 48, %s10377_s16  ;;  %vm3880_vm2 = vcmask 1046528  }
  0x89   : > { %1936 = vmatpush1.bf16.msra.mxu0 %v8343_v14  ;;  %2022 = vmatpush1.bf16.msra.mxu1 %v8344_v15  ;;  %v8379_v38 = vld [vmem:[#allocation2 + $0x288] ss:$36 sps:$4 sm:$0xff]   ;;  %v8380_v39 = vld [vmem:[#allocation2 + $0x290] ss:$36 sps:$4 sm:$0xff]   ;;  %v8383_v41 = vld [vmem:[#allocation2 + $0x2dc] ss:$36 sps:$4 sm:$0xff]  }
  0x8a   : > { %1937 = vmatprep.subr.bf16.mxu0 %v8345_v16  ;;  %2023 = vmatprep.subr.bf16.mxu1 %v8347_v17  ;;  %v8381_v40 = vld [vmem:[#allocation2 + $0x2d4] ss:$36 sps:$4 sm:$0xff]   ;;  %s9538_s13 = scalar_lea.vmem %s10297_s0, %s8258_s17  ;;  %v8387_v44 = vld [vmem:[#allocation2 + $0x31c] ss:$36 sps:$4 sm:$0xff]   ;;  %v8389_v45 = vld [vmem:[#allocation2 + $0x324] ss:$36 sps:$4 sm:$0xff]  }
  0x8b   : > { %v8385_v42 = vld [vmem:[#allocation2 + $0x2d0] ss:$36 sps:$4 sm:$0xff]   ;;  %v8386_v43 = vld [vmem:[#allocation2 + $0x2d8] ss:$36 sps:$4 sm:$0xff]   ;;  %v549_v46 = vld [vmem:[%s9538_s13 + $0x8] sm:$0xff]  ;;  %v10317_v16 = vmov 0  }
  0x8c   : > { %v552_v47 = vld [vmem:[%s9538_s13 + $0x20] sm:$0x3f]  ;;  %v8391_v48 = vld [vmem:[#allocation2 + $0x318] ss:$36 sps:$4 sm:$0xff]   ;;  %v8395_v52 = vld [vmem:[#allocation2 + $0x36c] ss:$36 sps:$4 sm:$0xff]  }
  0x8d   : > { %1938 = vmatpush1.bf16.msra.mxu0 %v8349_v18  ;;  %2024 = vmatpush1.bf16.msra.mxu1 %v8350_v19  ;;  %v8392_v49 = vld [vmem:[#allocation2 + $0x320] ss:$36 sps:$4 sm:$0xff]   ;;  %v9542_v50 = vpack.c.bf16 %v552_v47, %v549_v46  ;;  %v8398_v54 = vld [vmem:[#allocation2 + $0x368] ss:$36 sps:$4 sm:$0xff]   ;;  %v8401_v56 = vld [vmem:[#allocation2 + $0x3b4] ss:$36 sps:$4 sm:$0xff]  }
  0x8e   : > { %1939 = vmatprep.subr.bf16.mxu0 %v8351_v20  ;;  %2025 = vmatprep.subr.bf16.mxu1 %v8353_v21  ;;  %v8393_v51 = vld [vmem:[#allocation2 + $0x364] ss:$36 sps:$4 sm:$0xff]   ;;  %v8399_v55 = vld [vmem:[#allocation2 + $0x3ac] ss:$36 sps:$4 sm:$0xff]   ;;  %v8405_v59 = vld [vmem:[#allocation2 + $0x3f4] ss:$36 sps:$4 sm:$0xff]  }
  0x8f   : > { %1961 = vmatprep.mubr.bf16.mxu0 %v9542_v50  ;;  %2047 = vmatprep.mubr.bf16.mxu1 %v9542_v50  ;;  %v8397_v53 = vld [vmem:[#allocation2 + $0x360] ss:$36 sps:$4 sm:$0xff]   ;;  %v8403_v57 = vld [vmem:[#allocation2 + $0x3a8] ss:$36 sps:$4 sm:$0xff]   ;;  %v8404_v58 = vld [vmem:[#allocation2 + $0x3b0] ss:$36 sps:$4 sm:$0xff]  }
  0x90   : > { %v8407_v60 = vld [vmem:[#allocation2 + $0x3fc] ss:$36 sps:$4 sm:$0xff]   ;;  %v8409_v61 = vld [vmem:[#allocation2 + $0x3f0] ss:$36 sps:$4 sm:$0xff]   ;;  %v8413_v0 = vld [vmem:[#allocation2 + $0x444] ss:$36 sps:$4 sm:$0xff]  }
  0x91   : > { %1940 = vmatpush1.bf16.msra.mxu0 %v8355_v22  ;;  %2026 = vmatpush1.bf16.msra.mxu1 %v8356_v23  ;;  %v8410_v62 = vld [vmem:[#allocation2 + $0x3f8] ss:$36 sps:$4 sm:$0xff]   ;;  %v8416_v2 = vld [vmem:[#allocation2 + $0x440] ss:$36 sps:$4 sm:$0xff]   ;;  %v8422_v6 = vld [vmem:[#allocation2 + $0x48c] ss:$36 sps:$4 sm:$0xff]  }
  0x92   : > { %1941 = vmatprep.subr.bf16.mxu0 %v8357_v24  ;;  %2027 = vmatprep.subr.bf16.mxu1 %v8359_v25  ;;  %v8411_v63 = vld [vmem:[#allocation2 + $0x43c] ss:$36 sps:$4 sm:$0xff]   ;;  %v8419_v3 = vld [vmem:[#allocation2 + $0x484] ss:$36 sps:$4 sm:$0xff]   ;;  %v8425_v10 = vld [vmem:[#allocation2 + $0x4cc] ss:$36 sps:$4 sm:$0xff]  }
  0x93   : > { %v8415_v1 = vld [vmem:[#allocation2 + $0x438] ss:$36 sps:$4 sm:$0xff]   ;;  %v548_v4 = vld [vmem:[%s9538_s13] sm:$0xff]  ;;  %v8420_v9 = vld [vmem:[#allocation2 + $0x488] ss:$36 sps:$4 sm:$0xff]   ;;  %s8259_s29 = smul.u32 112, %s10377_s16 }
  0x94   : > { %v551_v5 = vld [vmem:[%s9538_s13 + $0x18] sm:$0x3f]  ;;  %v8417_v7 = vld [vmem:[#allocation2 + $0x480] ss:$36 sps:$4 sm:$0xff]   ;;  %v8423_v12 = vld [vmem:[#allocation2 + $0x4c8] ss:$36 sps:$4 sm:$0xff]  }
  0x95   : > { %1942 = vmatpush1.bf16.msra.mxu0 %v8361_v26  ;;  %2028 = vmatpush1.bf16.msra.mxu1 %v8362_v27  ;;  %v9548_v8 = vpack.c.bf16 %v551_v5, %v548_v4  ;;  %v8428_v11 = vld [vmem:[#allocation2 + $0x4d4] ss:$36 sps:$4 sm:$0xff]   ;;  %v8434_v15 = vld [vmem:[#allocation2 + $0x51c] ss:$36 sps:$4 sm:$0xff]   ;;  %v8440_v20 = vld [vmem:[#allocation2 + $0x564] ss:$36 sps:$4 sm:$0xff]   ;;  %s9657_s20 = scalar_lea.vmem %s10298_s1, %s8259_s29 }
  0x96   : > { %1943 = vmatprep.subr.bf16.mxu0 %v8363_v28  ;;  %2029 = vmatprep.subr.bf16.mxu1 %v8365_v29  ;;  %v8426_v13 = vld [vmem:[#allocation2 + $0x4d0] ss:$36 sps:$4 sm:$0xff]   ;;  %v8432_v18 = vld [vmem:[#allocation2 + $0x518] ss:$36 sps:$4 sm:$0xff]   ;;  %v8438_v22 = vld [vmem:[#allocation2 + $0x560] ss:$36 sps:$4 sm:$0xff]  }
  0x97   : > { %v8431_v14 = vld [vmem:[#allocation2 + $0x514] ss:$36 sps:$4 sm:$0xff]   ;;  %v8437_v19 = vld [vmem:[#allocation2 + $0x55c] ss:$36 sps:$4 sm:$0xff]   ;;  %v8443_v23 = vld [vmem:[#allocation2 + $0x5a4] ss:$36 sps:$4 sm:$0xff]  }
  0x98   : > { %v8429_v17 = vld [vmem:[#allocation2 + $0x510] ss:$36 sps:$4 sm:$0xff]   ;;  %v8435_v21 = vld [vmem:[#allocation2 + $0x558] ss:$36 sps:$4 sm:$0xff]   ;;  %v8441_v25 = vld [vmem:[#allocation2 + $0x5a0] ss:$36 sps:$4 sm:$0xff]  }
  0x99   : > { %1944 = vmatpush1.bf16.msra.mxu0 %v8367_v30  ;;  %2030 = vmatpush1.bf16.msra.mxu1 %v8368_v31  ;;  %v8446_v24 = vld [vmem:[#allocation2 + $0x5ac] ss:$36 sps:$4 sm:$0xff]   ;;  %v8452_v28 = vld [vmem:[#allocation2 + $0x5f4] ss:$36 sps:$4 sm:$0xff]   ;;  %v8470_v46 = vld [vmem:[#allocation2 + $0x5c] ss:$36 sps:$4 sm:$0xff]  }
  0x9a   : > { %1945 = vmatprep.subr.bf16.mxu0 %v8369_v32  ;;  %2031 = vmatprep.subr.bf16.mxu1 %v8371_v33  ;;  %v8444_v26 = vld [vmem:[#allocation2 + $0x5a8] ss:$36 sps:$4 sm:$0xff]   ;;  %v8450_v30 = vld [vmem:[#allocation2 + $0x5f0] ss:$36 sps:$4 sm:$0xff]   ;;  %v8458_v32 = vld [vmem:[#allocation2 + $0x63c] ss:$36 sps:$4 sm:$0xff]  }
  0x9b   : > { %v8449_v27 = vld [vmem:[#allocation2 + $0x5ec] ss:$36 sps:$4 sm:$0xff]   ;;  %v8455_v31 = vld [vmem:[#allocation2 + $0x634] ss:$36 sps:$4 sm:$0xff]   ;;  %v8506_v47 = vld [vmem:[#allocation2 + $0x64] ss:$36 sps:$4 sm:$0xff]  }
  0x9c   : > { %v8447_v29 = vld [vmem:[#allocation2 + $0x5e8] ss:$36 sps:$4 sm:$0xff]   ;;  %v8453_v33 = vld [vmem:[#allocation2 + $0x630] ss:$36 sps:$4 sm:$0xff]   ;;  %v8483_v5 = vld [vmem:[#allocation2 + $0x1c0] ss:$36 sps:$4 sm:$0xff]  }
  0x9d   : > { %1946 = vmatpush1.bf16.msra.mxu0 %v8373_v34  ;;  %2032 = vmatpush1.bf16.msra.mxu1 %v8374_v35  ;;  %v8456_v34 = vld [vmem:[#allocation2 + $0x638] ss:$36 sps:$4 sm:$0xff]   ;;  %v8536_v4 = vld [vmem:[#allocation2 + $0x1cc] ss:$36 sps:$4 sm:$0xff]   ;;  %vm2865_vm3 = vcmask 113664   ;;  %vm2867_vm4 = vcmask 107520  }
  0x9e   : > { %1947 = vmatprep.subr.bf16.mxu0 %v8375_v36  ;;  %2033 = vmatprep.subr.bf16.mxu1 %v8377_v37  ;;  %v8461_v35 = vld [vmem:[#allocation2 + $0x67c] ss:$36 sps:$4 sm:$0xff]   ;;  %v8464_v36 = vld [vmem:[#allocation2 + $0x684] ss:$36 sps:$4 sm:$0xff]   ;;  %vm3007_vm5 = vcmask 1041409   ;;  %vm3009_vm6 = vcmask 1042434  }
  0x9f   : > { %v8459_v37 = vld [vmem:[#allocation2 + $0x678] ss:$36 sps:$4 sm:$0xff]   ;;  %vm3011_vm7 = vcmask 1043459   ;;  %vm3013_vm8 = vcmask 1044484   ;;  %vm3015_vm9 = vcmask 1045509   ;;  %vm3017_vm10 = vcmask 1046534  }
  0xa0   : > { %vm3019_vm11 = vcmask 1047559   ;;  %vm3115_vm12 = vcmask 111616   ;;  %vm3634_vm13 = vcmask 130112   ;;  %vm3779_vm14 = vcmask 80896   ;;  %s10373_s23 = sld [smem:[#allocation23_spill]]  ;;  %s10374_s25 = sld [smem:[#allocation24_spill]] }
  0xa1   : > { %1948 = vmatpush1.bf16.msra.mxu0 %v8379_v38  ;;  %2034 = vmatpush1.bf16.msra.mxu1 %v8380_v39  ;;  %v8462_v38 = vld [vmem:[#allocation2 + $0x680] ss:$36 sps:$4 sm:$0xff]   ;;  %v550_v39 = vld [vmem:[%s9538_s13 + $0x10] sm:$0xff]  ;;  %vm4637_vm15 = vcmask 1045504  }
  0xa2   : > { %1949 = vmatprep.subr.bf16.mxu0 %v8381_v40  ;;  %2035 = vmatprep.subr.bf16.mxu1 %v8383_v41  ;;  %v553_v40 = vld [vmem:[%s9538_s13 + $0x28] sm:$0x3f]  ;;  %v8467_v41 = vld [vmem:[#allocation2 + $0x14] ss:$36 sps:$4 sm:$0xff]  }
  0xa5   : > { %1950 = vmatpush1.bf16.msra.mxu0 %v8385_v42  ;;  %2036 = vmatpush1.bf16.msra.mxu1 %v8386_v43  ;;  %v8500_v42 = vld [vmem:[#allocation2 + $0x1c] ss:$36 sps:$4 sm:$0xff]   ;;  %v9556_v43 = vpack.c.bf16 %v553_v40, %v550_v39  ;;  %v8527_v40 = vld [vmem:[#allocation2 + $0x44c] ss:$36 sps:$4 sm:$0xff]  }
  0xa6   : > { %1951 = vmatprep.subr.bf16.mxu0 %v8387_v44  ;;  %2037 = vmatprep.subr.bf16.mxu1 %v8389_v45  ;;  %v8465_v44 = vld [vmem:[#allocation2 + $0x10] ss:$36 sps:$4 sm:$0xff]   ;;  %v8498_v45 = vld [vmem:[#allocation2 + $0x18] ss:$36 sps:$4 sm:$0xff]   ;;  %v8519_v39 = vld [vmem:[#allocation2 + $0x400] ss:$36 sps:$4 sm:$0xff]  }
  0xa9   : > { %1952 = vmatpush1.bf16.msra.mxu0 %v8391_v48  ;;  %2038 = vmatpush1.bf16.msra.mxu1 %v8392_v49  ;;  %v8468_v48 = vld [vmem:[#allocation2 + $0x58] ss:$36 sps:$4 sm:$0xff]   ;;  %v8504_v49 = vld [vmem:[#allocation2 + $0x60] ss:$36 sps:$4 sm:$0xff]  }
  0xaa   : > { %1953 = vmatprep.subr.bf16.mxu0 %v8393_v51  ;;  %2039 = vmatprep.subr.bf16.mxu1 %v8395_v52  ;;  %v8473_v51 = vld [vmem:[#allocation2 + $0xa4] ss:$36 sps:$4 sm:$0xff]   ;;  %v8512_v52 = vld [vmem:[#allocation2 + $0xac] ss:$36 sps:$4 sm:$0xff]  }
  0xad   : > { %1954 = vmatpush1.bf16.msra.mxu0 %v8397_v53  ;;  %2040 = vmatpush1.bf16.msra.mxu1 %v8398_v54  ;;  %v8471_v53 = vld [vmem:[#allocation2 + $0xa0] ss:$36 sps:$4 sm:$0xff]   ;;  %v8510_v54 = vld [vmem:[#allocation2 + $0xa8] ss:$36 sps:$4 sm:$0xff]  }
  0xae   : > { %1955 = vmatprep.subr.bf16.mxu0 %v8399_v55  ;;  %2041 = vmatprep.subr.bf16.mxu1 %v8401_v56  ;;  %v8476_v55 = vld [vmem:[#allocation2 + $0xec] ss:$36 sps:$4 sm:$0xff]   ;;  %v8518_v56 = vld [vmem:[#allocation2 + $0xf4] ss:$36 sps:$4 sm:$0xff]  }
  0xb1   : > { %1956 = vmatpush1.bf16.msra.mxu0 %v8403_v57  ;;  %2042 = vmatpush1.bf16.msra.mxu1 %v8404_v58  ;;  %v8474_v57 = vld [vmem:[#allocation2 + $0xe8] ss:$36 sps:$4 sm:$0xff]   ;;  %v8516_v58 = vld [vmem:[#allocation2 + $0xf0] ss:$36 sps:$4 sm:$0xff]  }
  0xb2   : > { %1957 = vmatprep.subr.bf16.mxu0 %v8405_v59  ;;  %2043 = vmatprep.subr.bf16.mxu1 %v8407_v60  ;;  %v8479_v59 = vld [vmem:[#allocation2 + $0x134] ss:$36 sps:$4 sm:$0xff]   ;;  %v8524_v60 = vld [vmem:[#allocation2 + $0x13c] ss:$36 sps:$4 sm:$0xff]  }
  0xb5   : > { %1958 = vmatpush1.bf16.msra.mxu0 %v8409_v61  ;;  %2044 = vmatpush1.bf16.msra.mxu1 %v8410_v62  ;;  %v8477_v61 = vld [vmem:[#allocation2 + $0x130] ss:$36 sps:$4 sm:$0xff]   ;;  %v8522_v62 = vld [vmem:[#allocation2 + $0x138] ss:$36 sps:$4 sm:$0xff]  }
  0xb6   : > { %1959 = vmatprep.subr.bf16.mxu0 %v8411_v63  ;;  %2045 = vmatprep.subr.bf16.mxu1 %v8413_v0  ;;  %v8482_v63 = vld [vmem:[#allocation2 + $0x17c] ss:$36 sps:$4 sm:$0xff]   ;;  %v8530_v0 = vld [vmem:[#allocation2 + $0x184] ss:$36 sps:$4 sm:$0xff]  }
  0xb9   : > { %1960 = vmatpush1.bf16.msra.mxu0 %v8415_v1  ;;  %2046 = vmatpush1.bf16.msra.mxu1 %v8416_v2  ;;  %v8480_v1 = vld [vmem:[#allocation2 + $0x178] ss:$36 sps:$4 sm:$0xff]   ;;  %v8528_v2 = vld [vmem:[#allocation2 + $0x180] ss:$36 sps:$4 sm:$0xff]  }
  0xba   : > { %1972 = vmatprep.subr.bf16.mxu0 %v8419_v3  ;;  %2058 = vmatprep.subr.bf16.mxu1 %v8422_v6  ;;  %v8485_v3 = vld [vmem:[#allocation2 + $0x1c4] ss:$36 sps:$4 sm:$0xff]  }
  0xbb   : > { %v8534_v6 = vld [vmem:[#allocation2 + $0x1c8] ss:$36 sps:$4 sm:$0xff]  }
  0xbc   : > { %1962 = vmatmul.mubr.bf16.vlgmr.msra.gmra.mrb[0].mxu0 %v9548_v8  ;;  %2048 = vmatmul.mubr.bf16.vlgmr.msra.gmra.mrb[0].mxu1 %v9548_v8 }
  0xbd   : > { %1973 = vmatpush1.bf16.msra.mxu0 %v8417_v7  ;;  %2059 = vmatpush1.bf16.msra.mxu1 %v8420_v9  ;;  %v8488_v7 = vld [vmem:[#allocation2 + $0x20c] ss:$36 sps:$4 sm:$0xff]   ;;  %v8542_v9 = vld [vmem:[#allocation2 + $0x214] ss:$36 sps:$4 sm:$0xff]  }
  0xbe   : > { %1974 = vmatprep.subr.bf16.mxu0 %v8425_v10  ;;  %2060 = vmatprep.subr.bf16.mxu1 %v8428_v11  ;;  %v8486_v10 = vld [vmem:[#allocation2 + $0x208] ss:$36 sps:$4 sm:$0xff]   ;;  %v8540_v11 = vld [vmem:[#allocation2 + $0x210] ss:$36 sps:$4 sm:$0xff]  }
  0xbf   : > { %2004 = vmatprep.mubr.bf16.mxu0 %v10317_v16  ;;  %2090 = vmatprep.mubr.bf16.mxu1 %v10317_v16 }
  0xc1   : > { %1975 = vmatpush1.bf16.msra.mxu0 %v8423_v12  ;;  %2061 = vmatpush1.bf16.msra.mxu1 %v8426_v13  ;;  %v8491_v12 = vld [vmem:[#allocation2 + $0x254] ss:$36 sps:$4 sm:$0xff]   ;;  %v8548_v13 = vld [vmem:[#allocation2 + $0x25c] ss:$36 sps:$4 sm:$0xff]  }
  0xc2   : > { %1976 = vmatprep.subr.bf16.mxu0 %v8431_v14  ;;  %2062 = vmatprep.subr.bf16.mxu1 %v8434_v15  ;;  %v8489_v14 = vld [vmem:[#allocation2 + $0x250] ss:$36 sps:$4 sm:$0xff]   ;;  %v8546_v15 = vld [vmem:[#allocation2 + $0x258] ss:$36 sps:$4 sm:$0xff]  }
  0xc5   : > { %1977 = vmatpush1.bf16.msra.mxu0 %v8429_v17  ;;  %2063 = vmatpush1.bf16.msra.mxu1 %v8432_v18  ;;  %v8494_v17 = vld [vmem:[#allocation2 + $0x29c] ss:$36 sps:$4 sm:$0xff]   ;;  %v8554_v18 = vld [vmem:[#allocation2 + $0x2a4] ss:$36 sps:$4 sm:$0xff]  }
  0xc6   : > { %1978 = vmatprep.subr.bf16.mxu0 %v8437_v19  ;;  %2064 = vmatprep.subr.bf16.mxu1 %v8440_v20  ;;  %v8492_v19 = vld [vmem:[#allocation2 + $0x298] ss:$36 sps:$4 sm:$0xff]   ;;  %v8497_v20 = vld [vmem:[#allocation2 + $0x2e4] ss:$36 sps:$4 sm:$0xff]  }
  0xc9   : > { %1979 = vmatpush1.bf16.msra.mxu0 %v8435_v21  ;;  %2065 = vmatpush1.bf16.msra.mxu1 %v8438_v22  ;;  %v8552_v21 = vld [vmem:[#allocation2 + $0x2a0] ss:$36 sps:$4 sm:$0xff]   ;;  %v8560_v22 = vld [vmem:[#allocation2 + $0x2ec] ss:$36 sps:$4 sm:$0xff]  }
  0xca   : > { %1980 = vmatprep.subr.bf16.mxu0 %v8443_v23  ;;  %2066 = vmatprep.subr.bf16.mxu1 %v8446_v24  ;;  %v8495_v23 = vld [vmem:[#allocation2 + $0x2e0] ss:$36 sps:$4 sm:$0xff]   ;;  %v8503_v24 = vld [vmem:[#allocation2 + $0x32c] ss:$36 sps:$4 sm:$0xff]  }
  0xcd   : > { %1981 = vmatpush1.bf16.msra.mxu0 %v8441_v25  ;;  %2067 = vmatpush1.bf16.msra.mxu1 %v8444_v26  ;;  %v8558_v25 = vld [vmem:[#allocation2 + $0x2e8] ss:$36 sps:$4 sm:$0xff]   ;;  %v8566_v26 = vld [vmem:[#allocation2 + $0x334] ss:$36 sps:$4 sm:$0xff]  }
  0xce   : > { %1982 = vmatprep.subr.bf16.mxu0 %v8449_v27  ;;  %2068 = vmatprep.subr.bf16.mxu1 %v8452_v28  ;;  %v8501_v27 = vld [vmem:[#allocation2 + $0x328] ss:$36 sps:$4 sm:$0xff]   ;;  %v8509_v28 = vld [vmem:[#allocation2 + $0x374] ss:$36 sps:$4 sm:$0xff]  }
  0xd1   : > { %1983 = vmatpush1.bf16.msra.mxu0 %v8447_v29  ;;  %2069 = vmatpush1.bf16.msra.mxu1 %v8450_v30  ;;  %v8564_v29 = vld [vmem:[#allocation2 + $0x330] ss:$36 sps:$4 sm:$0xff]   ;;  %v8572_v30 = vld [vmem:[#allocation2 + $0x37c] ss:$36 sps:$4 sm:$0xff]  }
  0xd2   : > { %1984 = vmatprep.subr.bf16.mxu0 %v8455_v31  ;;  %2070 = vmatprep.subr.bf16.mxu1 %v8458_v32  ;;  %v8507_v31 = vld [vmem:[#allocation2 + $0x370] ss:$36 sps:$4 sm:$0xff]   ;;  %v8515_v32 = vld [vmem:[#allocation2 + $0x3bc] ss:$36 sps:$4 sm:$0xff]  }
  0xd5   : > { %1985 = vmatpush1.bf16.msra.mxu0 %v8453_v33  ;;  %2071 = vmatpush1.bf16.msra.mxu1 %v8456_v34  ;;  %v8570_v33 = vld [vmem:[#allocation2 + $0x378] ss:$36 sps:$4 sm:$0xff]   ;;  %v8578_v34 = vld [vmem:[#allocation2 + $0x3c4] ss:$36 sps:$4 sm:$0xff]  }
  0xd6   : > { %1986 = vmatprep.subr.bf16.mxu0 %v8461_v35  ;;  %2072 = vmatprep.subr.bf16.mxu1 %v8464_v36  ;;  %v8513_v35 = vld [vmem:[#allocation2 + $0x3b8] ss:$36 sps:$4 sm:$0xff]   ;;  %v8521_v36 = vld [vmem:[#allocation2 + $0x404] ss:$36 sps:$4 sm:$0xff]  }
  0xd9   : > { %1987 = vmatpush1.bf16.msra.mxu0 %v8459_v37  ;;  %2073 = vmatpush1.bf16.msra.mxu1 %v8462_v38  ;;  %v8576_v37 = vld [vmem:[#allocation2 + $0x3c0] ss:$36 sps:$4 sm:$0xff]   ;;  %v8581_v38 = vld [vmem:[#allocation2 + $0x40c] ss:$36 sps:$4 sm:$0xff]  }
  0xda   : > { %2101 = vmatprep.subr.bf16.mxu0 %v8467_v41  ;;  %2187 = vmatprep.subr.bf16.mxu1 %v8500_v42  ;;  %v8579_v41 = vld [vmem:[#allocation2 + $0x408] ss:$36 sps:$4 sm:$0xff]   ;;  %v8584_v42 = vld [vmem:[#allocation2 + $0x454] ss:$36 sps:$4 sm:$0xff]  }
  0xdc   : > { %2005 = vmatmul.mubr.bf16.vlgmr.msra.gmra.mrb[0].mxu0 %v9556_v43  ;;  %2091 = vmatmul.mubr.bf16.vlgmr.msra.gmra.mrb[0].mxu1 %v9556_v43 }
  0xdd   : > { %2102 = vmatpush1.bf16.msra.mxu0 %v8465_v44  ;;  %2188 = vmatpush1.bf16.msra.mxu1 %v8498_v45  ;;  %v8525_v44 = vld [vmem:[#allocation2 + $0x448] ss:$36 sps:$4 sm:$0xff]   ;;  %v8582_v45 = vld [vmem:[#allocation2 + $0x450] ss:$36 sps:$4 sm:$0xff]  }
  0xde   : > { %2103 = vmatprep.subr.bf16.mxu0 %v8470_v46  ;;  %2189 = vmatprep.subr.bf16.mxu1 %v8506_v47  ;;  %v8533_v46 = vld [vmem:[#allocation2 + $0x494] ss:$36 sps:$4 sm:$0xff]   ;;  %v8587_v47 = vld [vmem:[#allocation2 + $0x49c] ss:$36 sps:$4 sm:$0xff]  }
  0xdf   : > { %2133 = vmatprep.mubr.bf16.mxu0 %v9542_v50  ;;  %2219 = vmatprep.mubr.bf16.mxu1 %v9542_v50 }
  0xe1   : > { %2104 = vmatpush1.bf16.msra.mxu0 %v8468_v48  ;;  %2190 = vmatpush1.bf16.msra.mxu1 %v8504_v49  ;;  %v8531_v48 = vld [vmem:[#allocation2 + $0x490] ss:$36 sps:$4 sm:$0xff]   ;;  %v8539_v49 = vld [vmem:[#allocation2 + $0x4dc] ss:$36 sps:$4 sm:$0xff]  }
  0xe2   : > { %2105 = vmatprep.subr.bf16.mxu0 %v8473_v51  ;;  %2191 = vmatprep.subr.bf16.mxu1 %v8512_v52  ;;  %v8585_v51 = vld [vmem:[#allocation2 + $0x498] ss:$36 sps:$4 sm:$0xff]   ;;  %v8590_v52 = vld [vmem:[#allocation2 + $0x4e4] ss:$36 sps:$4 sm:$0xff]  }
  0xe5   : > { %2106 = vmatpush1.bf16.msra.mxu0 %v8471_v53  ;;  %2192 = vmatpush1.bf16.msra.mxu1 %v8510_v54  ;;  %v8537_v53 = vld [vmem:[#allocation2 + $0x4d8] ss:$36 sps:$4 sm:$0xff]   ;;  %v8545_v54 = vld [vmem:[#allocation2 + $0x524] ss:$36 sps:$4 sm:$0xff]  }
  0xe6   : > { %2107 = vmatprep.subr.bf16.mxu0 %v8476_v55  ;;  %2193 = vmatprep.subr.bf16.mxu1 %v8518_v56  ;;  %v8588_v55 = vld [vmem:[#allocation2 + $0x4e0] ss:$36 sps:$4 sm:$0xff]   ;;  %v8593_v56 = vld [vmem:[#allocation2 + $0x52c] ss:$36 sps:$4 sm:$0xff]  }
  0xe9   : > { %2108 = vmatpush1.bf16.msra.mxu0 %v8474_v57  ;;  %2194 = vmatpush1.bf16.msra.mxu1 %v8516_v58  ;;  %v8543_v57 = vld [vmem:[#allocation2 + $0x520] ss:$36 sps:$4 sm:$0xff]   ;;  %v8551_v58 = vld [vmem:[#allocation2 + $0x56c] ss:$36 sps:$4 sm:$0xff]  }
  0xea   : > { %2109 = vmatprep.subr.bf16.mxu0 %v8479_v59  ;;  %2195 = vmatprep.subr.bf16.mxu1 %v8524_v60  ;;  %v8591_v59 = vld [vmem:[#allocation2 + $0x528] ss:$36 sps:$4 sm:$0xff]   ;;  %v8596_v60 = vld [vmem:[#allocation2 + $0x574] ss:$36 sps:$4 sm:$0xff]  }
  0xed   : > { %2110 = vmatpush1.bf16.msra.mxu0 %v8477_v61  ;;  %2196 = vmatpush1.bf16.msra.mxu1 %v8522_v62  ;;  %v8549_v61 = vld [vmem:[#allocation2 + $0x568] ss:$36 sps:$4 sm:$0xff]   ;;  %v8557_v62 = vld [vmem:[#allocation2 + $0x5b4] ss:$36 sps:$4 sm:$0xff]  }
  0xee   : > { %2111 = vmatprep.subr.bf16.mxu0 %v8482_v63  ;;  %2197 = vmatprep.subr.bf16.mxu1 %v8530_v0  ;;  %v8594_v63 = vld [vmem:[#allocation2 + $0x570] ss:$36 sps:$4 sm:$0xff]   ;;  %v8599_v0 = vld [vmem:[#allocation2 + $0x5bc] ss:$36 sps:$4 sm:$0xff]  }
  0xf1   : > { %2112 = vmatpush1.bf16.msra.mxu0 %v8480_v1  ;;  %2198 = vmatpush1.bf16.msra.mxu1 %v8528_v2  ;;  %v8555_v1 = vld [vmem:[#allocation2 + $0x5b0] ss:$36 sps:$4 sm:$0xff]   ;;  %v8563_v2 = vld [vmem:[#allocation2 + $0x5fc] ss:$36 sps:$4 sm:$0xff]  }
  0xf2   : > { %2113 = vmatprep.subr.bf16.mxu0 %v8485_v3  ;;  %2199 = vmatprep.subr.bf16.mxu1 %v8536_v4  ;;  %v8597_v3 = vld [vmem:[#allocation2 + $0x5b8] ss:$36 sps:$4 sm:$0xff]   ;;  %v8602_v4 = vld [vmem:[#allocation2 + $0x604] ss:$36 sps:$4 sm:$0xff]  }
  0xf5   : > { %2114 = vmatpush1.bf16.msra.mxu0 %v8483_v5  ;;  %2200 = vmatpush1.bf16.msra.mxu1 %v8534_v6  ;;  %v8561_v5 = vld [vmem:[#allocation2 + $0x5f8] ss:$36 sps:$4 sm:$0xff]   ;;  %v8569_v6 = vld [vmem:[#allocation2 + $0x644] ss:$36 sps:$4 sm:$0xff]  }
  0xf6   : > { %2115 = vmatprep.subr.bf16.mxu0 %v8488_v7  ;;  %2201 = vmatprep.subr.bf16.mxu1 %v8542_v9  ;;  %v8600_v7 = vld [vmem:[#allocation2 + $0x600] ss:$36 sps:$4 sm:$0xff]   ;;  %v8605_v9 = vld [vmem:[#allocation2 + $0x64c] ss:$36 sps:$4 sm:$0xff]  }
  0xf9   : > { %2116 = vmatpush1.bf16.msra.mxu0 %v8486_v10  ;;  %2202 = vmatpush1.bf16.msra.mxu1 %v8540_v11  ;;  %v8567_v10 = vld [vmem:[#allocation2 + $0x640] ss:$36 sps:$4 sm:$0xff]   ;;  %v8575_v11 = vld [vmem:[#allocation2 + $0x68c] ss:$36 sps:$4 sm:$0xff]  }
  0xfa   : > { %2117 = vmatprep.subr.bf16.mxu0 %v8491_v12  ;;  %2203 = vmatprep.subr.bf16.mxu1 %v8548_v13  ;;  %v8603_v12 = vld [vmem:[#allocation2 + $0x648] ss:$36 sps:$4 sm:$0xff]   ;;  %v8608_v13 = vld [vmem:[#allocation2 + $0x694] ss:$36 sps:$4 sm:$0xff]  }
  0xfd   : > { %2118 = vmatpush1.bf16.msra.mxu0 %v8489_v14  ;;  %2204 = vmatpush1.bf16.msra.mxu1 %v8546_v15  ;;  %v8573_v14 = vld [vmem:[#allocation2 + $0x688] ss:$36 sps:$4 sm:$0xff]   ;;  %v8606_v15 = vld [vmem:[#allocation2 + $0x690] ss:$36 sps:$4 sm:$0xff]  }
  0xfe   : > { %2119 = vmatprep.subr.bf16.mxu0 %v8494_v17  ;;  %2205 = vmatprep.subr.bf16.mxu1 %v8554_v18  ;;  %v8609_v17 = vld [vmem:[#allocation2 + $0x260] ss:$36 sps:$4 sm:$0xff]  }
  0xff   : > { %v8611_v18 = vld [vmem:[#allocation2 + $0x20] ss:$36 sps:$4 sm:$0xff]  }
 0x101   : > { %2120 = vmatpush1.bf16.msra.mxu0 %v8492_v19  ;;  %2206 = vmatpush1.bf16.msra.mxu1 %v8552_v21  ;;  %v8610_v19 = vld [vmem:[#allocation2 + $0x4a0] ss:$36 sps:$4 sm:$0xff]   ;;  %v10320_v21 = vmov 0.0  }
 0x102   : > { %2121 = vmatprep.subr.bf16.mxu0 %v8497_v20  ;;  %2207 = vmatprep.subr.bf16.mxu1 %v8560_v22  ;;  %v8612_v20 = vld [vmem:[#allocation2 + $0x2a8] ss:$36 sps:$4 sm:$0xff]  }
 0x103   : > { %v8614_v22 = vld [vmem:[#allocation2 + $0x68] ss:$36 sps:$4 sm:$0xff]  }
 0x105   : > { %2122 = vmatpush1.bf16.msra.mxu0 %v8495_v23  ;;  %2208 = vmatpush1.bf16.msra.mxu1 %v8558_v25  ;;  %v8613_v23 = vld [vmem:[#allocation2 + $0x4e8] ss:$36 sps:$4 sm:$0xff]   ;;  %v8617_v25 = vld [vmem:[#allocation2 + $0xb0] ss:$36 sps:$4 sm:$0xff]  }
 0x106   : > { %2123 = vmatprep.subr.bf16.mxu0 %v8503_v24  ;;  %2209 = vmatprep.subr.bf16.mxu1 %v8566_v26  ;;  %v8615_v24 = vld [vmem:[#allocation2 + $0x2f0] ss:$36 sps:$4 sm:$0xff]  }
 0x107   : > { %v8616_v26 = vld [vmem:[#allocation2 + $0x530] ss:$36 sps:$4 sm:$0xff]  }
 0x109   : > { %2124 = vmatpush1.bf16.msra.mxu0 %v8501_v27  ;;  %2210 = vmatpush1.bf16.msra.mxu1 %v8564_v29  ;;  %v8618_v27 = vld [vmem:[#allocation2 + $0x338] ss:$36 sps:$4 sm:$0xff]  }
 0x10a   : > { %2125 = vmatprep.subr.bf16.mxu0 %v8509_v28  ;;  %2211 = vmatprep.subr.bf16.mxu1 %v8572_v30  ;;  %v8620_v28 = vld [vmem:[#allocation2 + $0xf8] ss:$36 sps:$4 sm:$0xff]   ;;  %v8621_v30 = vld [vmem:[#allocation2 + $0x380] ss:$36 sps:$4 sm:$0xff]  }
 0x10b   : > { %v8619_v29 = vld [vmem:[#allocation2 + $0x578] ss:$36 sps:$4 sm:$0xff]  }
 0x10d   : > { %2126 = vmatpush1.bf16.msra.mxu0 %v8507_v31  ;;  %2212 = vmatpush1.bf16.msra.mxu1 %v8570_v33  ;;  %v8622_v31 = vld [vmem:[#allocation2 + $0x5c0] ss:$36 sps:$4 sm:$0xff]   ;;  %v8626_v33 = vld [vmem:[#allocation2 + $0x188] ss:$36 sps:$4 sm:$0xff]  }
 0x10e   : > { %2127 = vmatprep.subr.bf16.mxu0 %v8515_v32  ;;  %2213 = vmatprep.subr.bf16.mxu1 %v8578_v34  ;;  %v8624_v32 = vld [vmem:[#allocation2 + $0x3c8] ss:$36 sps:$4 sm:$0xff]  }
 0x10f   : > { %v8625_v34 = vld [vmem:[#allocation2 + $0x608] ss:$36 sps:$4 sm:$0xff]  }
 0x111   : > { %2128 = vmatpush1.bf16.msra.mxu0 %v8513_v35  ;;  %2214 = vmatpush1.bf16.msra.mxu1 %v8576_v37  ;;  %v8627_v35 = vld [vmem:[#allocation2 + $0x410] ss:$36 sps:$4 sm:$0xff]  }
 0x112   : > { %2129 = vmatprep.subr.bf16.mxu0 %v8521_v36  ;;  %2215 = vmatprep.subr.bf16.mxu1 %v8581_v38  ;;  %v8629_v36 = vld [vmem:[#allocation2 + $0x1d0] ss:$36 sps:$4 sm:$0xff]   ;;  %v8630_v38 = vld [vmem:[#allocation2 + $0x458] ss:$36 sps:$4 sm:$0xff]  }
 0x113   : > { %v8628_v37 = vld [vmem:[#allocation2 + $0x650] ss:$36 sps:$4 sm:$0xff]  }
 0x115   : > { %2130 = vmatpush1.bf16.msra.mxu0 %v8519_v39  ;;  %2216 = vmatpush1.bf16.msra.mxu1 %v8579_v41  ;;  %v8632_v39 = vld [vmem:[#allocation2 + $0x218] ss:$36 sps:$4 sm:$0xff]   ;;  %v8635_v41 = vld [vmem:[%s10301_s4 + $0x4] ss:$12 sps:$4 sm:$0x1f]  }
 0x116   : > { %2131 = vmatprep.subr.bf16.mxu0 %v8527_v40  ;;  %2217 = vmatprep.subr.bf16.mxu1 %v8584_v42  ;;  %v8631_v40 = vld [vmem:[#allocation2 + $0x698] ss:$36 sps:$4 sm:$0xff]   ;;  %v8633_v42 = vld [vmem:[%s10301_s4] ss:$12 sps:$4 sm:$0x1f]  }
 0x119   : > { %2132 = vmatpush1.bf16.msra.mxu0 %v8525_v44  ;;  %2218 = vmatpush1.bf16.msra.mxu1 %v8582_v45  ;;  %v8637_v44 = vld [vmem:[%s10302_s5 + $0x4] ss:$12 sps:$4 sm:$0x1f]  }
 0x11a   : > { %2144 = vmatprep.subr.bf16.mxu0 %v8533_v46  ;;  %2230 = vmatprep.subr.bf16.mxu1 %v8587_v47 }
 0x11c   : > { %2134 = vmatmul.mubr.bf16.vlgmr.msra.gmra.mrb[4].mxu0 %v9548_v8  ;;  %2220 = vmatmul.mubr.bf16.vlgmr.msra.gmra.mrb[4].mxu1 %v9548_v8 }
 0x11d   : > { %2145 = vmatpush1.bf16.msra.mxu0 %v8531_v48  ;;  %2176 = vmatprep.mubr.bf16.mxu0 %v10317_v16 }
 0x11e   : > { %2146 = vmatprep.subr.bf16.mxu0 %v8539_v49  ;;  %2231 = vmatpush1.bf16.msra.mxu1 %v8585_v51 }
 0x11f   : > { %2232 = vmatprep.subr.bf16.mxu1 %v8590_v52  ;;  %2262 = vmatprep.mubr.bf16.mxu1 %v10317_v16 }
 0x121   : > { %2147 = vmatpush1.bf16.msra.mxu0 %v8537_v53 }
 0x122   : > { %2148 = vmatprep.subr.bf16.mxu0 %v8545_v54  ;;  %2233 = vmatpush1.bf16.msra.mxu1 %v8588_v55 }
 0x123   : > { %2234 = vmatprep.subr.bf16.mxu1 %v8593_v56 }
 0x125   : > { %2149 = vmatpush1.bf16.msra.mxu0 %v8543_v57 }
 0x126   : > { %2150 = vmatprep.subr.bf16.mxu0 %v8551_v58  ;;  %2235 = vmatpush1.bf16.msra.mxu1 %v8591_v59  ;;  %v8636_v58 = vld [vmem:[%s10301_s4 + $0x8] ss:$12 sps:$4 sm:$0x1f]  }
 0x127   : > { %2236 = vmatprep.subr.bf16.mxu1 %v8596_v60 }
 0x129   : > { %2151 = vmatpush1.bf16.msra.mxu0 %v8549_v61 }
 0x12a   : > { %2152 = vmatprep.subr.bf16.mxu0 %v8557_v62  ;;  %2237 = vmatpush1.bf16.msra.mxu1 %v8594_v63 }
 0x12b   : > { %2238 = vmatprep.subr.bf16.mxu1 %v8599_v0 }
 0x12d   : > { %2153 = vmatpush1.bf16.msra.mxu0 %v8555_v1 }
 0x12e   : > { %2154 = vmatprep.subr.bf16.mxu0 %v8563_v2  ;;  %2239 = vmatpush1.bf16.msra.mxu1 %v8597_v3 }
 0x12f   : > { %2240 = vmatprep.subr.bf16.mxu1 %v8602_v4 }
 0x131   : > { %2155 = vmatpush1.bf16.msra.mxu0 %v8561_v5 }
 0x132   : > { %2156 = vmatprep.subr.bf16.mxu0 %v8569_v6  ;;  %2241 = vmatpush1.bf16.msra.mxu1 %v8600_v7 }
 0x133   : > { %2242 = vmatprep.subr.bf16.mxu1 %v8605_v9 }
 0x135   : > { %2157 = vmatpush1.bf16.msra.mxu0 %v8567_v10 }
 0x136   : > { %2158 = vmatprep.subr.bf16.mxu0 %v8575_v11  ;;  %2243 = vmatpush1.bf16.msra.mxu1 %v8603_v12 }
 0x137   : > { %2244 = vmatprep.subr.bf16.mxu1 %v8608_v13 }
 0x139   : > { %2159 = vmatpush1.bf16.msra.mxu0 %v8573_v14 }
 0x13a   : > { %2245 = vmatpush1.bf16.msra.mxu1 %v8606_v15  ;;  %7984 = vmatprep.subr.bf16.mxu0 %v8609_v17 }
 0x13b   : > { %8120 = vmatprep.subr.bf16.mxu1 %v10320_v21 }
 0x13c   : > { %2177 = vmatmul.mubr.bf16.vlgmr.msra.gmra.mrb[4].mxu0 %v9556_v43 }
 0x13d   : > { %2263 = vmatmul.mubr.bf16.vlgmr.msra.gmra.mrb[4].mxu1 %v9556_v43  ;;  %7985 = vmatpush3.bf16.msra.mxu0 %v8611_v18 }
 0x13e   : > { %8121 = vmatpush3.bf16.msra.mxu1 %v8610_v19  ;;  %7986 = vmatprep.subr.bf16.mxu0 %v8612_v20 }
 0x13f   : > { %8122 = vmatprep.subr.bf16.mxu1 %v10320_v21  ;;  %2305 = vmatprep.mubr.bf16.mxu0 %v9542_v50  ;;  %v8623_v50 = vld [vmem:[#allocation2 + $0x140] ss:$36 sps:$4 sm:$0xff]  }
 0x140   : > { %8136 = vmatprep.mubr.msk.bf16.mxu1 %vm9311_vm0, %v10320_v21 }
 0x141   : > { %7987 = vmatpush3.bf16.msra.mxu0 %v8614_v22 }
 0x142   : > { %8123 = vmatpush3.bf16.msra.mxu1 %v8613_v23  ;;  %7988 = vmatprep.subr.bf16.mxu0 %v8615_v24 }
 0x143   : > { %8124 = vmatprep.subr.bf16.mxu1 %v10320_v21 }
 0x145   : > { %7989 = vmatpush3.bf16.msra.mxu0 %v8617_v25  ;;  %v10319_v25 = vlaneseq }
 0x146   : > { %8125 = vmatpush3.bf16.msra.mxu1 %v8616_v26  ;;  %7990 = vmatprep.subr.bf16.mxu0 %v8618_v27 }
 0x147   : > { %8126 = vmatprep.subr.bf16.mxu1 %v10320_v21  ;;  %v9616_v26 = vshrl.u32 %v10319_v25, 7 }
 0x149   : > { %7991 = vmatpush3.bf16.msra.mxu0 %v8620_v28 }
 0x14a   : > { %8127 = vmatpush3.bf16.msra.mxu1 %v8619_v29  ;;  %7992 = vmatprep.subr.bf16.mxu0 %v8621_v30 }
 0x14b   : > { %8128 = vmatprep.subr.bf16.mxu1 %v10320_v21 }
 0x14d   : > { %7993 = vmatpush3.bf16.msra.mxu0 %v8623_v50 }
 0x14e   : > { %8129 = vmatpush3.bf16.msra.mxu1 %v8622_v31  ;;  %7994 = vmatprep.subr.bf16.mxu0 %v8624_v32  ;;  %v9619_v31 = vsub.s32 1, %v9616_v26  ;;  %v9622_v32 = vsub.s32 0, %v9616_v26 }
 0x14f   : > { %8130 = vmatprep.subr.bf16.mxu1 %v10320_v21 }
 0x150   : > { %10349 = vst [vmem:[#allocation15_spill] sm:$0xff] %v9619_v31 }
 0x151   : > { %7995 = vmatpush3.bf16.msra.mxu0 %v8626_v33 }
 0x152   : > { %8131 = vmatpush3.bf16.msra.mxu1 %v8625_v34  ;;  %7996 = vmatprep.subr.bf16.mxu0 %v8627_v35 }
 0x153   : > { %8132 = vmatprep.subr.bf16.mxu1 %v10320_v21 }
 0x155   : > { %7997 = vmatpush3.bf16.msra.mxu0 %v8629_v36  ;;  %v9627_v36 = vsub.s32 5, %v9616_v26 }
 0x156   : > { %8133 = vmatpush3.bf16.msra.mxu1 %v8628_v37  ;;  %7998 = vmatprep.subr.bf16.mxu0 %v8630_v38  ;;  %v9630_v37 = vsub.s32 4, %v9616_v26  ;;  %v2559_v38 = vsub.s32 6, %v9616_v26 }
 0x157   : > { %8134 = vmatprep.subr.bf16.mxu1 %v10320_v21  ;;  %10350 = vst [vmem:[#allocation16_spill] sm:$0xff] %v9627_v36 }
 0x158   : > { %10351 = vst [vmem:[#allocation17_spill] sm:$0xff] %v9630_v37 }
 0x159   : > { %7999 = vmatpush3.bf16.msra.mxu0 %v8632_v39 }
 0x15a   : > { %8135 = vmatpush3.bf16.msra.mxu1 %v8631_v40  ;;  %7616 = vmatprep.subr.msk.bf16.mxu0 %vm3783_vm1, %v8637_v44 }
 0x15b   : > { %2384 = vmatprep.subr.bf16.mxu1 %v8635_v41 }
 0x15c   : > { %2306 = vmatmul.mubr.bf16.vlgmr.msra.gmra.mrb[8].mxu0 %v9548_v8  ;;  %v8639_v8 = vld [vmem:[%s10302_s5] ss:$12 sps:$4 sm:$0x1f]  }
 0x15d   : > { %8137 = vmatmul.mubr.bf16.vlgmr.msra.gmra.mrb[8].mxu1 %v9556_v43  ;;  %3825 = vmatprep.mubr.bf16.mxu0 %v10317_v16  ;;  %v3785_v43 = vsel %vm3783_vm1, %v8639_v8, 0 }
 0x15e   : > { %3794 = vmatpush1.bf16.msra.mxu0 %v3785_v43 }
 0x163   : > { %2385 = vmatpush1.bf16.xpose.msra.mxu1 %v8633_v42  ;;  %v9636_v42 = vsub.s32 2, %v9616_v26 }
 0x164   : > { %8140 = vmatprep.subr.bf16.mxu1 %v10320_v21 }
 0x165   : > { %10352 = vst [vmem:[#allocation18_spill] sm:$0xff] %v9636_v42 }
 0x1af   : > { %v2006_v45 = vpop.f32.mrb[0].mxu0  ;;  %v2092_v46 = vpop.f32.mrb[0].mxu1 }
 0x1b0   : > { %v2008_v47 = vpop.f32.mrb[1].mxu0  ;;  %v2094_v48 = vpop.f32.mrb[1].mxu1 }
 0x1b1   : > { %v2010_v49 = vpop.f32.mrb[2].mxu0  ;;  %v2096_v51 = vpop.f32.mrb[2].mxu1 }
 0x1b2   : > { %v2355_v52 = vpack.c.bf16 %v2010_v49, %v2006_v45  ;;  %v2357_v53 = vpack.c.bf16 %v2096_v51, %v2092_v46  ;;  %v2012_v54 = vpop.f32.mrb[3].mxu0  ;;  %v2098_v55 = vpop.f32.mrb[3].mxu1  ;;  %v9640_v45 = vsub.s32 3, %v9616_v26 }
 0x1b3   : > { %v2356_v56 = vpack.c.bf16 %v2012_v54, %v2008_v47  ;;  %v2358_v57 = vpack.c.bf16 %v2098_v55, %v2094_v48 }
 0x1b4   : > { %10353 = vst [vmem:[#allocation19_spill] sm:$0xff] %v9640_v45 }
 0x1b5   : > { %2416 = vmatprep.mubr.bf16.mxu1 %v2356_v56 }
 0x1b6   : > { %2417 = vmatmul.mubr.bf16.vlgmr.msra.gmra.mrb[12].mxu1 %v2355_v52 }
 0x1b7   : > { %8141 = vmatpush3.bf16.xpose.msra.mxu1 %v8636_v58  ;;  %8142 = vmatprep.mubr.msk.bf16.mxu1 %vm9311_vm0, %v10320_v21 }
 0x1c2   : > { %8143 = vmatmul.mubr.bf16.vlgmr.msra.gmra.mrb[12].mxu1 %v2357_v53 }
 0x1c3   : > { %3060 = vmatprep.mubr.bf16.mxu1 %v2356_v56 }
 0x20f   : > { %v2178_v59 = vpop.f32.mrb[4].mxu0 }
 0x210   : > { %v2180_v60 = vpop.f32.mrb[5].mxu0  ;;  %v2264_v61 = vpop.f32.mrb[4].mxu1 }
 0x211   : > { %v2182_v62 = vpop.f32.mrb[6].mxu0  ;;  %v2266_v63 = vpop.f32.mrb[5].mxu1 }
 0x212   : > { %v2359_v0 = vpack.c.bf16 %v2182_v62, %v2178_v59  ;;  %v2184_v1 = vpop.f32.mrb[7].mxu0  ;;  %v2268_v2 = vpop.f32.mrb[6].mxu1  ;;  %v9312_v59 = vmov 839922192  }
 0x213   : > { %v2360_v3 = vpack.c.bf16 %v2184_v1, %v2180_v60  ;;  %v2361_v4 = vpack.c.bf16 %v2268_v2, %v2264_v61  ;;  %v2270_v5 = vpop.f32.mrb[7].mxu1  ;;  %v2586_v60 = vunpack.c.l.s4 %v9312_v59  ;;  %v9313_v61 = vmov 1985246804  }
 0x214   : > { %3028 = vmatprep.subr.bf16.mxu1 %v2359_v0  ;;  %v2362_v6 = vpack.c.bf16 %v2270_v5, %v2266_v63  ;;  %v2593_v62 = vunpack.c.l.s4 %v9313_v61 }
 0x215   : > { %3029 = vmatpush1.bf16.xpose.msra.mxu1 %v2358_v57  ;;  %v9603_v7 = vsel %vm3880_vm2, %v2361_v4, 0  ;;  %v2587_v63 = vunpack.c.0.s8 %v2586_v60  ;;  %v9669_v4 = vld [vmem:[%s9657_s20 + $0x14] sm:$0x1] }
 0x216   : > { %10347 = vst [vmem:[#allocation13_spill] sm:$0xff] %v9603_v7  ;;  %8146 = vmatprep.subr.bf16.mxu1 %v10320_v21  ;;  %7619 = vmatprep.subr.msk.bf16.mxu0 %vm3880_vm2, %v2362_v6  ;;  %v2594_v0 = vunpack.c.0.s8 %v2593_v62  ;;  %v9672_v6 = vld [vmem:[%s9657_s20] sm:$0xf] }
 0x217   : > { %v9660_v1 = vsub.s32 %v2587_v63, %v9616_v26 }
 0x218   : > { %v9663_v2 = vsub.s32 %v2594_v0, %v9616_v26 }
 0x21c   : > { %3061 = vmatmul.mubr.bf16.vlgmr.msra.gmra.mrb[16].mxu1 %v2355_v52 }
 0x21d   : > { %8147 = vmatpush3.bf16.xpose.msra.mxu1 %v2360_v3  ;;  %8148 = vmatprep.mubr.msk.bf16.mxu1 %vm9311_vm0, %v10320_v21  ;;  %v9666_v3 = vld [vmem:[%s9657_s20 + $0x10] sm:$0xf] }
 0x21e   : > { %8152 = vmatprep.subr.bf16.mxu1 %v10320_v21 }
 0x228   : > { %8149 = vmatmul.mubr.bf16.vlgmr.msra.gmra.mrb[16].mxu1 %v2357_v53 }
 0x229   : > { %8154 = vmatprep.mubr.msk.bf16.mxu1 %vm9311_vm0, %v10320_v21 }
 0x22f   : > { %v8000_v9 = vpop.f32.mrb[8].mxu0 }
 0x230   : > { %v8001_v10 = vpop.f32.mrb[9].mxu0  ;;  %v2348_v11 = vpop.f32.mrb[8].mxu1 }
 0x231   : > { %v8002_v12 = vadd.f32 %v8001_v10, %v8000_v9  ;;  %v8003_v13 = vpop.f32.mrb[10].mxu0  ;;  %v8138_v14 = vpop.f32.mrb[9].mxu1  ;;  %v9675_v9 = vld [vmem:[%s9657_s20 + $0x4] sm:$0x1] }
 0x232   : > { %v8004_v15 = vpop.f32.mrb[11].mxu0  ;;  %v2351_v17 = vpop.f32.mrb[10].mxu1 }
 0x233   : > { %v2349_v18 = vadd.f32 %v8002_v12, %v2348_v11  ;;  %v8005_v19 = vadd.f32 %v8004_v15, %v8003_v13  ;;  %v8139_v20 = vpop.f32.mrb[11].mxu1 }
 0x235   : > { %v2352_v22 = vadd.f32 %v8005_v19, %v2351_v17 }
 0x237   : > { %v2363_v23 = vpack.c.bf16 %v2352_v22, %v2349_v18 }
 0x239   : > { %v9613_v24 = vsel %vm3880_vm2, %v2363_v23, 0 }
 0x23a   : > { %10348 = vst [vmem:[#allocation14_spill] sm:$0xff] %v9613_v24 }
 0x295   : > { %v2459_v27 = vpop.f32.mrb[12].mxu1 }
 0x296   : > { %v8144_v28 = vpop.f32.mrb[13].mxu1 }
 0x297   : > { %v2462_v29 = vpop.f32.mrb[14].mxu1 }
 0x298   : > { %v2466_v30 = vpack.c.bf16 %v2462_v29, %v2459_v27  ;;  %v8145_v50 = vpop.f32.mrb[15].mxu1 }
 0x299   : > { %v9689_v50 = vld [vmem:[%s9657_s20 + $0x54] sm:$0x1] }
 0x29a   : > { %v2468_v33 = vpack.i.b16 %v2466_v30, %v2466_v30  ;;  %v2477_v39 = vshrl.u32 %v2466_v30, 16  ;;  %v9686_v30 = vld [vmem:[%s9657_s20 + $0x50] sm:$0xf] }
 0x29c   : > { %v2490_v34 = vrot.slane %v2468_v33, %v9619_v31  ;;  %v2473_v35 = vrot.slane %v2468_v33, %v9622_v32  ;;  %v2546_v40 = vrot.slane %v2468_v33, %v9627_v36  ;;  %v2532_v41 = vrot.slane %v2468_v33, %v9630_v37 }
 0x29d   : > { %v2478_v44 = vpack.i.b16 %v2477_v39, %v2477_v39  ;;  %v2560_v8 = vrot.slane %v2468_v33, %v2559_v38  ;;  %v2504_v43 = vrot.slane %v2468_v33, %v9636_v42  ;;  %v2518_v47 = vrot.slane %v2468_v33, %v9640_v45 }
 0x29e   : > { %2492 = vbcast.lane.c.b16.xlu1 %v2490_v34, 256  ;;  %2475 = vbcast.lane.c.b16.xlu0 %v2473_v35, 256  ;;  %v9694_v35 = vld [vmem:[%s9657_s20 + $0x40] sm:$0xf] }
 0x29f   : > { %v2497_v46 = vrot.slane %v2478_v44, %v9619_v31  ;;  %v2539_v48 = vrot.slane %v2478_v44, %v9630_v37  ;;  %v2483_v49 = vrot.slane %v2478_v44, %v9622_v32  ;;  %v2553_v51 = vrot.slane %v2478_v44, %v9627_v36 }
 0x2a0   : > { %v2511_v52 = vrot.slane %v2478_v44, %v9636_v42  ;;  %v2567_v53 = vrot.slane %v2478_v44, %v2559_v38  ;;  %v2525_v54 = vrot.slane %v2478_v44, %v9640_v45  ;;  %v9697_v38 = vld [vmem:[%s9657_s20 + $0x44] sm:$0x1]  ;;  %v9830_v45 = vld [vmem:[%s9657_s20 + $0x6c] sm:$0x1] }
 0x2a1   : > { %10355 = vst [vmem:[#allocation21_spill] sm:$0xff] %v9830_v45 }
 0x2a2   : > { %2548 = vbcast.lane.c.b16.xlu1 %v2546_v40, 256  ;;  %2534 = vbcast.lane.c.b16.xlu0 %v2532_v41, 256 }
 0x2a6   : > { %2562 = vbcast.lane.c.b16.xlu1 %v2560_v8, 256  ;;  %2506 = vbcast.lane.c.b16.xlu0 %v2504_v43, 256 }
 0x2aa   : > { %2499 = vbcast.lane.c.b16.xlu1 %v2497_v46, 256  ;;  %2520 = vbcast.lane.c.b16.xlu0 %v2518_v47, 256 }
 0x2ae   : > { %2541 = vbcast.lane.c.b16.xlu1 %v2539_v48, 256  ;;  %2485 = vbcast.lane.c.b16.xlu0 %v2483_v49, 256 }
 0x2b2   : > { %2555 = vbcast.lane.c.b16.xlu1 %v2553_v51, 256  ;;  %2513 = vbcast.lane.c.b16.xlu0 %v2511_v52, 256  ;;  %v9708_v51 = vld [vmem:[%s9657_s20 + $0x60] sm:$0xf]  ;;  %v9711_v52 = vld [vmem:[%s9657_s20 + $0x64] sm:$0x1] }
 0x2b6   : > { %2569 = vbcast.lane.c.b16.xlu1 %v2567_v53, 256  ;;  %2527 = vbcast.lane.c.b16.xlu0 %v2525_v54, 256 }
 0x2fb   : > { %v9649_v55 = vpop.f32.mrb[16].mxu1 }
 0x2fc   : > { %v8150_v56 = vpop.f32.mrb[17].mxu1 }
 0x2fd   : > { %v9651_v57 = vpop.f32.mrb[18].mxu1 }
 0x2fe   : > { %v8151_v58 = vpop.f32.mrb[19].mxu1 }
 0x310   : > { %v2493_v5 = vpop.permute.xlu1 %2492  ;;  %v2476_v10 = vpop.permute.xlu0 %2475 }
 0x311   : > { %v2619_v11 = vrot.slane %v2493_v5, %v9660_v1  ;;  %v2626_v12 = vrot.slane %v2493_v5, %v9663_v2  ;;  %v2591_v13 = vrot.slane %v2476_v10, %v9660_v1  ;;  %v2598_v14 = vrot.slane %v2476_v10, %v9663_v2 }
 0x313   : > { %v2813_v15 = vmul.bf16 %v2619_v11, %v9666_v3  ;;  %v2814_v17 = vmul.bf16 %v2626_v12, %v9669_v4  ;;  %v2809_v18 = vmul.bf16 %v2591_v13, %v9672_v6  ;;  %v2810_v19 = vmul.bf16 %v2598_v14, %v9675_v9 }
 0x314   : > { %v2549_v20 = vpop.permute.xlu1 %2548  ;;  %v2535_v22 = vpop.permute.xlu0 %2534 }
 0x315   : > { %v2841_v23 = vunpack.c.l.bf16 %v2813_v15  ;;  %v2842_v27 = vunpack.c.l.bf16 %v2814_v17  ;;  %v2837_v28 = vunpack.c.l.bf16 %v2809_v18  ;;  %v2838_v29 = vunpack.c.l.bf16 %v2810_v19 }
 0x316   : > { %v2731_v33 = vrot.slane %v2549_v20, %v9660_v1  ;;  %v2738_v34 = vrot.slane %v2549_v20, %v9663_v2  ;;  %v2703_v39 = vrot.slane %v2535_v22, %v9660_v1  ;;  %v2710_v40 = vrot.slane %v2535_v22, %v9663_v2 }
 0x317   : > { %v2885_v41 = vsel %vm2865_vm3, %v2841_v23, 0.0  ;;  %v2886_v44 = vsel %vm2867_vm4, %v2842_v27, 0.0  ;;  %v2866_v8 = vsel %vm2865_vm3, %v2837_v28, 0.0  ;;  %v2868_v43 = vsel %vm2867_vm4, %v2838_v29, 0.0 }
 0x318   : > { %v2887_v46 = vadd.f32 %v2886_v44, %v2885_v41  ;;  %v2869_v47 = vadd.f32 %v2868_v43, %v2866_v8  ;;  %v2829_v48 = vmul.bf16 %v2731_v33, %v9686_v30  ;;  %v2830_v49 = vmul.bf16 %v2738_v34, %v9689_v50  ;;  %v2563_v53 = vpop.permute.xlu1 %2562  ;;  %v2507_v17 = vpop.permute.xlu0 %2506  ;;  %v9724_v33 = vld [vmem:[%s9657_s20 + $0x20] sm:$0xf]  ;;  %v9727_v34 = vld [vmem:[%s9657_s20 + $0x24] sm:$0x1] }
 0x319   : > { %v2825_v54 = vmul.bf16 %v2703_v39, %v9694_v35  ;;  %v2826_v56 = vmul.bf16 %v2710_v40, %v9697_v38  ;;  %v2759_v58 = vrot.slane %v2563_v53, %v9660_v1  ;;  %v2766_v59 = vrot.slane %v2563_v53, %v9663_v2 }
 0x31a   : > { %v2888_v60 = vrot.slane %v2887_v46, 4  ;;  %v2870_v61 = vrot.slane %v2869_v47, 4  ;;  %v2857_v62 = vunpack.c.l.bf16 %v2829_v48  ;;  %v2858_v63 = vunpack.c.l.bf16 %v2830_v49 }
 0x31b   : > { %v2853_v0 = vunpack.c.l.bf16 %v2825_v54  ;;  %v2854_v5 = vunpack.c.l.bf16 %v2826_v56  ;;  %v2833_v10 = vmul.bf16 %v2759_v58, %v9708_v51  ;;  %v2834_v11 = vmul.bf16 %v2766_v59, %v9711_v52 }
 0x31c   : > { %v2889_v12 = vadd.f32 %v2888_v60, %v2887_v46  ;;  %v2871_v13 = vadd.f32 %v2870_v61, %v2869_v47  ;;  %v2957_v14 = vsel %vm2865_vm3, %v2857_v62, 0.0  ;;  %v2958_v15 = vsel %vm2867_vm4, %v2858_v63, 0.0  ;;  %v2500_v44 = vpop.permute.xlu1 %2499  ;;  %v9737_v60 = vld [vmem:[%s9657_s20 + $0x18] sm:$0xf]  ;;  %v9740_v61 = vld [vmem:[%s9657_s20 + $0x1c] sm:$0x1]  ;;  %v2521_v62 = vpop.permute.xlu0 %2520 }
 0x31d   : > { %v2959_v18 = vadd.f32 %v2958_v15, %v2957_v14  ;;  %v2939_v19 = vsel %vm2865_vm3, %v2853_v0, 0.0  ;;  %v2940_v20 = vsel %vm2867_vm4, %v2854_v5, 0.0  ;;  %v2861_v22 = vunpack.c.l.bf16 %v2833_v10 }
 0x31e   : > { %v2890_v23 = vrot.slane %v2889_v12, 2  ;;  %v2872_v27 = vrot.slane %v2871_v13, 2  ;;  %v2941_v28 = vadd.f32 %v2940_v20, %v2939_v19  ;;  %v2862_v29 = vunpack.c.l.bf16 %v2834_v11  ;;  %v9748_v19 = vld [vmem:[%s9657_s20 + $0x30] sm:$0xf]  ;;  %v9751_v20 = vld [vmem:[%s9657_s20 + $0x34] sm:$0x1] }
 0x31f   : > { %v2960_v39 = vrot.slane %v2959_v18, 4  ;;  %v2647_v40 = vrot.slane %v2507_v17, %v9660_v1  ;;  %v2654_v41 = vrot.slane %v2507_v17, %v9663_v2  ;;  %v2975_v46 = vsel %vm2865_vm3, %v2861_v22, 0.0 }
 0x320   : > { %v2891_v8 = vadd.f32 %v2890_v23, %v2889_v12  ;;  %v2873_v43 = vadd.f32 %v2872_v27, %v2871_v13  ;;  %v2942_v47 = vrot.slane %v2941_v28, 4  ;;  %v2976_v48 = vsel %vm2867_vm4, %v2862_v29, 0.0  ;;  %v2542_v22 = vpop.permute.xlu1 %2541 }
 0x321   : > { %v2817_v49 = vmul.bf16 %v2647_v40, %v9724_v33  ;;  %v2818_v53 = vmul.bf16 %v2654_v41, %v9727_v34  ;;  %v2961_v54 = vadd.f32 %v2960_v39, %v2959_v18  ;;  %v2633_v56 = vrot.slane %v2500_v44, %v9660_v1 }
 0x322   : > { %v2892_v63 = vrot.slane %v2891_v8, 1  ;;  %v2977_v0 = vadd.f32 %v2976_v48, %v2975_v46  ;;  %v2640_v5 = vrot.slane %v2500_v44, %v9663_v2  ;;  %v2874_v10 = vrot.slane %v2873_v43, 1  ;;  %v2486_v48 = vpop.permute.xlu0 %2485 }
 0x323   : > { %v2845_v58 = vunpack.c.l.bf16 %v2817_v49  ;;  %v2846_v59 = vunpack.c.l.bf16 %v2818_v53  ;;  %v2943_v11 = vadd.f32 %v2942_v47, %v2941_v28  ;;  %v2962_v14 = vrot.slane %v2961_v54, 2 }
 0x324   : > { %v2815_v17 = vmul.bf16 %v2633_v56, %v9737_v60  ;;  %v2816_v18 = vmul.bf16 %v2640_v5, %v9740_v61  ;;  %v2675_v23 = vrot.slane %v2521_v62, %v9660_v1  ;;  %v2682_v27 = vrot.slane %v2521_v62, %v9663_v2 }
 0x325   : > { %v2903_v12 = vsel %vm2865_vm3, %v2845_v58, 0.0  ;;  %v2904_v13 = vsel %vm2867_vm4, %v2846_v59, 0.0  ;;  %v2978_v28 = vrot.slane %v2977_v0, 4  ;;  %v9755_v41 = vadd.f32 %v2892_v63, %v2891_v8  ;;  %v9766_v59 = vld [vmem:[%s9657_s20 + $0x48] sm:$0xf] }
 0x326   : > { %v2905_v15 = vadd.f32 %v2904_v13, %v2903_v12  ;;  %v2843_v39 = vunpack.c.l.bf16 %v2815_v17  ;;  %v2844_v40 = vunpack.c.l.bf16 %v2816_v18  ;;  %v9757_v44 = vadd.f32 %v2874_v10, %v2873_v43  ;;  %v9769_v43 = vld [vmem:[%s9657_s20 + $0x4c] sm:$0x1]  ;;  %v9773_v10 = vld [vmem:[%s9657_s20 + $0x8] sm:$0xf]  ;;  %v2556_v18 = vpop.permute.xlu1 %2555 }
 0x327   : > { %v2821_v46 = vmul.bf16 %v2675_v23, %v9748_v19  ;;  %v2822_v47 = vmul.bf16 %v2682_v27, %v9751_v20  ;;  %v9761_v49 = vadd.f32 %v2962_v14, %v2961_v54  ;;  %v2944_v53 = vrot.slane %v2943_v11, 2  ;;  %v9777_v13 = vld [vmem:[%s9657_s20 + $0xc] sm:$0x1] }
 0x328   : > { %v2906_v29 = vrot.slane %v2905_v15, 4  ;;  %v2894_v56 = vsel %vm2865_vm3, %v2843_v39, 0.0  ;;  %v2895_v58 = vsel %vm2867_vm4, %v2844_v40, 0.0  ;;  %v2717_v5 = vrot.slane %v2542_v22, %v9660_v1 }
 0x329   : > { %v2896_v62 = vadd.f32 %v2895_v58, %v2894_v56  ;;  %v2849_v8 = vunpack.c.l.bf16 %v2821_v46  ;;  %v2850_v63 = vunpack.c.l.bf16 %v2822_v47  ;;  %v2724_v54 = vrot.slane %v2542_v22, %v9663_v2 }
 0x32a   : > { %v2907_v12 = vadd.f32 %v2906_v29, %v2905_v15  ;;  %v2605_v14 = vrot.slane %v2486_v48, %v9660_v1  ;;  %v2612_v17 = vrot.slane %v2486_v48, %v9663_v2  ;;  %v2827_v40 = vmul.bf16 %v2717_v5, %v9766_v59 }
 0x32b   : > { %v2897_v23 = vrot.slane %v2896_v62, 4  ;;  %v2921_v27 = vsel %vm2865_vm3, %v2849_v8, 0.0  ;;  %v2922_v39 = vsel %vm2867_vm4, %v2850_v63, 0.0  ;;  %v9784_v46 = vadd.f32 %v2978_v28, %v2977_v0  ;;  %v9794_v0 = vld [vmem:[%s9657_s20 + $0x58] sm:$0xf] }
 0x32c   : > { %v2923_v15 = vadd.f32 %v2922_v39, %v2921_v27  ;;  %v2828_v22 = vmul.bf16 %v2724_v54, %v9769_v43  ;;  %v2811_v29 = vmul.bf16 %v2605_v14, %v9773_v10  ;;  %v2855_v56 = vunpack.c.l.bf16 %v2827_v40  ;;  %v9812_v8 = vld [vmem:[%s9657_s20 + $0x2c] sm:$0x1] }
 0x32d   : > { %v2898_v47 = vadd.f32 %v2897_v23, %v2896_v62  ;;  %v2812_v48 = vmul.bf16 %v2612_v17, %v9777_v13  ;;  %v2745_v58 = vrot.slane %v2556_v18, %v9660_v1  ;;  %v9791_v16 = vadd.f32 %v2944_v53, %v2943_v11  ;;  %v9798_v62 = vld [vmem:[%s9657_s20 + $0x5c] sm:$0x1]  ;;  %v2514_v17 = vpop.permute.xlu0 %2513 }
 0x32e   : > { %v2856_v63 = vunpack.c.l.bf16 %v2828_v22  ;;  %v2839_v5 = vunpack.c.l.bf16 %v2811_v29  ;;  %v2908_v28 = vrot.slane %v2907_v12, 2  ;;  %v2948_v54 = vsel %vm2865_vm3, %v2855_v56, 0.0 }
 0x32f   : > { %v2840_v27 = vunpack.c.l.bf16 %v2812_v48  ;;  %v2752_v14 = vrot.slane %v2556_v18, %v9663_v2  ;;  %v2924_v39 = vrot.slane %v2923_v15, 4  ;;  %v2899_v40 = vrot.slane %v2898_v47, 2  ;;  %v9807_v48 = vld [vmem:[%s9657_s20 + $0x28] sm:$0xf] }
 0x330   : > { %v2949_v11 = vsel %vm2867_vm4, %v2856_v63, 0.0  ;;  %v2876_v53 = vsel %vm2865_vm3, %v2839_v5, 0.0  ;;  %v2831_v56 = vmul.bf16 %v2745_v58, %v9794_v0  ;;  %v2661_v63 = vrot.slane %v2514_v17, %v9660_v1  ;;  %v2570_v58 = vpop.permute.xlu1 %2569 }
 0x331   : > { %v2950_v22 = vadd.f32 %v2949_v11, %v2948_v54  ;;  %v2877_v29 = vsel %vm2867_vm4, %v2840_v27, 0.0  ;;  %v2832_v18 = vmul.bf16 %v2752_v14, %v9798_v62  ;;  %v9815_v23 = vadd.f32 %v2908_v28, %v2907_v12  ;;  %v9826_v28 = vld [vmem:[%s9657_s20 + $0x68] sm:$0xf] }
 0x332   : > { %v2878_v21 = vadd.f32 %v2877_v29, %v2876_v53  ;;  %v2859_v54 = vunpack.c.l.bf16 %v2831_v56  ;;  %v2668_v27 = vrot.slane %v2514_v17, %v9663_v2  ;;  %v9818_v11 = vadd.f32 %v2924_v39, %v2923_v15  ;;  %10354 = vst [vmem:[#allocation20_spill] sm:$0xff] %v9826_v28  ;;  %v2528_v56 = vpop.permute.xlu0 %2527 }
 0x333   : > { %v2951_v5 = vrot.slane %v2950_v22, 4  ;;  %v2860_v25 = vunpack.c.l.bf16 %v2832_v18  ;;  %v2819_v53 = vmul.bf16 %v2661_v63, %v9807_v48  ;;  %v9821_v14 = vadd.f32 %v2899_v40, %v2898_v47 }
 0x334   : > { %v2879_v36 = vrot.slane %v2878_v21, 4  ;;  %v2966_v37 = vsel %vm2865_vm3, %v2859_v54, 0.0  ;;  %v2820_v12 = vmul.bf16 %v2668_v27, %v9812_v8  ;;  %v2773_v47 = vrot.slane %v2570_v58, %v9660_v1 }
 0x335   : > { %v2952_v29 = vadd.f32 %v2951_v5, %v2950_v22  ;;  %v2967_v15 = vsel %vm2867_vm4, %v2860_v25, 0.0  ;;  %v2847_v39 = vunpack.c.l.bf16 %v2819_v53  ;;  %v2780_v63 = vrot.slane %v2570_v58, %v9663_v2 }
 0x336   : > { %v2880_v17 = vadd.f32 %v2879_v36, %v2878_v21  ;;  %v2968_v22 = vadd.f32 %v2967_v15, %v2966_v37  ;;  %v2848_v18 = vunpack.c.l.bf16 %v2820_v12  ;;  %v2835_v27 = vmul.bf16 %v2773_v47, %v9826_v28  ;;  %v9837_v21 = vld [vmem:[%s9657_s20 + $0x38] sm:$0xf]  ;;  %v9843_v37 = vld [vmem:[%s9657_s20 + $0x3c] sm:$0x1] }
 0x337   : > { %v2953_v40 = vrot.slane %v2952_v29, 2  ;;  %v2912_v54 = vsel %vm2865_vm3, %v2847_v39, 0.0  ;;  %10356 = vst [vmem:[#allocation22_spill] sm:$0xff] %v9837_v21  ;;  %v2689_v25 = vrot.slane %v2528_v56, %v9660_v1  ;;  %v2836_v31 = vmul.bf16 %v2780_v63, %v9830_v45 }
 0x338   : > { %v2881_v5 = vrot.slane %v2880_v17, 2  ;;  %v2969_v53 = vrot.slane %v2968_v22, 4  ;;  %v2913_v42 = vsel %vm2867_vm4, %v2848_v18, 0.0  ;;  %v2863_v15 = vunpack.c.l.bf16 %v2835_v27 }
 0x339   : > { %v2954_v36 = vadd.f32 %v2953_v40, %v2952_v29  ;;  %v2914_v58 = vadd.f32 %v2913_v42, %v2912_v54  ;;  %v2696_v24 = vrot.slane %v2528_v56, %v9663_v2  ;;  %v2864_v7 = vunpack.c.l.bf16 %v2836_v31 }
 0x33a   : > { %v2882_v12 = vadd.f32 %v2881_v5, %v2880_v17  ;;  %v2970_v47 = vadd.f32 %v2969_v53, %v2968_v22  ;;  %v2823_v28 = vmul.bf16 %v2689_v25, %v9837_v21  ;;  %v2984_v40 = vsel %vm2865_vm3, %v2863_v15, 0.0 }
 0x33b   : > { %v2955_v39 = vrot.slane %v2954_v36, 1  ;;  %v2915_v29 = vrot.slane %v2914_v58, 4  ;;  %v2824_v18 = vmul.bf16 %v2696_v24, %v9843_v37  ;;  %v2926_v63 = vrot.slane %v9818_v11, 2 }
 0x33c   : > { %v2883_v1 = vrot.slane %v2882_v12, 1  ;;  %v2971_v45 = vrot.slane %v2970_v47, 2  ;;  %v2985_v42 = vsel %vm2867_vm4, %v2864_v7, 0.0  ;;  %v2851_v17 = vunpack.c.l.bf16 %v2823_v28 }
 0x33d   : > { %v2916_v2 = vadd.f32 %v2915_v29, %v2914_v58  ;;  %v2986_v56 = vadd.f32 %v2985_v42, %v2984_v40  ;;  %v2852_v54 = vunpack.c.l.bf16 %v2824_v18  ;;  %v2901_v31 = vrot.slane %v9821_v14, 1 }
 0x33e   : > { %v2884_v5 = vadd.f32 %v2883_v1, %v2882_v12  ;;  %v2956_v22 = vadd.f32 %v2955_v39, %v2954_v36  ;;  %v2972_v27 = vadd.f32 %v2971_v45, %v2970_v47  ;;  %v2930_v25 = vsel %vm2865_vm3, %v2851_v17, 0.0 }
 0x33f   : > { %v2917_v53 = vrot.slane %v2916_v2, 2  ;;  %v2987_v15 = vrot.slane %v2986_v56, 4  ;;  %v2931_v24 = vsel %vm2867_vm4, %v2852_v54, 0.0  ;;  %v10357_v7 = vrot.slane %v9791_v16, 1 }
 0x340   : > { %v3008_v21 = vsel %vm3007_vm5, %v2884_v5, %v9757_v44  ;;  %v10358_v12 = vrot.slane %v9784_v46, 2  ;;  %v2973_v1 = vrot.slane %v2972_v27, 1  ;;  %v2932_v36 = vadd.f32 %v2931_v24, %v2930_v25 }
 0x341   : > { %v2947_v28 = vadd.f32 %v10357_v7, %v9791_v16  ;;  %v2910_v45 = vrot.slane %v9815_v23, 1  ;;  %v2918_v39 = vadd.f32 %v2917_v53, %v2916_v2  ;;  %v2988_v47 = vadd.f32 %v2987_v15, %v2986_v56 }
 0x342   : > { %v2981_v58 = vadd.f32 %v10358_v12, %v9784_v46  ;;  %v3010_v29 = vsel %vm3009_vm6, %v9755_v41, %v3008_v21  ;;  %v2902_v40 = vadd.f32 %v2901_v31, %v9821_v14  ;;  %v2927_v44 = vadd.f32 %v2926_v63, %v9818_v11 }
 0x343   : > { %v2933_v18 = vrot.slane %v2932_v36, 4  ;;  %v2919_v16 = vrot.slane %v2918_v39, 1  ;;  %v2989_v42 = vrot.slane %v2988_v47, 2  ;;  %v2974_v17 = vadd.f32 %v2973_v1, %v2972_v27 }
 0x344   : > { %v3021_v46 = vsel %vm3007_vm5, %v2956_v22, %v2947_v28  ;;  %v10359_v5 = vrot.slane %v9761_v49, 1  ;;  %v3012_v56 = vsel %vm3011_vm7, %v2902_v40, %v3010_v29  ;;  %v2982_v25 = vrot.slane %v2981_v58, 1 }
 0x345   : > { %v2934_v2 = vadd.f32 %v2933_v18, %v2932_v36  ;;  %v2911_v41 = vadd.f32 %v2910_v45, %v9815_v23  ;;  %v2990_v14 = vadd.f32 %v2989_v42, %v2988_v47  ;;  %v2920_v11 = vadd.f32 %v2919_v16, %v2918_v39 }
 0x346   : > { %v2965_v54 = vadd.f32 %v10359_v5, %v9761_v49  ;;  %v2928_v31 = vrot.slane %v2927_v44, 1  ;;  %v2983_v49 = vadd.f32 %v2982_v25, %v2981_v58 }
 0x347   : > { %v2935_v21 = vrot.slane %v2934_v2, 2  ;;  %v3014_v27 = vsel %vm3013_vm8, %v2911_v41, %v3012_v56  ;;  %v2991_v22 = vrot.slane %v2990_v14, 1 }
 0x348   : > { %v3022_v63 = vsel %vm3009_vm6, %v2965_v54, %v3021_v46  ;;  %v3016_v28 = vsel %vm3015_vm9, %v2920_v11, %v3014_v27  ;;  %v2929_v12 = vadd.f32 %v2928_v31, %v2927_v44 }
 0x349   : > { %v3023_v53 = vsel %vm3011_vm7, %v2974_v17, %v3022_v63  ;;  %v2936_v15 = vadd.f32 %v2935_v21, %v2934_v2  ;;  %v2992_v24 = vadd.f32 %v2991_v22, %v2990_v14  ;;  %v9314_v14 = vmov 1966171168  }
 0x34a   : > { %v3024_v23 = vsel %vm3013_vm8, %v2983_v49, %v3023_v53  ;;  %v3018_v39 = vsel %vm3017_vm10, %v2929_v12, %v3016_v28  ;;  %v3139_v21 = vunpack.c.l.s4 %v9314_v14 }
 0x34b   : > { %v2937_v7 = vrot.slane %v2936_v15, 1  ;;  %v3025_v1 = vsel %vm3015_vm9, %v2992_v24, %v3024_v23 }
 0x34c   : > { %v8185_v45 = vadd.f32 %v9651_v57, %v3025_v1  ;;  %v3140_v11 = vunpack.c.0.s8 %v3139_v21 }
 0x34d   : > { %v2938_v36 = vadd.f32 %v2937_v7, %v2936_v15 }
 0x34e   : > { %v3111_v58 = vmul.f32 0.057735026, %v8185_v45  ;;  %v3143_v22 = vsub.s32 %v3140_v11, %v9616_v26 }
 0x34f   : > { %v3020_v47 = vsel %vm3019_vm11, %v2938_v36, %v3018_v39 }
 0x350   : > { %v8184_v29 = vadd.f32 %v9649_v55, %v3020_v47  ;;  %v3116_v40 = vsel %vm3115_vm12, %v3111_v58, -inf }
 0x351   : > { %3117 = vmax.xlane.f32.xlu1 %v3116_v40 }
 0x352   : > { %v3110_v18 = vmul.f32 0.057735026, %v8184_v29 }
 0x354   : > { %v3112_v44 = vsel %vm2865_vm3, %v3110_v18, -inf }
 0x355   : > { %3113 = vmax.xlane.f32.xlu0 %v3112_v44 }
 0x3de   : > { %v3118_v16 = vpop.xlane.xlu1 %3117 }
 0x3df   : > { %v3120_v42 = vsub.f32 %v3111_v58, %v3118_v16 }
 0x3e1   : > { %v3123_v5 = vmul.f32 1.442695, %v3120_v42 }
 0x3e2   : > { %v3114_v17 = vpop.xlane.xlu0 %3113 }
 0x3e3   : > { %v3119_v46 = vsub.f32 %v3110_v18, %v3114_v17 }
 0x3e5   : > { %v3121_v57 = vmul.f32 1.442695, %v3119_v46 }
 0x3e7   : > { %9145 = vpow2.f32 %v3121_v57 }
 0x3e8   : > { %9147 = vpow2.f32 %v3123_v5 }
 0x3f1   : > { %v9146_v54 = vpop.eup %9145 }
 0x3f2   : > { %v3125_v2 = vsel %vm2865_vm3, %v9146_v54, 0.0  ;;  %v9148_v56 = vpop.eup %9147 }
 0x3f3   : > { %3126 = vadd.xlane.f32.xlu0 %v3125_v2  ;;  %v3128_v55 = vsel %vm3115_vm12, %v9148_v56, 0.0 }
 0x3f7   : > { %3129 = vadd.xlane.f32.xlu0 %v3128_v55 }
 0x480   : > { %v3127_v25 = vpop.xlane.xlu0 %3126 }
 0x481   : > { %9149 = vrcp.f32 %v3127_v25 }
 0x484   : > { %v3130_v41 = vpop.xlane.xlu0 %3129 }
 0x485   : > { %9151 = vrcp.f32 %v3130_v41 }
 0x48b   : > { %v9150_v63 = vpop.eup %9149 }
 0x48c   : > { %v3133_v27 = vmul.f32 %v9150_v63, %v9146_v54 }
 0x48f   : > { %v9152_v31 = vpop.eup %9151 }
 0x490   : > { %v3134_v53 = vmul.f32 %v9152_v31, %v9148_v56 }
 0x492   : > { %v9888_v15 = vpack.c.bf16 %v3134_v53, %v3133_v27  ;;  %v7591_v49 = vpack.c.bf16 %v3134_v53, %v3134_v53 }
 0x494   : > { %v3151_v24 = vrot.slane %v7591_v49, %v3143_v22  ;;  %v3144_v7 = vrot.slane %v9888_v15, %v3143_v22 }
 0x496   : > { %v3167_v28 = vrot.slane %v3151_v24, %v3143_v22  ;;  %v3160_v23 = vrot.slane %v3144_v7, %v3143_v22  ;;  %v3153_v12 = vcombine.high %v3151_v24, %v3151_v24  ;;  %v3152_v1 = vcombine.high %v3144_v7, %v3144_v7 }
 0x498   : > { %v7596_v36 = vpack.i.b16 %v3167_v28, %v3167_v28  ;;  %v7592_v45 = vpack.i.b16 %v3160_v23, %v3160_v23  ;;  %v3194_v39 = vunpack.i.h.s16 %v3167_v28  ;;  %v9891_v47 = vrot.slane %v3153_v12, %v3143_v22 }
 0x499   : > { %v9893_v58 = vcombine.high %v3167_v28, %v3167_v28  ;;  %v3186_v29 = vunpack.i.h.s16 %v3160_v23  ;;  %v9901_v46 = vrot.slane %v3152_v1, %v3143_v22  ;;  %v9911_v63 = vcombine.high %v3160_v23, %v3160_v23 }
 0x49a   : > { %v3248_v40 = vrot.slane %v7596_v36, %v9622_v32  ;;  %v3216_v18 = vrot.slane %v7592_v45, %v9622_v32  ;;  %v3208_v44 = vpack.i.b16 %v3194_v39, %v3194_v39  ;;  %v7597_v16 = vpack.i.b16 %v9891_v47, %v9891_v47 }
 0x49b   : > { %v7598_v42 = vpack.i.b16 %v9893_v58, %v9893_v58  ;;  %v3200_v17 = vpack.i.b16 %v3186_v29, %v3186_v29  ;;  %v7593_v11 = vpack.i.b16 %v9901_v46, %v9901_v46  ;;  %v7594_v23 = vpack.i.b16 %v9911_v63, %v9911_v63 }
 0x49c   : > { %v3326_v57 = vpack.i.b16 %v3248_v40, %v3248_v40  ;;  %v3270_v5 = vpack.i.b16 %v3216_v18, %v3216_v18  ;;  %v3252_v54 = vrot.slane %v3208_v44, %v9622_v32  ;;  %v3256_v2 = vrot.slane %v7597_v16, %v9622_v32 }
 0x49d   : > { %v3264_v56 = vrot.slane %v7598_v42, %v9622_v32  ;;  %v3220_v21 = vrot.slane %v3200_v17, %v9622_v32  ;;  %v3224_v36 = vrot.slane %v7593_v11, %v9622_v32  ;;  %v3232_v42 = vrot.slane %v7594_v23, %v9622_v32 }
 0x49e   : > { %v3331_v55 = vrot.slane %v3326_v57, %v9622_v32  ;;  %v3275_v25 = vrot.slane %v3270_v5, %v9622_v32  ;;  %v3333_v41 = vpack.i.b16 %v3252_v54, %v3252_v54  ;;  %v3340_v14 = vpack.i.b16 %v3256_v2, %v3256_v2 }
 0x49f   : > { %v3354_v49 = vpack.i.b16 %v3264_v56, %v3264_v56  ;;  %v3277_v40 = vpack.i.b16 %v3220_v21, %v3220_v21  ;;  %v3284_v5 = vpack.i.b16 %v3224_v36, %v3224_v36 }
 0x4a0   : > { %v7607_v31 = vcombine.low %v3331_v55, %v3331_v55  ;;  %v7599_v27 = vcombine.low %v3275_v25, %v3275_v25  ;;  %v3338_v22 = vrot.slane %v3333_v41, %v9622_v32  ;;  %v3345_v53 = vrot.slane %v3340_v14, %v9622_v32 }
 0x4a1   : > { %v3282_v57 = vrot.slane %v3277_v40, %v9622_v32  ;;  %v3196_v41 = vunpack.i.h.s16 %v9891_v47  ;;  %v3188_v14 = vunpack.i.h.s16 %v9901_v46  ;;  %v3289_v11 = vrot.slane %v3284_v5, %v9622_v32 }
 0x4a2   : > { %v3440_v24 = vmul.bf16 %v7607_v31, %v9697_v38  ;;  %v3439_v7 = vmul.bf16 %v7607_v31, %v9694_v35  ;;  %v3424_v28 = vmul.bf16 %v7599_v27, %v9675_v9  ;;  %v3423_v12 = vmul.bf16 %v7599_v27, %v9672_v6 }
 0x4a3   : > { %v7608_v1 = vcombine.low %v3338_v22, %v3338_v22  ;;  %v7609_v29 = vcombine.low %v3345_v53, %v3345_v53  ;;  %v3359_v38 = vrot.slane %v3354_v49, %v9622_v32  ;;  %v7600_v21 = vcombine.low %v3282_v57, %v3282_v57 }
 0x4a4   : > { %v3468_v45 = vunpack.c.l.bf16 %v3440_v24  ;;  %v3467_v39 = vunpack.c.l.bf16 %v3439_v7  ;;  %v3452_v18 = vunpack.c.l.bf16 %v3424_v28  ;;  %v3451_v6 = vunpack.c.l.bf16 %v3423_v12 }
 0x4a5   : > { %v3442_v44 = vmul.bf16 %v7608_v1, %v9769_v43  ;;  %v3441_v16 = vmul.bf16 %v7608_v1, %v9766_v59  ;;  %v3444_v17 = vmul.bf16 %v7609_v29, %v9689_v50  ;;  %v3443_v43 = vmul.bf16 %v7609_v29, %v9686_v30 }
 0x4a6   : > { %v3530_v35 = vsel %vm2867_vm4, %v3468_v45, 0.0  ;;  %v3527_v9 = vsel %vm2865_vm3, %v3467_v39, 0.0  ;;  %v7611_v2 = vcombine.low %v3359_v38, %v3359_v38  ;;  %v3482_v56 = vsel %vm2867_vm4, %v3452_v18, 0.0 }
 0x4a7   : > { %3531 = vadd.xlane.f32.xlu0 %v3530_v35  ;;  %3528 = vadd.xlane.f32.xlu1 %v3527_v9  ;;  %v3470_v54 = vunpack.c.l.bf16 %v3442_v44  ;;  %v3479_v55 = vsel %vm2865_vm3, %v3451_v6, 0.0  ;;  %v3469_v25 = vunpack.c.l.bf16 %v3441_v16  ;;  %v3298_v59 = vpack.i.b16 %v3232_v42, %v3232_v42 }
 0x4a8   : > { %v3472_v50 = vunpack.c.l.bf16 %v3444_v17  ;;  %v3471_v30 = vunpack.c.l.bf16 %v3443_v43  ;;  %v3448_v27 = vmul.bf16 %v7611_v2, %v9711_v52  ;;  %v3447_v22 = vmul.bf16 %v7611_v2, %v9708_v51 }
 0x4a9   : > { %v3536_v31 = vsel %vm2867_vm4, %v3470_v54, 0.0  ;;  %v3533_v53 = vsel %vm2865_vm3, %v3469_v25, 0.0  ;;  %v3210_v49 = vpack.i.b16 %v3196_v41, %v3196_v41  ;;  %v3202_v24 = vpack.i.b16 %v3188_v14, %v3188_v14 }
 0x4aa   : > { %v3190_v7 = vunpack.i.h.s16 %v9911_v63  ;;  %v3303_v47 = vrot.slane %v3298_v59, %v9622_v32  ;;  %v3426_v28 = vmul.bf16 %v7600_v21, %v9777_v13  ;;  %v3425_v12 = vmul.bf16 %v7600_v21, %v9773_v10 }
 0x4ab   : > { %3483 = vadd.xlane.f32.xlu0 %v3482_v56  ;;  %3480 = vadd.xlane.f32.xlu1 %v3479_v55  ;;  %v3260_v1 = vrot.slane %v3210_v49, %v9622_v32  ;;  %v3184_v52 = vcombine.high %v9901_v46, %v9901_v46  ;;  %v3476_v51 = vunpack.c.l.bf16 %v3448_v27  ;;  %v7601_v36 = vcombine.low %v3289_v11, %v3289_v11 }
 0x4ac   : > { %v3228_v23 = vrot.slane %v3202_v24, %v9622_v32  ;;  %v3204_v45 = vpack.i.b16 %v3190_v7, %v3190_v7  ;;  %v3542_v63 = vsel %vm2867_vm4, %v3472_v50, 0.0  ;;  %v3539_v39 = vsel %vm2865_vm3, %v3471_v30, 0.0 }
 0x4ad   : > { %v3475_v29 = vunpack.c.l.bf16 %v3447_v22  ;;  %v3347_v40 = vpack.i.b16 %v3260_v1, %v3260_v1  ;;  %v3454_v13 = vunpack.c.l.bf16 %v3426_v28  ;;  %v3453_v10 = vunpack.c.l.bf16 %v3425_v12 }
 0x4ae   : > { %v7603_v18 = vcombine.low %v3303_v47, %v3303_v47  ;;  %v7595_v44 = vpack.i.b16 %v3184_v52, %v3184_v52  ;;  %v3554_v38 = vsel %vm2867_vm4, %v3476_v51, 0.0  ;;  %v3428_v46 = vmul.bf16 %v7601_v36, %v9669_v4 }
 0x4af   : > { %3537 = vadd.xlane.f32.xlu0 %v3536_v31  ;;  %3534 = vadd.xlane.f32.xlu1 %v3533_v53  ;;  %v3291_v35 = vpack.i.b16 %v3228_v23, %v3228_v23  ;;  %v3236_v9 = vrot.slane %v3204_v45, %v9622_v32  ;;  %v3551_v6 = vsel %vm2865_vm3, %v3475_v29, 0.0  ;;  %v3427_v16 = vmul.bf16 %v7601_v36, %v9666_v3 }
 0x4b0   : > { %v3352_v42 = vrot.slane %v3347_v40, %v9622_v32  ;;  %v3192_v17 = vunpack.i.h.s16 %v3184_v52  ;;  %v3488_v57 = vsel %vm2867_vm4, %v3454_v13, 0.0  ;;  %v3432_v5 = vmul.bf16 %v7603_v18, %v9727_v34 }
 0x4b1   : > { %v3431_v54 = vmul.bf16 %v7603_v18, %v9724_v33  ;;  %v3240_v4 = vrot.slane %v7595_v44, %v9622_v32  ;;  %v3456_v43 = vunpack.c.l.bf16 %v3428_v46  ;;  %v3296_v2 = vrot.slane %v3291_v35, %v9622_v32 }
 0x4b2   : > { %v3305_v56 = vpack.i.b16 %v3236_v9, %v3236_v9  ;;  %v3198_v55 = vunpack.i.h.s16 %v9893_v58  ;;  %v3485_v3 = vsel %vm2865_vm3, %v3453_v10, 0.0  ;;  %v3455_v25 = vunpack.c.l.bf16 %v3427_v16  ;;  %v10360_v16 = vld [vmem:[#allocation22_spill] sm:$0xff] }
 0x4b3   : > { %3543 = vadd.xlane.f32.xlu0 %v3542_v63  ;;  %3540 = vadd.xlane.f32.xlu1 %v3539_v39  ;;  %v7610_v59 = vcombine.low %v3352_v42, %v3352_v42  ;;  %v3206_v41 = vpack.i.b16 %v3192_v17, %v3192_v17  ;;  %v3460_v14 = vunpack.c.l.bf16 %v3432_v5  ;;  %v3459_v50 = vunpack.c.l.bf16 %v3431_v54  ;;  %v10361_v54 = vld [vmem:[#allocation21_spill] sm:$0xff] }
 0x4b4   : > { %v3312_v34 = vpack.i.b16 %v3240_v4, %v3240_v4  ;;  %v3494_v33 = vsel %vm2867_vm4, %v3456_v43, 0.0  ;;  %v7602_v21 = vcombine.low %v3296_v2, %v3296_v2  ;;  %v3310_v11 = vrot.slane %v3305_v56, %v9622_v32  ;;  %v10362_v43 = vld [vmem:[#allocation20_spill] sm:$0xff] }
 0x4b5   : > { %v3212_v31 = vpack.i.b16 %v3198_v55, %v3198_v55  ;;  %v3491_v30 = vsel %vm2865_vm3, %v3455_v25, 0.0  ;;  %v3446_v58 = vmul.bf16 %v7610_v59, %v9798_v62  ;;  %v3445_v27 = vmul.bf16 %v7610_v59, %v9794_v0 }
 0x4b6   : > { %v3244_v22 = vrot.slane %v3206_v41, %v9622_v32  ;;  %v3506_v53 = vsel %vm2867_vm4, %v3460_v14, 0.0  ;;  %v3317_v49 = vrot.slane %v3312_v34, %v9622_v32  ;;  %v3430_v24 = vmul.bf16 %v7602_v21, %v9740_v61  ;;  %v8640_v41 = vld [vmem:[%s10302_s5 + $0x8] ss:$12 sps:$4 sm:$0x1f]  }
 0x4b7   : > { %3555 = vadd.xlane.f32.xlu0 %v3554_v38  ;;  %3552 = vadd.xlane.f32.xlu1 %v3551_v6  ;;  %v3429_v7 = vmul.bf16 %v7602_v21, %v9737_v60  ;;  %v7604_v47 = vcombine.low %v3310_v11, %v3310_v11  ;;  %v3268_v28 = vrot.slane %v3212_v31, %v9622_v32  ;;  %v3503_v12 = vsel %vm2865_vm3, %v3459_v50, 0.0 }
 0x4b8   : > { %v3474_v62 = vunpack.c.l.bf16 %v3446_v58  ;;  %v3473_v1 = vunpack.c.l.bf16 %v3445_v27  ;;  %v3319_v0 = vpack.i.b16 %v3244_v22, %v3244_v22  ;;  %v7605_v52 = vcombine.low %v3317_v49, %v3317_v49 }
 0x4b9   : > { %v3458_v51 = vunpack.c.l.bf16 %v3430_v24  ;;  %v3457_v36 = vunpack.c.l.bf16 %v3429_v7  ;;  %v3434_v23 = vmul.bf16 %v7604_v47, %v9812_v8  ;;  %v3361_v45 = vpack.i.b16 %v3268_v28, %v3268_v28 }
 0x4ba   : > { %v3548_v61 = vsel %vm2867_vm4, %v3474_v62, 0.0  ;;  %v3545_v60 = vsel %vm2865_vm3, %v3473_v1, 0.0  ;;  %v3433_v63 = vmul.bf16 %v7604_v47, %v9807_v48  ;;  %v3324_v39 = vrot.slane %v3319_v0, %v9622_v32 }
 0x4bb   : > { %3489 = vadd.xlane.f32.xlu0 %v3488_v57  ;;  %3486 = vadd.xlane.f32.xlu1 %v3485_v3  ;;  %v3500_v29 = vsel %vm2867_vm4, %v3458_v51, 0.0  ;;  %v3462_v40 = vunpack.c.l.bf16 %v3434_v23  ;;  %v3436_v13 = vmul.bf16 %v7605_v52, %v9751_v20  ;;  %v3435_v10 = vmul.bf16 %v7605_v52, %v9748_v19 }
 0x4bc   : > { %v3497_v8 = vsel %vm2865_vm3, %v3457_v36, 0.0  ;;  %v3461_v18 = vunpack.c.l.bf16 %v3433_v63  ;;  %v7606_v44 = vcombine.low %v3324_v39, %v3324_v39  ;;  %v3366_v38 = vrot.slane %v3361_v45, %v9622_v32 }
 0x4bd   : > { %v3512_v48 = vsel %vm2867_vm4, %v3462_v40, 0.0  ;;  %v3464_v46 = vunpack.c.l.bf16 %v3436_v13  ;;  %v3463_v35 = vunpack.c.l.bf16 %v3435_v10  ;;  %v3791_v14 = vsel %vm3783_vm1, %v8640_v41, 0 }
 0x4be   : > { %v3509_v9 = vsel %vm2865_vm3, %v3461_v18, 0.0  ;;  %v3438_v6 = vmul.bf16 %v7606_v44, %v9843_v37  ;;  %v3437_v20 = vmul.bf16 %v7606_v44, %v10360_v16  ;;  %v7612_v42 = vcombine.low %v3366_v38, %v3366_v38  ;;  %8153 = vmatpush3.bf16.msra.mxu1 %v3791_v14 }
 0x4bf   : > { %3495 = vadd.xlane.f32.xlu0 %v3494_v33  ;;  %3492 = vadd.xlane.f32.xlu1 %v3491_v30  ;;  %v3518_v19 = vsel %vm2867_vm4, %v3464_v46, 0.0  ;;  %v3515_v17 = vsel %vm2865_vm3, %v3463_v35, 0.0  ;;  %v10363_v50 = vmov 0.0   ;;  %v10364_v28 = vlaneseq }
 0x4c0   : > { %v3466_v57 = vunpack.c.l.bf16 %v3438_v6  ;;  %v3465_v5 = vunpack.c.l.bf16 %v3437_v20  ;;  %v3450_v4 = vmul.bf16 %v7612_v42, %v10361_v54  ;;  %v3449_v2 = vmul.bf16 %v7612_v42, %v10362_v43  ;;  %8158 = vmatprep.subr.bf16.mxu1 %v10363_v50 }
 0x4c2   : > { %v3524_v56 = vsel %vm2867_vm4, %v3466_v57, 0.0  ;;  %v3521_v37 = vsel %vm2865_vm3, %v3465_v5, 0.0  ;;  %v3478_v55 = vunpack.c.l.bf16 %v3450_v4  ;;  %v3477_v3 = vunpack.c.l.bf16 %v3449_v2 }
 0x4c3   : > { %3507 = vadd.xlane.f32.xlu0 %v3506_v53  ;;  %3504 = vadd.xlane.f32.xlu1 %v3503_v12  ;;  %v3624_v12 = vand.u32 127, %v10364_v28 }
 0x4c4   : > { %v3560_v25 = vsel %vm2867_vm4, %v3478_v55, 0.0  ;;  %v3557_v59 = vsel %vm2865_vm3, %v3477_v3, 0.0 }
 0x4c5   : > { %v3629_v0 = vadd.s32 4294967288, %v3624_v12  ;;  %v10006_v63 = vsub.s32 %v3624_v12, %v9616_v26 }
 0x4c7   : > { %3549 = vadd.xlane.f32.xlu0 %v3548_v61  ;;  %3546 = vadd.xlane.f32.xlu1 %v3545_v60  ;;  %v10009_v39 = vsub.s32 %v3629_v0, %v9616_v26 }
 0x4cb   : > { %3501 = vadd.xlane.f32.xlu0 %v3500_v29  ;;  %3498 = vadd.xlane.f32.xlu1 %v3497_v8 }
 0x4cf   : > { %3513 = vadd.xlane.f32.xlu0 %v3512_v48  ;;  %3510 = vadd.xlane.f32.xlu1 %v3509_v9 }
 0x4d3   : > { %3519 = vadd.xlane.f32.xlu0 %v3518_v19  ;;  %3516 = vadd.xlane.f32.xlu1 %v3515_v17 }
 0x4d7   : > { %3525 = vadd.xlane.f32.xlu0 %v3524_v56  ;;  %3522 = vadd.xlane.f32.xlu1 %v3521_v37 }
 0x4db   : > { %3561 = vadd.xlane.f32.xlu0 %v3560_v25  ;;  %3558 = vadd.xlane.f32.xlu1 %v3557_v59 }
 0x534   : > { %v3532_v34 = vpop.xlane.xlu0 %3531  ;;  %v3529_v33 = vpop.xlane.xlu1 %3528 }
 0x535   : > { %v3571_v52 = vpack.c.bf16 %v3532_v34, %v3529_v33 }
 0x537   : > { %v3611_v40 = vunpack.c.l.b16 %v3571_v52  ;;  %v3612_v13 = vunpack.c.h.b16 %v3571_v52 }
 0x538   : > { %v3484_v21 = vpop.xlane.xlu0 %3483  ;;  %v3481_v11 = vpop.xlane.xlu1 %3480 }
 0x539   : > { %v3563_v51 = vpack.c.bf16 %v3484_v21, %v3481_v11  ;;  %v3702_v26 = vrot.slane %v3611_v40, %v10006_v63  ;;  %v3706_v19 = vrot.slane %v3612_v13, %v10009_v39 }
 0x53b   : > { %v3595_v10 = vunpack.c.l.b16 %v3563_v51  ;;  %v3596_v8 = vunpack.c.h.b16 %v3563_v51  ;;  %v3707_v33 = vsel %vm3634_vm13, %v3706_v19, %v3702_v26 }
 0x53c   : > { %v3538_v31 = vpop.xlane.xlu0 %3537  ;;  %v3535_v30 = vpop.xlane.xlu1 %3534 }
 0x53d   : > { %v3572_v45 = vpack.c.bf16 %v3538_v31, %v3535_v30  ;;  %v3628_v17 = vrot.slane %v3595_v10, %v10006_v63  ;;  %v3633_v57 = vrot.slane %v3596_v8, %v10009_v39 }
 0x53f   : > { %v3613_v38 = vunpack.c.l.b16 %v3572_v45  ;;  %v3614_v48 = vunpack.c.h.b16 %v3572_v45  ;;  %v3635_v21 = vsel %vm3634_vm13, %v3633_v57, %v3628_v17 }
 0x540   : > { %v3544_v58 = vpop.xlane.xlu0 %3543  ;;  %v3541_v27 = vpop.xlane.xlu1 %3540 }
 0x541   : > { %v3573_v61 = vpack.c.bf16 %v3544_v58, %v3541_v27  ;;  %v3711_v4 = vrot.slane %v3613_v38, %v10006_v63  ;;  %v3715_v43 = vrot.slane %v3614_v48, %v10009_v39 }
 0x543   : > { %v3615_v46 = vunpack.c.l.b16 %v3573_v61  ;;  %v3616_v16 = vunpack.c.h.b16 %v3573_v61  ;;  %v3716_v58 = vsel %vm3634_vm13, %v3715_v43, %v3711_v4 }
 0x544   : > { %v10002_v22 = vpop.xlane.xlu0 %3555  ;;  %v3553_v53 = vpop.xlane.xlu1 %3552 }
 0x545   : > { %v3720_v2 = vrot.slane %v3615_v46, %v10006_v63  ;;  %v3724_v59 = vrot.slane %v3616_v16, %v10009_v39 }
 0x547   : > { %v3725_v0 = vsel %vm3634_vm13, %v3724_v59, %v3720_v2 }
 0x548   : > { %v3490_v49 = vpop.xlane.xlu0 %3489  ;;  %v3487_v24 = vpop.xlane.xlu1 %3486 }
 0x549   : > { %v3564_v60 = vpack.c.bf16 %v3490_v49, %v3487_v24 }
 0x54b   : > { %v3597_v35 = vunpack.c.l.b16 %v3564_v60  ;;  %v3598_v9 = vunpack.c.h.b16 %v3564_v60 }
 0x54c   : > { %v3496_v7 = vpop.xlane.xlu0 %3495  ;;  %v3493_v47 = vpop.xlane.xlu1 %3492 }
 0x54d   : > { %v3565_v29 = vpack.c.bf16 %v3496_v7, %v3493_v47  ;;  %v3639_v37 = vrot.slane %v3597_v35, %v10006_v63  ;;  %v3643_v55 = vrot.slane %v3598_v9, %v10009_v39  ;;  %v3575_v7 = vpack.c.bf16 %v10002_v22, %v3553_v53 }
 0x54f   : > { %v3599_v20 = vunpack.c.l.b16 %v3565_v29  ;;  %v3600_v42 = vunpack.c.h.b16 %v3565_v29  ;;  %v3644_v47 = vsel %vm3634_vm13, %v3643_v55, %v3639_v37  ;;  %v3619_v13 = vunpack.c.l.b16 %v3575_v7 }
 0x550   : > { %v3508_v62 = vpop.xlane.xlu0 %3507  ;;  %v3505_v1 = vpop.xlane.xlu1 %3504  ;;  %v3753_v22 = vsel %vm3007_vm5, %v3644_v47, %v3635_v21  ;;  %v3620_v10 = vunpack.c.h.b16 %v3575_v7  ;;  %v8643_v7 = vld [vmem:[#allocation4 + $0x4] ss:$12 sps:$4 sm:$0xff]   ;;  %v10366_v47 = vld [vmem:[#allocation14_spill] sm:$0xff] }
 0x551   : > { %v3648_v41 = vrot.slane %v3599_v20, %v10006_v63  ;;  %v3652_v14 = vrot.slane %v3600_v42, %v10009_v39  ;;  %v3567_v11 = vpack.c.bf16 %v3508_v62, %v3505_v1 }
 0x552   : > { %v3742_v4 = vrot.slane %v3620_v10, %v10009_v39  ;;  %v8689_v10 = vld [vmem:[#allocation4 + $0x68] ss:$12 sps:$4 sm:$0xff]  }
 0x553   : > { %v3653_v52 = vsel %vm3634_vm13, %v3652_v14, %v3648_v41  ;;  %v3603_v51 = vunpack.c.l.b16 %v3567_v11 }
 0x554   : > { %v3550_v36 = vpop.xlane.xlu0 %3549  ;;  %v3547_v23 = vpop.xlane.xlu1 %3546  ;;  %v3754_v8 = vsel %vm3009_vm6, %v3653_v52, %v3753_v22  ;;  %v8646_v52 = vld [vmem:[#allocation4 + $0x1c] ss:$12 sps:$4 sm:$0xff]  }
 0x555   : > { %v3574_v56 = vpack.c.bf16 %v3550_v36, %v3547_v23  ;;  %v3604_v36 = vunpack.c.h.b16 %v3567_v11  ;;  %v3666_v35 = vrot.slane %v3603_v51, %v10006_v63  ;;  %v8674_v51 = vld [vmem:[#allocation4 + $0x20] ss:$12 sps:$4 sm:$0xff]   ;;  %v8683_v22 = vld [vmem:[#allocation4 + $0x110] ss:$12 sps:$4 sm:$0xff]  }
 0x557   : > { %v3617_v27 = vunpack.c.l.b16 %v3574_v56  ;;  %v3618_v49 = vunpack.c.h.b16 %v3574_v56  ;;  %v3670_v9 = vrot.slane %v3604_v36, %v10009_v39  ;;  %v8649_v36 = vld [vmem:[#allocation4 + $0x34] ss:$12 sps:$4 sm:$0xff]  }
 0x558   : > { %v3502_v18 = vpop.xlane.xlu0 %3501  ;;  %v3499_v44 = vpop.xlane.xlu1 %3498 }
 0x559   : > { %v3566_v6 = vpack.c.bf16 %v3502_v18, %v3499_v44  ;;  %v3729_v53 = vrot.slane %v3617_v27, %v10006_v63  ;;  %v3733_v29 = vrot.slane %v3618_v49, %v10009_v39 }
 0x55b   : > { %v3601_v3 = vunpack.c.l.b16 %v3566_v6  ;;  %v3602_v25 = vunpack.c.h.b16 %v3566_v6  ;;  %v3734_v26 = vsel %vm3634_vm13, %v3733_v29, %v3729_v53  ;;  %v8650_v53 = vld [vmem:[#allocation4 + $0x48] ss:$12 sps:$4 sm:$0xff]   ;;  %v8655_v29 = vld [vmem:[#allocation4 + $0x64] ss:$12 sps:$4 sm:$0xff]  }
 0x55c   : > { %v3514_v5 = vpop.xlane.xlu0 %3513  ;;  %v3511_v54 = vpop.xlane.xlu1 %3510 }
 0x55d   : > { %v3568_v34 = vpack.c.bf16 %v3514_v5, %v3511_v54  ;;  %v3657_v28 = vrot.slane %v3601_v3, %v10006_v63  ;;  %v3661_v12 = vrot.slane %v3602_v25, %v10009_v39  ;;  %v3760_v5 = vsel %vm3007_vm5, %v3716_v58, %v3707_v33 }
 0x55e   : > { %v3738_v54 = vrot.slane %v3619_v13, %v10006_v63  ;;  %v3761_v2 = vsel %vm3009_vm6, %v3725_v0, %v3760_v5  ;;  %v3671_v3 = vsel %vm3634_vm13, %v3670_v9, %v3666_v35  ;;  %v8669_v0 = vld [vmem:[#allocation4 + $0x8] ss:$12 sps:$4 sm:$0xff]   ;;  %v8653_v13 = vld [vmem:[#allocation4 + $0x60] ss:$12 sps:$4 sm:$0xff]   ;;  %v8659_v35 = vld [vmem:[#allocation4 + $0x90] ss:$12 sps:$4 sm:$0xff]  }
 0x55f   : > { %v3605_v62 = vunpack.c.l.b16 %v3568_v34  ;;  %v3606_v1 = vunpack.c.h.b16 %v3568_v34  ;;  %v3662_v18 = vsel %vm3634_vm13, %v3661_v12, %v3657_v28  ;;  %v3762_v25 = vsel %vm3011_vm7, %v3734_v26, %v3761_v2  ;;  %v8641_v12 = vld [vmem:[#allocation4] ss:$12 sps:$4 sm:$0xff]   ;;  %v8699_v9 = vld [vmem:[#allocation4 + $0x98] ss:$12 sps:$4 sm:$0xff]   ;;  %v8672_v26 = vld [vmem:[#allocation4 + $0xdc] ss:$12 sps:$4 sm:$0xff]  }
 0x560   : > { %v3520_v31 = vpop.xlane.xlu0 %3519  ;;  %v3517_v30 = vpop.xlane.xlu1 %3516  ;;  %v3755_v43 = vsel %vm3011_vm7, %v3662_v18, %v3754_v8  ;;  %v3743_v21 = vsel %vm3634_vm13, %v3742_v4, %v3738_v54  ;;  %v10367_v28 = vmov 0   ;;  %v8658_v8 = vld [vmem:[#allocation4 + $0x7c] ss:$12 sps:$4 sm:$0xff]   ;;  %v8693_v18 = vld [vmem:[#allocation4 + $0x140] ss:$12 sps:$4 sm:$0xff]  }
 0x561   : > { %v3569_v24 = vpack.c.bf16 %v3520_v31, %v3517_v30  ;;  %v3675_v44 = vrot.slane %v3605_v62, %v10006_v63  ;;  %v3679_v38 = vrot.slane %v3606_v1, %v10009_v39  ;;  %v3756_v41 = vsel %vm3013_vm8, %v3671_v3, %v3755_v43  ;;  %v8673_v62 = vld [vmem:[#allocation4 + $0xe0] ss:$12 sps:$4 sm:$0xff]   ;;  %v8644_v1 = vld [vmem:[#allocation4 + $0x18] ss:$12 sps:$4 sm:$0xff]   ;;  %v8680_v54 = vld [vmem:[#allocation4 + $0x108] ss:$12 sps:$4 sm:$0xff]  }
 0x562   : > { %v3763_v30 = vsel %vm3013_vm8, %v3743_v21, %v3762_v25  ;;  %v8682_v5 = vld [vmem:[#allocation4 + $0x10c] ss:$12 sps:$4 sm:$0xff]   ;;  %v8687_v4 = vld [vmem:[#allocation4 + $0x124] ss:$12 sps:$4 sm:$0xff]   ;;  %v8692_v2 = vld [vmem:[#allocation4 + $0x13c] ss:$12 sps:$4 sm:$0xff]  }
 0x563   : > { %v3607_v23 = vunpack.c.l.b16 %v3569_v24  ;;  %v3608_v45 = vunpack.c.h.b16 %v3569_v24  ;;  %v3680_v56 = vsel %vm3634_vm13, %v3679_v38, %v3675_v44  ;;  %v8656_v44 = vld [vmem:[#allocation4 + $0x78] ss:$12 sps:$4 sm:$0xff]   ;;  %v8694_v38 = vld [vmem:[#allocation4 + $0x80] ss:$12 sps:$4 sm:$0xff]   ;;  %v8700_v3 = vld [vmem:[#allocation4 + $0x168] ss:$12 sps:$4 sm:$0xff]  }
 0x564   : > { %v3526_v61 = vpop.xlane.xlu0 %3525  ;;  %v3523_v60 = vpop.xlane.xlu1 %3522  ;;  %v3757_v11 = vsel %vm3015_vm9, %v3680_v56, %v3756_v41  ;;  %v8685_v43 = vld [vmem:[#allocation4 + $0x120] ss:$12 sps:$4 sm:$0xff]   ;;  %v8690_v56 = vld [vmem:[#allocation4 + $0x138] ss:$12 sps:$4 sm:$0xff]   ;;  %v8704_v41 = vld [vmem:[#allocation4 + $0xb0] ss:$12 sps:$4 sm:$0xff]  }
 0x565   : > { %v3570_v40 = vpack.c.bf16 %v3526_v61, %v3523_v60  ;;  %v3684_v6 = vrot.slane %v3607_v23, %v10006_v63  ;;  %v3688_v16 = vrot.slane %v3608_v45, %v10009_v39  ;;  %v8678_v23 = vld [vmem:[#allocation4 + $0xf8] ss:$12 sps:$4 sm:$0xff]   ;;  %v8647_v45 = vld [vmem:[#allocation4 + $0x30] ss:$12 sps:$4 sm:$0xff]  }
 0x566   : > { %v8679_v61 = vld [vmem:[#allocation4 + $0x38] ss:$12 sps:$4 sm:$0xff]  }
 0x567   : > { %v3609_v48 = vunpack.c.l.b16 %v3570_v40  ;;  %v3610_v46 = vunpack.c.h.b16 %v3570_v40  ;;  %v3689_v59 = vsel %vm3634_vm13, %v3688_v16, %v3684_v6  ;;  %v8652_v60 = vld [vmem:[#allocation4 + $0x4c] ss:$12 sps:$4 sm:$0xff]   ;;  %v8688_v40 = vld [vmem:[#allocation4 + $0x128] ss:$12 sps:$4 sm:$0xff]  }
 0x568   : > { %v3562_v20 = vpop.xlane.xlu0 %3561  ;;  %v3559_v42 = vpop.xlane.xlu1 %3558  ;;  %v3758_v31 = vsel %vm3017_vm10, %v3689_v59, %v3757_v11  ;;  %v8664_v6 = vld [vmem:[#allocation4 + $0xac] ss:$12 sps:$4 sm:$0xff]   ;;  %v8662_v16 = vld [vmem:[#allocation4 + $0xa8] ss:$12 sps:$4 sm:$0xff]   ;;  %v8703_v59 = vld [vmem:[#allocation4 + $0x170] ss:$12 sps:$4 sm:$0xff]  }
 0x569   : > { %v3693_v19 = vrot.slane %v3609_v48, %v10006_v63  ;;  %v3697_v17 = vrot.slane %v3610_v46, %v10009_v39  ;;  %v3576_v57 = vpack.c.bf16 %v3562_v20, %v3559_v42  ;;  %v8661_v48 = vld [vmem:[#allocation4 + $0x94] ss:$12 sps:$4 sm:$0xff]   ;;  %v8698_v46 = vld [vmem:[#allocation4 + $0x158] ss:$12 sps:$4 sm:$0xff]  }
 0x56a   : > { %v8667_v20 = vld [vmem:[#allocation4 + $0xc4] ss:$12 sps:$4 sm:$0xff]   ;;  %v8665_v42 = vld [vmem:[#allocation4 + $0xc0] ss:$12 sps:$4 sm:$0xff]  }
 0x56b   : > { %v3621_v37 = vunpack.c.l.b16 %v3576_v57  ;;  %v3622_v55 = vunpack.c.h.b16 %v3576_v57  ;;  %v3698_v14 = vsel %vm3634_vm13, %v3697_v17, %v3693_v19  ;;  %v8670_v19 = vld [vmem:[#allocation4 + $0xd8] ss:$12 sps:$4 sm:$0xff]   ;;  %v8677_v17 = vld [vmem:[#allocation4 + $0xf4] ss:$12 sps:$4 sm:$0xff]   ;;  %v8675_v57 = vld [vmem:[#allocation4 + $0xf0] ss:$12 sps:$4 sm:$0xff]  }
 0x56c   : > { %v3759_v27 = vsel %vm3019_vm11, %v3698_v14, %v3758_v31  ;;  %v8702_v25 = vld [vmem:[#allocation4 + $0x16c] ss:$12 sps:$4 sm:$0xff]   ;;  %v8707_v14 = vld [vmem:[#allocation4 + $0x184] ss:$12 sps:$4 sm:$0xff]  }
 0x56d   : > { %v3747_v34 = vrot.slane %v3621_v37, %v10006_v63  ;;  %v3751_v33 = vrot.slane %v3622_v55, %v10009_v39  ;;  %v8668_v63 = vld [vmem:[#allocation4 + $0xc8] ss:$12 sps:$4 sm:$0xff]   ;;  %v10365_v39 = vld [vmem:[#allocation13_spill] sm:$0xff]  ;;  %v8695_v55 = vld [vmem:[#allocation4 + $0x150] ss:$12 sps:$4 sm:$0xff]  }
 0x56e   : > { %v8697_v37 = vld [vmem:[#allocation4 + $0x154] ss:$12 sps:$4 sm:$0xff]  }
 0x56f   : > { %v3752_v58 = vsel %vm3634_vm13, %v3751_v33, %v3747_v34 }
 0x570   : > { %v3764_v49 = vsel %vm3015_vm9, %v3752_v58, %v3763_v30 }
 0x571   : > { %v3765_v24 = vpack.c.b16 %v3764_v49, %v3759_v27 }
 0x573   : > { %7617 = vmatmul.mubr.msk.bf16.vlgmr.msra.gmra.mrb[12].mxu0 %vm3779_vm14, %v3765_v24  ;;  %8155 = vmatmul.mubr.msk.bf16.vlgmr.msra.gmra.mrb[20].mxu1 %vm3779_vm14, %v3765_v24 }
 0x574   : > { %3891 = vmatpush1.bf16.msra.mxu0 %v10365_v39  ;;  %8159 = vmatpush3.bf16.msra.mxu1 %v10366_v47  ;;  %v8708_v39 = vld [vmem:[#allocation4 + $0x188] ss:$12 sps:$4 sm:$0xff]  }
 0x575   : > { %3922 = vmatprep.mubr.bf16.mxu0 %v10367_v28  ;;  %8160 = vmatprep.mubr.msk.bf16.mxu1 %vm9311_vm0, %v10363_v50  ;;  %v8711_v47 = vld [vmem:[#allocation4 + $0x19c] ss:$12 sps:$4 sm:$0xff]  }
 0x576   : > { %4457 = vmatprep.subr.bf16.mxu0 %v8643_v7  ;;  %8023 = vmatprep.subr.bf16.mxu1 %v8668_v63  ;;  %v8705_v63 = vld [vmem:[#allocation4 + $0x180] ss:$12 sps:$4 sm:$0xff]  }
 0x57f   : > { %7620 = vmatmul.mubr.msk.bf16.vlgmr.msra.gmra.mrb[12].mxu0 %vm2865_vm3, %v9888_v15  ;;  %8161 = vmatmul.mubr.msk.bf16.vlgmr.msra.gmra.mrb[20].mxu1 %vm2865_vm3, %v9888_v15  ;;  %v8684_v15 = vld [vmem:[#allocation4 + $0x50] ss:$12 sps:$4 sm:$0xff]  }
 0x580   : > { %4458 = vmatpush1.bf16.msra.mxu0 %v8641_v12  ;;  %8024 = vmatpush3.bf16.msra.mxu1 %v8669_v0  ;;  %v8709_v12 = vld [vmem:[#allocation4 + $0x198] ss:$12 sps:$4 sm:$0xff]   ;;  %v8712_v0 = vld [vmem:[#allocation4 + $0x1a0] ss:$12 sps:$4 sm:$0xff]  }
 0x581   : > { %4459 = vmatprep.subr.bf16.mxu0 %v8646_v52  ;;  %8025 = vmatprep.subr.bf16.mxu1 %v8673_v62  ;;  %v8715_v52 = vld [vmem:[#allocation4 + $0x1b4] ss:$12 sps:$4 sm:$0xff]   ;;  %v8713_v62 = vld [vmem:[#allocation4 + $0x1b0] ss:$12 sps:$4 sm:$0xff]  }
 0x584   : > { %4460 = vmatpush1.bf16.msra.mxu0 %v8644_v1  ;;  %8026 = vmatpush3.bf16.msra.mxu1 %v8674_v51  ;;  %v8716_v1 = vld [vmem:[#allocation4 + $0x1b8] ss:$12 sps:$4 sm:$0xff]  }
 0x585   : > { %4461 = vmatprep.subr.bf16.mxu0 %v8649_v36  ;;  %8027 = vmatprep.subr.bf16.mxu1 %v8678_v23  ;;  %v8719_v51 = vld [vmem:[#allocation4 + $0x1cc] ss:$12 sps:$4 sm:$0xff]   ;;  %v8717_v36 = vld [vmem:[#allocation4 + $0x1c8] ss:$12 sps:$4 sm:$0xff]   ;;  %v8720_v23 = vld [vmem:[#allocation4 + $0x1d0] ss:$12 sps:$4 sm:$0xff]  }
 0x588   : > { %4462 = vmatpush1.bf16.msra.mxu0 %v8647_v45  ;;  %8028 = vmatpush3.bf16.msra.mxu1 %v8679_v61  ;;  %v8723_v45 = vld [vmem:[#allocation4 + $0x1e4] ss:$12 sps:$4 sm:$0xff]   ;;  %v8721_v61 = vld [vmem:[#allocation4 + $0x1e0] ss:$12 sps:$4 sm:$0xff]  }
 0x589   : > { %4463 = vmatprep.subr.bf16.mxu0 %v8652_v60  ;;  %8029 = vmatprep.subr.bf16.mxu1 %v8683_v22  ;;  %v8724_v60 = vld [vmem:[#allocation4 + $0x1e8] ss:$12 sps:$4 sm:$0xff]  }
 0x58a   : > { %v8727_v22 = vld [vmem:[#allocation4 + $0x1fc] ss:$12 sps:$4 sm:$0xff]  }
 0x58c   : > { %4464 = vmatpush1.bf16.msra.mxu0 %v8650_v53  ;;  %8030 = vmatpush3.bf16.msra.mxu1 %v8684_v15  ;;  %v8725_v53 = vld [vmem:[#allocation4 + $0x1f8] ss:$12 sps:$4 sm:$0xff]   ;;  %v8728_v15 = vld [vmem:[#allocation4 + $0x200] ss:$12 sps:$4 sm:$0xff]  }
 0x58d   : > { %4465 = vmatprep.subr.bf16.mxu0 %v8655_v29  ;;  %8031 = vmatprep.subr.bf16.mxu1 %v8688_v40  ;;  %v8731_v29 = vld [vmem:[#allocation4 + $0x214] ss:$12 sps:$4 sm:$0xff]   ;;  %v8729_v40 = vld [vmem:[#allocation4 + $0x210] ss:$12 sps:$4 sm:$0xff]  }
 0x590   : > { %4466 = vmatpush1.bf16.msra.mxu0 %v8653_v13  ;;  %8032 = vmatpush3.bf16.msra.mxu1 %v8689_v10  ;;  %v8732_v13 = vld [vmem:[#allocation4 + $0x218] ss:$12 sps:$4 sm:$0xff]  }
 0x591   : > { %4467 = vmatprep.subr.bf16.mxu0 %v8658_v8  ;;  %8033 = vmatprep.subr.bf16.mxu1 %v8693_v18  ;;  %v8735_v10 = vld [vmem:[#allocation4 + $0x22c] ss:$12 sps:$4 sm:$0xff]   ;;  %v8733_v8 = vld [vmem:[#allocation4 + $0x228] ss:$12 sps:$4 sm:$0xff]   ;;  %v8736_v18 = vld [vmem:[#allocation4 + $0x230] ss:$12 sps:$4 sm:$0xff]  }
 0x594   : > { %4468 = vmatpush1.bf16.msra.mxu0 %v8656_v44  ;;  %8034 = vmatpush3.bf16.msra.mxu1 %v8694_v38 }
 0x595   : > { %4469 = vmatprep.subr.bf16.mxu0 %v8661_v48  ;;  %8035 = vmatprep.subr.bf16.mxu1 %v8698_v46 }
 0x598   : > { %4470 = vmatpush1.bf16.msra.mxu0 %v8659_v35  ;;  %8036 = vmatpush3.bf16.msra.mxu1 %v8699_v9 }
 0x599   : > { %4471 = vmatprep.subr.bf16.mxu0 %v8664_v6  ;;  %8037 = vmatprep.subr.bf16.mxu1 %v8703_v59  ;;  %v9165_v59 = vld [vmem:[%s9538_s13 + $0x20] sm:$0x3f] }
 0x59c   : > { %4472 = vmatpush1.bf16.msra.mxu0 %v8662_v16  ;;  %8038 = vmatpush3.bf16.msra.mxu1 %v8704_v41 }
 0x59d   : > { %4473 = vmatprep.subr.bf16.mxu0 %v8667_v20  ;;  %8164 = vmatprep.subr.bf16.mxu1 %v10363_v50  ;;  %v9161_v20 = vld [vmem:[%s9538_s13] sm:$0xff] }
 0x5a0   : > { %4474 = vmatpush1.bf16.msra.mxu0 %v8665_v42 }
 0x5a1   : > { %4475 = vmatprep.subr.bf16.mxu0 %v8672_v26 }
 0x5a4   : > { %4476 = vmatpush1.bf16.msra.mxu0 %v8670_v19 }
 0x5a5   : > { %4477 = vmatprep.subr.bf16.mxu0 %v8677_v17  ;;  %v9162_v17 = vld [vmem:[%s9538_s13 + $0x8] sm:$0xff] }
 0x5a8   : > { %4478 = vmatpush1.bf16.msra.mxu0 %v8675_v57 }
 0x5a9   : > { %4479 = vmatprep.subr.bf16.mxu0 %v8682_v5 }
 0x5ac   : > { %4480 = vmatpush1.bf16.msra.mxu0 %v8680_v54 }
 0x5ad   : > { %4481 = vmatprep.subr.bf16.mxu0 %v8687_v4  ;;  %v9163_v4 = vld [vmem:[%s9538_s13 + $0x10] sm:$0xff] }
 0x5b0   : > { %4482 = vmatpush1.bf16.msra.mxu0 %v8685_v43 }
 0x5b1   : > { %4483 = vmatprep.subr.bf16.mxu0 %v8692_v2  ;;  %v9164_v2 = vld [vmem:[%s9538_s13 + $0x18] sm:$0x3f] }
 0x5b4   : > { %4484 = vmatpush1.bf16.msra.mxu0 %v8690_v56 }
 0x5b5   : > { %4485 = vmatprep.subr.bf16.mxu0 %v8697_v37 }
 0x5b8   : > { %4486 = vmatpush1.bf16.msra.mxu0 %v8695_v55 }
 0x5b9   : > { %4487 = vmatprep.subr.bf16.mxu0 %v8702_v25 }
 0x5bc   : > { %4488 = vmatpush1.bf16.msra.mxu0 %v8700_v3 }
 0x5bd   : > { %4500 = vmatprep.subr.bf16.mxu0 %v8707_v14 }
 0x652   : > { %v3924_v34 = vpop.f32.mrb[12].mxu0  ;;  %v3967_v33 = vpop.f32.mrb[20].mxu1 }
 0x653   : > { %v3926_v21 = vpop.f32.mrb[13].mxu0  ;;  %v8162_v11 = vpop.f32.mrb[21].mxu1 }
 0x654   : > { %v3928_v31 = vpop.f32.mrb[14].mxu0  ;;  %v3970_v30 = vpop.f32.mrb[22].mxu1 }
 0x655   : > { %v3974_v58 = vpack.c.bf16 %v3928_v31, %v3924_v34  ;;  %v10076_v27 = vpack.c.bf16 %v3970_v30, %v3967_v33  ;;  %v3930_v49 = vpop.f32.mrb[15].mxu0  ;;  %v8163_v24 = vpop.f32.mrb[23].mxu1  ;;  %v9166_v34 = vld [vmem:[%s9538_s13 + $0x28] sm:$0x3f]  ;;  %s546_s13 = scalar_lea.vmem %s10374_s25, %s8258_s17 }
 0x656   : > { %v3975_v7 = vpack.c.bf16 %v3930_v49, %v3926_v21  ;;  %v8739_v49 = vld [vmem:[#allocation6 + $0x4] ss:$24 sps:$4 sm:$0xff]   ;;  %v8740_v24 = vld [vmem:[#allocation6 + $0x8] ss:$24 sps:$4 sm:$0xff]  }
 0x658   : > { %4489 = vmatprep.mubr.bf16.mxu0 %v3975_v7  ;;  %4575 = vmatprep.mubr.bf16.mxu1 %v3975_v7  ;;  %v8742_v7 = vld [vmem:[#allocation6 + $0xc] ss:$24 sps:$4 sm:$0xff]  }
 0x659   : > { %4490 = vmatmul.mubr.bf16.vlgmr.msra.gmra.mrb[16].mxu0 %v3974_v58  ;;  %4576 = vmatmul.mubr.bf16.vlgmr.msra.gmra.mrb[24].mxu1 %v3974_v58 }
 0x65a   : > { %4501 = vmatpush1.bf16.msra.mxu0 %v8705_v63  ;;  %8165 = vmatpush3.bf16.msra.mxu1 %v8708_v39  ;;  %v8745_v63 = vld [vmem:[#allocation6 + $0x34] ss:$24 sps:$4 sm:$0xff]  }
 0x65b   : > { %4502 = vmatprep.subr.bf16.mxu0 %v8711_v47  ;;  %8166 = vmatprep.subr.bf16.mxu1 %v10363_v50  ;;  %v8748_v39 = vld [vmem:[#allocation6 + $0x3c] ss:$24 sps:$4 sm:$0xff]   ;;  %v8743_v47 = vld [vmem:[#allocation6 + $0x30] ss:$24 sps:$4 sm:$0xff]  }
 0x65c   : > { %4532 = vmatprep.mubr.bf16.mxu0 %v10367_v28  ;;  %8180 = vmatprep.mubr.msk.bf16.mxu1 %vm9311_vm0, %v10363_v50 }
 0x65e   : > { %4503 = vmatpush1.bf16.msra.mxu0 %v8709_v12  ;;  %8167 = vmatpush3.bf16.msra.mxu1 %v8712_v0  ;;  %v8746_v12 = vld [vmem:[#allocation6 + $0x38] ss:$24 sps:$4 sm:$0xff]   ;;  %v8751_v0 = vld [vmem:[#allocation6 + $0x64] ss:$24 sps:$4 sm:$0xff]  }
 0x65f   : > { %4504 = vmatprep.subr.bf16.mxu0 %v8715_v52  ;;  %8168 = vmatprep.subr.bf16.mxu1 %v10363_v50  ;;  %v8754_v52 = vld [vmem:[#allocation6 + $0x6c] ss:$24 sps:$4 sm:$0xff]  }
 0x662   : > { %4505 = vmatpush1.bf16.msra.mxu0 %v8713_v62  ;;  %8169 = vmatpush3.bf16.msra.mxu1 %v8716_v1  ;;  %v8749_v62 = vld [vmem:[#allocation6 + $0x60] ss:$24 sps:$4 sm:$0xff]  }
 0x663   : > { %4506 = vmatprep.subr.bf16.mxu0 %v8719_v51  ;;  %8170 = vmatprep.subr.bf16.mxu1 %v10363_v50  ;;  %v8752_v1 = vld [vmem:[#allocation6 + $0x68] ss:$24 sps:$4 sm:$0xff]   ;;  %v8757_v51 = vld [vmem:[#allocation6 + $0x94] ss:$24 sps:$4 sm:$0xff]  }
 0x666   : > { %4507 = vmatpush1.bf16.msra.mxu0 %v8717_v36  ;;  %8171 = vmatpush3.bf16.msra.mxu1 %v8720_v23  ;;  %v8760_v36 = vld [vmem:[#allocation6 + $0x9c] ss:$24 sps:$4 sm:$0xff]   ;;  %v8755_v23 = vld [vmem:[#allocation6 + $0x90] ss:$24 sps:$4 sm:$0xff]  }
 0x667   : > { %4508 = vmatprep.subr.bf16.mxu0 %v8723_v45  ;;  %8172 = vmatprep.subr.bf16.mxu1 %v10363_v50  ;;  %v8758_v45 = vld [vmem:[#allocation6 + $0x98] ss:$24 sps:$4 sm:$0xff]  }
 0x66a   : > { %4509 = vmatpush1.bf16.msra.mxu0 %v8721_v61  ;;  %8173 = vmatpush3.bf16.msra.mxu1 %v8724_v60  ;;  %v8763_v61 = vld [vmem:[#allocation6 + $0xc4] ss:$24 sps:$4 sm:$0xff]  }
 0x66b   : > { %4510 = vmatprep.subr.bf16.mxu0 %v8727_v22  ;;  %8174 = vmatprep.subr.bf16.mxu1 %v10363_v50  ;;  %v8766_v60 = vld [vmem:[#allocation6 + $0xcc] ss:$24 sps:$4 sm:$0xff]   ;;  %v8761_v22 = vld [vmem:[#allocation6 + $0xc0] ss:$24 sps:$4 sm:$0xff]  }
 0x66e   : > { %4511 = vmatpush1.bf16.msra.mxu0 %v8725_v53  ;;  %8175 = vmatpush3.bf16.msra.mxu1 %v8728_v15  ;;  %v8764_v53 = vld [vmem:[#allocation6 + $0xc8] ss:$24 sps:$4 sm:$0xff]   ;;  %v8769_v15 = vld [vmem:[#allocation6 + $0xf4] ss:$24 sps:$4 sm:$0xff]  }
 0x66f   : > { %4512 = vmatprep.subr.bf16.mxu0 %v8731_v29  ;;  %8176 = vmatprep.subr.bf16.mxu1 %v10363_v50  ;;  %v8772_v29 = vld [vmem:[#allocation6 + $0xfc] ss:$24 sps:$4 sm:$0xff]  }
 0x672   : > { %4513 = vmatpush1.bf16.msra.mxu0 %v8729_v40  ;;  %8177 = vmatpush3.bf16.msra.mxu1 %v8732_v13  ;;  %v8767_v40 = vld [vmem:[#allocation6 + $0xf0] ss:$24 sps:$4 sm:$0xff]  }
 0x673   : > { %4514 = vmatprep.subr.bf16.mxu0 %v8735_v10  ;;  %8178 = vmatprep.subr.bf16.mxu1 %v10363_v50  ;;  %v8770_v13 = vld [vmem:[#allocation6 + $0xf8] ss:$24 sps:$4 sm:$0xff]   ;;  %v8775_v10 = vld [vmem:[#allocation6 + $0x124] ss:$24 sps:$4 sm:$0xff]  }
 0x676   : > { %4515 = vmatpush1.bf16.msra.mxu0 %v8733_v8  ;;  %8179 = vmatpush3.bf16.msra.mxu1 %v8736_v18  ;;  %v8778_v8 = vld [vmem:[#allocation6 + $0x12c] ss:$24 sps:$4 sm:$0xff]   ;;  %v8773_v18 = vld [vmem:[#allocation6 + $0x120] ss:$24 sps:$4 sm:$0xff]  }
 0x677   : > { %5631 = vmatprep.subr.bf16.mxu1 %v8739_v49  ;;  %5717 = vmatprep.subr.bf16.mxu0 %v8742_v7  ;;  %v8797_v49 = vld [vmem:[#allocation6 + $0x1e0] ss:$24 sps:$4 sm:$0xff]  }
 0x678   : > { %v8800_v7 = vld [vmem:[#allocation6 + $0x1e8] ss:$24 sps:$4 sm:$0xff]  }
 0x679   : > { %4533 = vmatmul.mubr.bf16.vlgmr.msra.gmra.mrb[16].mxu0 %v10076_v27  ;;  %8181 = vmatmul.mubr.bf16.vlgmr.msra.gmra.mrb[28].mxu1 %v10076_v27  ;;  %v8737_v27 = vld [vmem:[#allocation6] ss:$24 sps:$4 sm:$0xff]  }
 0x67a   : > { %5632 = vmatpush1.bf16.msra.mxu1 %v8737_v27  ;;  %5718 = vmatpush1.bf16.msra.mxu0 %v8740_v24  ;;  %v8796_v27 = vld [vmem:[#allocation6 + $0x1bc] ss:$24 sps:$4 sm:$0xff]  }
 0x67b   : > { %5633 = vmatprep.subr.bf16.mxu1 %v8745_v63  ;;  %5719 = vmatprep.subr.bf16.mxu0 %v8748_v39  ;;  %v8799_v24 = vld [vmem:[#allocation6 + $0x1e4] ss:$24 sps:$4 sm:$0xff]   ;;  %v8805_v39 = vld [vmem:[#allocation6 + $0x214] ss:$24 sps:$4 sm:$0xff]  }
 0x67c   : > { %v8802_v63 = vld [vmem:[#allocation6 + $0x1ec] ss:$24 sps:$4 sm:$0xff]  }
 0x67e   : > { %5634 = vmatpush1.bf16.msra.mxu1 %v8743_v47  ;;  %5720 = vmatpush1.bf16.msra.mxu0 %v8746_v12  ;;  %v8808_v47 = vld [vmem:[#allocation6 + $0x21c] ss:$24 sps:$4 sm:$0xff]   ;;  %v8803_v12 = vld [vmem:[#allocation6 + $0x210] ss:$24 sps:$4 sm:$0xff]  }
 0x67f   : > { %5635 = vmatprep.subr.bf16.mxu1 %v8751_v0  ;;  %5721 = vmatprep.subr.bf16.mxu0 %v8754_v52  ;;  %v8806_v0 = vld [vmem:[#allocation6 + $0x218] ss:$24 sps:$4 sm:$0xff]   ;;  %v8811_v52 = vld [vmem:[#allocation6 + $0x244] ss:$24 sps:$4 sm:$0xff]  }
 0x682   : > { %5636 = vmatpush1.bf16.msra.mxu1 %v8749_v62  ;;  %5722 = vmatpush1.bf16.msra.mxu0 %v8752_v1  ;;  %v8814_v62 = vld [vmem:[#allocation6 + $0x24c] ss:$24 sps:$4 sm:$0xff]   ;;  %v8809_v1 = vld [vmem:[#allocation6 + $0x240] ss:$24 sps:$4 sm:$0xff]  }
 0x683   : > { %5637 = vmatprep.subr.bf16.mxu1 %v8757_v51  ;;  %5723 = vmatprep.subr.bf16.mxu0 %v8760_v36  ;;  %v8812_v51 = vld [vmem:[#allocation6 + $0x248] ss:$24 sps:$4 sm:$0xff]   ;;  %v8817_v36 = vld [vmem:[#allocation6 + $0x274] ss:$24 sps:$4 sm:$0xff]  }
 0x686   : > { %5638 = vmatpush1.bf16.msra.mxu1 %v8755_v23  ;;  %5724 = vmatpush1.bf16.msra.mxu0 %v8758_v45  ;;  %v8820_v23 = vld [vmem:[#allocation6 + $0x27c] ss:$24 sps:$4 sm:$0xff]   ;;  %v8815_v45 = vld [vmem:[#allocation6 + $0x270] ss:$24 sps:$4 sm:$0xff]  }
 0x687   : > { %5639 = vmatprep.subr.bf16.mxu1 %v8763_v61  ;;  %5725 = vmatprep.subr.bf16.mxu0 %v8766_v60  ;;  %v8818_v61 = vld [vmem:[#allocation6 + $0x278] ss:$24 sps:$4 sm:$0xff]   ;;  %v8823_v60 = vld [vmem:[#allocation6 + $0x2a4] ss:$24 sps:$4 sm:$0xff]  }
 0x68a   : > { %5640 = vmatpush1.bf16.msra.mxu1 %v8761_v22  ;;  %5726 = vmatpush1.bf16.msra.mxu0 %v8764_v53  ;;  %v8826_v22 = vld [vmem:[#allocation6 + $0x2ac] ss:$24 sps:$4 sm:$0xff]   ;;  %v8821_v53 = vld [vmem:[#allocation6 + $0x2a0] ss:$24 sps:$4 sm:$0xff]  }
 0x68b   : > { %5641 = vmatprep.subr.bf16.mxu1 %v8769_v15  ;;  %5727 = vmatprep.subr.bf16.mxu0 %v8772_v29  ;;  %v8824_v15 = vld [vmem:[#allocation6 + $0x2a8] ss:$24 sps:$4 sm:$0xff]   ;;  %v8829_v29 = vld [vmem:[#allocation6 + $0x2d4] ss:$24 sps:$4 sm:$0xff]  }
 0x68e   : > { %5642 = vmatpush1.bf16.msra.mxu1 %v8767_v40  ;;  %5728 = vmatpush1.bf16.msra.mxu0 %v8770_v13  ;;  %v8832_v40 = vld [vmem:[#allocation6 + $0x2dc] ss:$24 sps:$4 sm:$0xff]   ;;  %v8827_v13 = vld [vmem:[#allocation6 + $0x2d0] ss:$24 sps:$4 sm:$0xff]  }
 0x68f   : > { %5643 = vmatprep.subr.bf16.mxu1 %v8775_v10  ;;  %5729 = vmatprep.subr.bf16.mxu0 %v8778_v8  ;;  %v8830_v10 = vld [vmem:[#allocation6 + $0x2d8] ss:$24 sps:$4 sm:$0xff]   ;;  %v8835_v8 = vld [vmem:[#allocation6 + $0x304] ss:$24 sps:$4 sm:$0xff]  }
 0x692   : > { %5644 = vmatpush1.bf16.msra.mxu1 %v8773_v18  ;;  %v8838_v18 = vld [vmem:[#allocation6 + $0x30c] ss:$24 sps:$4 sm:$0xff]  }
 0x72c   : > { %v8039_v44 = vpop.f32.mrb[24].mxu1 }
 0x72d   : > { %v8040_v38 = vpop.f32.mrb[25].mxu1 }
 0x72e   : > { %v8041_v48 = vadd.f32 %v8040_v38, %v8039_v44  ;;  %v8042_v46 = vpop.f32.mrb[26].mxu1  ;;  %v8776_v44 = vld [vmem:[#allocation6 + $0x128] ss:$24 sps:$4 sm:$0xff]   ;;  %v8781_v38 = vld [vmem:[#allocation6 + $0x154] ss:$24 sps:$4 sm:$0xff]  }
 0x72f   : > { %v8043_v35 = vpop.f32.mrb[27].mxu1  ;;  %5730 = vmatpush1.bf16.msra.mxu0 %v8776_v44  ;;  %5645 = vmatprep.subr.bf16.mxu1 %v8781_v38 }
 0x730   : > { %v8044_v9 = vadd.f32 %v8043_v35, %v8042_v46  ;;  %v8779_v46 = vld [vmem:[#allocation6 + $0x150] ss:$24 sps:$4 sm:$0xff]  }
 0x731   : > { %v8782_v35 = vld [vmem:[#allocation6 + $0x158] ss:$24 sps:$4 sm:$0xff]   ;;  %5646 = vmatpush1.bf16.msra.mxu1 %v8779_v46 }
 0x74c   : > { %v4534_v6 = vpop.f32.mrb[16].mxu0  ;;  %v4618_v16 = vpop.f32.mrb[28].mxu1 }
 0x74d   : > { %v10091_v42 = vadd.f32 %v9161_v20, %v4534_v6  ;;  %v4619_v50 = vadd.f32 %v8041_v48, %v4618_v16  ;;  %v4536_v26 = vpop.f32.mrb[17].mxu0  ;;  %v8182_v19 = vpop.f32.mrb[29].mxu1  ;;  %v8784_v48 = vld [vmem:[#allocation6 + $0x15c] ss:$24 sps:$4 sm:$0xff]   ;;  %v8790_v6 = vld [vmem:[#allocation6 + $0x18c] ss:$24 sps:$4 sm:$0xff]  }
 0x74e   : > { %v10094_v57 = vadd.f32 %v9162_v17, %v4536_v26  ;;  %v4538_v5 = vpop.f32.mrb[18].mxu0  ;;  %v4621_v54 = vpop.f32.mrb[30].mxu1  ;;  %5731 = vmatprep.subr.bf16.mxu0 %v8784_v48  ;;  %v8785_v16 = vld [vmem:[#allocation6 + $0x180] ss:$24 sps:$4 sm:$0xff]  }
 0x74f   : > { %v10097_v43 = vadd.f32 %v9163_v4, %v4619_v50  ;;  %v10100_v56 = vadd.f32 %v9164_v2, %v4538_v5  ;;  %v4622_v37 = vadd.f32 %v8044_v9, %v4621_v54  ;;  %v4540_v55 = vpop.f32.mrb[19].mxu0  ;;  %v8183_v3 = vpop.f32.mrb[31].mxu1  ;;  %v8787_v9 = vld [vmem:[#allocation6 + $0x184] ss:$24 sps:$4 sm:$0xff]   ;;  %5732 = vmatpush1.bf16.msra.mxu0 %v8782_v35  ;;  %v8788_v20 = vld [vmem:[#allocation6 + $0x188] ss:$24 sps:$4 sm:$0xff]  }
 0x750   : > { %v4633_v25 = vadd.f32 %v10094_v57, %v10091_v42  ;;  %v10105_v41 = vadd.f32 %v9165_v59, %v4540_v55  ;;  %5647 = vmatprep.subr.bf16.mxu1 %v8787_v9  ;;  %5733 = vmatprep.subr.bf16.mxu0 %v8790_v6 }
 0x751   : > { %v4638_v14 = vsel %vm4637_vm15, %v10100_v56, 0.0  ;;  %v10110_v33 = vadd.f32 %v9166_v34, %v4622_v37  ;;  %5648 = vmatpush1.bf16.msra.mxu1 %v8785_v16 }
 0x752   : > { %v4639_v21 = vsel %vm4637_vm15, %v10105_v41, 0.0  ;;  %v4634_v11 = vadd.f32 %v4633_v25, %v10097_v43 }
 0x753   : > { %v4640_v31 = vadd.f32 %v4639_v21, %v4638_v14  ;;  %v4641_v30 = vsel %vm4637_vm15, %v10110_v33, 0.0  ;;  %5734 = vmatpush1.bf16.msra.mxu0 %v8788_v20 }
 0x754   : > { %4635 = vadd.xlane.f32.xlu0 %v4634_v11  ;;  %5735 = vmatprep.subr.bf16.mxu0 %v8796_v27 }
 0x755   : > { %v4642_v58 = vadd.f32 %v4641_v30, %v4640_v31  ;;  %v8791_v31 = vld [vmem:[#allocation6 + $0x1b0] ss:$24 sps:$4 sm:$0xff]   ;;  %v8793_v30 = vld [vmem:[#allocation6 + $0x1b4] ss:$24 sps:$4 sm:$0xff]  }
 0x756   : > { %5649 = vmatprep.subr.bf16.mxu1 %v8793_v30 }
 0x757   : > { %4643 = vadd.xlane.f32.xlu1 %v4642_v58  ;;  %v8794_v58 = vld [vmem:[#allocation6 + $0x1b8] ss:$24 sps:$4 sm:$0xff]   ;;  %5650 = vmatpush1.bf16.msra.mxu1 %v8791_v31 }
 0x758   : > { %5736 = vmatpush1.bf16.msra.mxu0 %v8794_v58  ;;  %5651 = vmatprep.subr.bf16.mxu1 %v8799_v24 }
 0x759   : > { %5737 = vmatprep.subr.bf16.mxu0 %v8802_v63  ;;  %v8841_v63 = vld [vmem:[#allocation6 + $0x334] ss:$24 sps:$4 sm:$0xff]  }
 0x75b   : > { %5652 = vmatpush1.bf16.msra.mxu1 %v8797_v49 }
 0x75c   : > { %5738 = vmatpush1.bf16.msra.mxu0 %v8800_v7  ;;  %5653 = vmatprep.subr.bf16.mxu1 %v8805_v39  ;;  %v8836_v7 = vld [vmem:[#allocation6 + $0x308] ss:$24 sps:$4 sm:$0xff]   ;;  %v8844_v39 = vld [vmem:[#allocation6 + $0x33c] ss:$24 sps:$4 sm:$0xff]  }
 0x75d   : > { %5739 = vmatprep.subr.bf16.mxu0 %v8808_v47  ;;  %v8839_v47 = vld [vmem:[#allocation6 + $0x330] ss:$24 sps:$4 sm:$0xff]  }
 0x75f   : > { %5654 = vmatpush1.bf16.msra.mxu1 %v8803_v12  ;;  %v8842_v12 = vld [vmem:[#allocation6 + $0x338] ss:$24 sps:$4 sm:$0xff]  }
 0x760   : > { %5740 = vmatpush1.bf16.msra.mxu0 %v8806_v0  ;;  %5655 = vmatprep.subr.bf16.mxu1 %v8811_v52  ;;  %v8847_v0 = vld [vmem:[#allocation6 + $0x364] ss:$24 sps:$4 sm:$0xff]  }
 0x761   : > { %5741 = vmatprep.subr.bf16.mxu0 %v8814_v62  ;;  %v8850_v52 = vld [vmem:[#allocation6 + $0x36c] ss:$24 sps:$4 sm:$0xff]   ;;  %v8845_v62 = vld [vmem:[#allocation6 + $0x360] ss:$24 sps:$4 sm:$0xff]  }
 0x763   : > { %5656 = vmatpush1.bf16.msra.mxu1 %v8809_v1  ;;  %v8848_v1 = vld [vmem:[#allocation6 + $0x368] ss:$24 sps:$4 sm:$0xff]  }
 0x764   : > { %5742 = vmatpush1.bf16.msra.mxu0 %v8812_v51  ;;  %5657 = vmatprep.subr.bf16.mxu1 %v8817_v36  ;;  %v8853_v51 = vld [vmem:[#allocation6 + $0x394] ss:$24 sps:$4 sm:$0xff]  }
 0x765   : > { %5743 = vmatprep.subr.bf16.mxu0 %v8820_v23  ;;  %v8856_v36 = vld [vmem:[#allocation6 + $0x39c] ss:$24 sps:$4 sm:$0xff]   ;;  %v8851_v23 = vld [vmem:[#allocation6 + $0x390] ss:$24 sps:$4 sm:$0xff]  }
 0x767   : > { %5658 = vmatpush1.bf16.msra.mxu1 %v8815_v45  ;;  %v8854_v45 = vld [vmem:[#allocation6 + $0x398] ss:$24 sps:$4 sm:$0xff]  }
 0x768   : > { %5744 = vmatpush1.bf16.msra.mxu0 %v8818_v61  ;;  %5659 = vmatprep.subr.bf16.mxu1 %v8823_v60  ;;  %v8859_v61 = vld [vmem:[#allocation6 + $0x3c4] ss:$24 sps:$4 sm:$0xff]  }
 0x769   : > { %5745 = vmatprep.subr.bf16.mxu0 %v8826_v22  ;;  %v8862_v60 = vld [vmem:[#allocation6 + $0x3cc] ss:$24 sps:$4 sm:$0xff]   ;;  %v8857_v22 = vld [vmem:[#allocation6 + $0x3c0] ss:$24 sps:$4 sm:$0xff]  }
 0x76b   : > { %5660 = vmatpush1.bf16.msra.mxu1 %v8821_v53  ;;  %v8860_v53 = vld [vmem:[#allocation6 + $0x3c8] ss:$24 sps:$4 sm:$0xff]  }
 0x76c   : > { %5746 = vmatpush1.bf16.msra.mxu0 %v8824_v15  ;;  %5661 = vmatprep.subr.bf16.mxu1 %v8829_v29  ;;  %v8865_v15 = vld [vmem:[#allocation6 + $0x3f4] ss:$24 sps:$4 sm:$0xff]  }
 0x76d   : > { %5747 = vmatprep.subr.bf16.mxu0 %v8832_v40  ;;  %v8868_v29 = vld [vmem:[#allocation6 + $0x3fc] ss:$24 sps:$4 sm:$0xff]   ;;  %v8863_v40 = vld [vmem:[#allocation6 + $0x3f0] ss:$24 sps:$4 sm:$0xff]  }
 0x76f   : > { %5662 = vmatpush1.bf16.msra.mxu1 %v8827_v13  ;;  %v8866_v13 = vld [vmem:[#allocation6 + $0x3f8] ss:$24 sps:$4 sm:$0xff]  }
 0x770   : > { %5748 = vmatpush1.bf16.msra.mxu0 %v8830_v10  ;;  %5674 = vmatprep.subr.bf16.mxu1 %v8835_v8  ;;  %v8871_v10 = vld [vmem:[#allocation6 + $0x424] ss:$24 sps:$4 sm:$0xff]  }
 0x771   : > { %5760 = vmatprep.subr.bf16.mxu0 %v8838_v18  ;;  %v8874_v8 = vld [vmem:[#allocation6 + $0x42c] ss:$24 sps:$4 sm:$0xff]  }
 0x7e1   : > { %v4636_v50 = vpop.xlane.xlu0 %4635 }
 0x7e2   : > { %v10117_v26 = vmul.f32 0.0033333334, %v4636_v50 }
 0x7e4   : > { %v4644_v19 = vpop.xlane.xlu1 %4643  ;;  %v10121_v17 = vsub.f32 %v10091_v42, %v10117_v26  ;;  %v10125_v5 = vsub.f32 %v10094_v57, %v10117_v26  ;;  %v10129_v54 = vsub.f32 %v10097_v43, %v10117_v26  ;;  %v4670_v44 = vmul.f32 84.0, %v10117_v26 }
 0x7e5   : > { %v10131_v4 = vmul.f32 0.0033333334, %v4644_v19 }
 0x7e6   : > { %v4653_v2 = vmul.f32 %v10121_v17, %v10121_v17  ;;  %v4654_v37 = vmul.f32 %v10125_v5, %v10125_v5  ;;  %v4655_v55 = vmul.f32 %v10129_v54, %v10129_v54  ;;  %v4672_v38 = vmul.f32 %v4670_v44, %v10117_v26 }
 0x7e7   : > { %v10139_v42 = vsub.f32 %v10100_v56, %v10131_v4  ;;  %v10143_v57 = vsub.f32 %v10105_v41, %v10131_v4  ;;  %v10147_v43 = vsub.f32 %v10110_v33, %v10131_v4  ;;  %v4671_v48 = vmul.f32 84.0, %v10131_v4 }
 0x7e8   : > { %v4659_v3 = vadd.f32 %v4654_v37, %v4653_v2  ;;  %v10167_v37 = vld [vmem:[%s10303_s6] sm:$0x7] }
 0x7e9   : > { %v4656_v25 = vmul.f32 %v10139_v42, %v10139_v42  ;;  %v4657_v59 = vmul.f32 %v10143_v57, %v10143_v57  ;;  %v4658_v56 = vmul.f32 %v10147_v43, %v10147_v43  ;;  %v4673_v6 = vmul.f32 %v4671_v48, %v10131_v4 }
 0x7ea   : > { %v4660_v14 = vadd.f32 %v4659_v3, %v4655_v55  ;;  %v10174_v55 = vld [vmem:[%s10304_s7] sm:$0x7]  ;;  %v10368_v3 = vld [vmem:[#allocation15_spill] sm:$0xff] }
 0x7eb   : > { %v4663_v41 = vsel %vm4637_vm15, %v4656_v25, 0.0  ;;  %v4664_v34 = vsel %vm4637_vm15, %v4657_v59, 0.0  ;;  %v4666_v21 = vsel %vm4637_vm15, %v4658_v56, 0.0  ;;  %v4696_v25 = vrot.slane %v10167_v37, %v10368_v3 }
 0x7ec   : > { %4661 = vadd.xlane.f32.xlu1 %v4660_v14  ;;  %v4665_v33 = vadd.f32 %v4664_v34, %v4663_v41  ;;  %v4692_v56 = vrot.slane %v10167_v37, %v9622_v32  ;;  %v4718_v41 = vrot.slane %v10174_v55, %v10368_v3  ;;  %v4714_v34 = vrot.slane %v10174_v55, %v9622_v32 }
 0x7ee   : > { %v4667_v11 = vadd.f32 %v4666_v21, %v4665_v33 }
 0x7f0   : > { %4668 = vadd.xlane.f32.xlu0 %v4667_v11 }
 0x879   : > { %v4662_v46 = vpop.xlane.xlu1 %4661 }
 0x87a   : > { %v4674_v35 = vsub.f32 %v4662_v46, %v4672_v38  ;;  %v10369_v38 = vld [vmem:[#allocation18_spill] sm:$0xff]  ;;  %v8869_v46 = vld [vmem:[#allocation6 + $0x420] ss:$24 sps:$4 sm:$0xff]  }
 0x87b   : > { %v4700_v48 = vrot.slane %v10167_v37, %v10369_v38  ;;  %v8955_v37 = vld [vmem:[#allocation7 + $0x4] ss:$12 sps:$4 sm:$0xff]  }
 0x87c   : > { %v4676_v9 = vmul.f32 0.0033333334, %v4674_v35  ;;  %v8872_v35 = vld [vmem:[#allocation6 + $0x428] ss:$24 sps:$4 sm:$0xff]  }
 0x87d   : > { %v4669_v16 = vpop.xlane.xlu0 %4668 }
 0x87e   : > { %v4678_v20 = vadd.f32 1e-05, %v4676_v9  ;;  %v4675_v50 = vsub.f32 %v4669_v16, %v4673_v6  ;;  %v8877_v9 = vld [vmem:[#allocation6 + $0x454] ss:$24 sps:$4 sm:$0xff]  }
 0x87f   : > { %v8880_v6 = vld [vmem:[#allocation6 + $0x45c] ss:$24 sps:$4 sm:$0xff]  }
 0x880   : > { %9153 = vrsqrt.f32 %v4678_v20  ;;  %v4677_v19 = vmul.f32 0.0033333334, %v4675_v50  ;;  %v4722_v50 = vrot.slane %v10174_v55, %v10369_v38  ;;  %v8886_v55 = vld [vmem:[#allocation6 + $0x44] ss:$24 sps:$4 sm:$0xff]  }
 0x882   : > { %v4679_v2 = vadd.f32 1e-05, %v4677_v19 }
 0x884   : > { %9155 = vrsqrt.f32 %v4679_v2  ;;  %v8883_v2 = vld [vmem:[#allocation6 + $0x14] ss:$24 sps:$4 sm:$0xff]  }
 0x88a   : > { %v10169_v26 = vpop.eup %9153 }
 0x88b   : > { %v4683_v4 = vmul.f32 %v10169_v26, %v10125_v5  ;;  %v4682_v59 = vmul.f32 %v10169_v26, %v10121_v17  ;;  %v4684_v44 = vmul.f32 %v10169_v26, %v10129_v54  ;;  %v8878_v54 = vld [vmem:[#allocation6 + $0x458] ss:$24 sps:$4 sm:$0xff]  }
 0x88d   : > { %v4705_v33 = vmul.f32 %v4696_v25, %v4683_v4  ;;  %v4704_v11 = vmul.f32 %v4692_v56, %v4682_v59  ;;  %v4706_v20 = vmul.f32 %v4700_v48, %v4684_v44  ;;  %v8881_v4 = vld [vmem:[#allocation6 + $0x10] ss:$24 sps:$4 sm:$0xff]   ;;  %v8953_v59 = vld [vmem:[#allocation7] ss:$12 sps:$4 sm:$0xff]  }
 0x88e   : > { %v10184_v14 = vpop.eup %9155  ;;  %v8989_v44 = vld [vmem:[#allocation7 + $0xf4] ss:$12 sps:$4 sm:$0xff]  }
 0x88f   : > { %v4686_v5 = vmul.f32 %v10184_v14, %v10143_v57  ;;  %v4685_v21 = vmul.f32 %v10184_v14, %v10139_v42  ;;  %v10194_v30 = vadd.f32 %v4718_v41, %v4705_v33  ;;  %v10198_v27 = vadd.f32 %v4714_v34, %v4704_v11  ;;  %v8833_v57 = vld [vmem:[#allocation6 + $0x300] ss:$24 sps:$4 sm:$0xff]   ;;  %v8887_v33 = vld [vmem:[#allocation6 + $0x70] ss:$24 sps:$4 sm:$0xff]  }
 0x890   : > { %v4687_v18 = vmul.f32 %v10184_v14, %v10147_v43  ;;  %v8875_v43 = vld [vmem:[#allocation6 + $0x450] ss:$24 sps:$4 sm:$0xff]   ;;  %v10226_v26 = vadd.f32 %v4722_v50, %v4706_v20  ;;  %v8884_v14 = vld [vmem:[#allocation6 + $0x40] ss:$24 sps:$4 sm:$0xff]  }
 0x891   : > { %v4708_v17 = vmul.f32 %v4696_v25, %v4686_v5  ;;  %v4707_v31 = vmul.f32 %v4692_v56, %v4685_v21  ;;  %v8958_v56 = vld [vmem:[#allocation7 + $0x1c] ss:$12 sps:$4 sm:$0xff]   ;;  %v8961_v5 = vld [vmem:[#allocation7 + $0x34] ss:$12 sps:$4 sm:$0xff]  }
 0x892   : > { %v4709_v16 = vmul.f32 %v4700_v48, %v4687_v18  ;;  %v8892_v21 = vld [vmem:[#allocation6 + $0xa4] ss:$24 sps:$4 sm:$0xff]   ;;  %v8911_v48 = vld [vmem:[#allocation6 + $0x1f0] ss:$24 sps:$4 sm:$0xff]  }
 0x893   : > { %v10196_v58 = vadd.f32 %v4718_v41, %v4708_v17  ;;  %v10200_v49 = vadd.f32 %v4714_v34, %v4707_v31  ;;  %v8889_v41 = vld [vmem:[#allocation6 + $0x74] ss:$24 sps:$4 sm:$0xff]   ;;  %v8956_v34 = vld [vmem:[#allocation7 + $0x18] ss:$12 sps:$4 sm:$0xff]   ;;  %v8959_v11 = vld [vmem:[#allocation7 + $0x30] ss:$12 sps:$4 sm:$0xff]  }
 0x894   : > { %v10224_v19 = vadd.f32 %v4722_v50, %v4709_v16  ;;  %v8964_v17 = vld [vmem:[#allocation7 + $0x4c] ss:$12 sps:$4 sm:$0xff]   ;;  %v8992_v20 = vld [vmem:[#allocation7 + $0x108] ss:$12 sps:$4 sm:$0xff]   ;;  %v8999_v50 = vld [vmem:[#allocation7 + $0x124] ss:$12 sps:$4 sm:$0xff]  }
 0x895   : > { %v10204_v24 = vpack.c.bf16 %v10196_v58, %v10194_v30  ;;  %v10208_v42 = vpack.c.bf16 %v10200_v49, %v10198_v27  ;;  %v8890_v31 = vld [vmem:[#allocation6 + $0xa0] ss:$24 sps:$4 sm:$0xff]   ;;  %v8919_v16 = vld [vmem:[#allocation6 + $0x254] ss:$24 sps:$4 sm:$0xff]  }
 0x896   : > { %v10230_v25 = vpack.c.bf16 %v10224_v19, %v10226_v26  ;;  %v8982_v18 = vld [vmem:[#allocation7 + $0xd8] ss:$12 sps:$4 sm:$0xff]  }
 0x897   : > { %5663 = vmatprep.mubr.bf16.mxu1 %v10204_v24  ;;  %5749 = vmatprep.mubr.bf16.mxu0 %v10204_v24 }
 0x898   : > { %5664 = vmatmul.mubr.bf16.vlgmr.msra.gmra.mrb[32].mxu1 %v10208_v42  ;;  %5750 = vmatmul.mubr.bf16.vlgmr.msra.gmra.mrb[20].mxu0 %v10208_v42 }
 0x899   : > { %5675 = vmatpush1.bf16.msra.mxu1 %v8833_v57  ;;  %5761 = vmatpush1.bf16.msra.mxu0 %v8836_v7  ;;  %v8895_v57 = vld [vmem:[#allocation6 + $0xd4] ss:$24 sps:$4 sm:$0xff]   ;;  %v8967_v7 = vld [vmem:[#allocation7 + $0x64] ss:$12 sps:$4 sm:$0xff]  }
 0x89a   : > { %5676 = vmatprep.subr.bf16.mxu1 %v8841_v63  ;;  %5762 = vmatprep.subr.bf16.mxu0 %v8844_v39  ;;  %v8893_v63 = vld [vmem:[#allocation6 + $0xd0] ss:$24 sps:$4 sm:$0xff]   ;;  %v8898_v39 = vld [vmem:[#allocation6 + $0x104] ss:$24 sps:$4 sm:$0xff]  }
 0x89b   : > { %5706 = vmatprep.mubr.bf16.mxu1 %v10367_v28  ;;  %5792 = vmatprep.mubr.bf16.mxu0 %v10367_v28 }
 0x89d   : > { %5677 = vmatpush1.bf16.msra.mxu1 %v8839_v47  ;;  %5763 = vmatpush1.bf16.msra.mxu0 %v8842_v12  ;;  %v8965_v47 = vld [vmem:[#allocation7 + $0x60] ss:$12 sps:$4 sm:$0xff]   ;;  %v8970_v12 = vld [vmem:[#allocation7 + $0x7c] ss:$12 sps:$4 sm:$0xff]  }
 0x89e   : > { %5678 = vmatprep.subr.bf16.mxu1 %v8847_v0  ;;  %5764 = vmatprep.subr.bf16.mxu0 %v8850_v52  ;;  %v8896_v0 = vld [vmem:[#allocation6 + $0x100] ss:$24 sps:$4 sm:$0xff]   ;;  %v8901_v52 = vld [vmem:[#allocation6 + $0x134] ss:$24 sps:$4 sm:$0xff]  }
 0x8a1   : > { %5679 = vmatpush1.bf16.msra.mxu1 %v8845_v62  ;;  %5765 = vmatpush1.bf16.msra.mxu0 %v8848_v1  ;;  %v8968_v62 = vld [vmem:[#allocation7 + $0x78] ss:$12 sps:$4 sm:$0xff]   ;;  %v8973_v1 = vld [vmem:[#allocation7 + $0x94] ss:$12 sps:$4 sm:$0xff]  }
 0x8a2   : > { %5680 = vmatprep.subr.bf16.mxu1 %v8853_v51  ;;  %5766 = vmatprep.subr.bf16.mxu0 %v8856_v36  ;;  %v8899_v51 = vld [vmem:[#allocation6 + $0x130] ss:$24 sps:$4 sm:$0xff]   ;;  %v8904_v36 = vld [vmem:[#allocation6 + $0x164] ss:$24 sps:$4 sm:$0xff]  }
 0x8a5   : > { %5681 = vmatpush1.bf16.msra.mxu1 %v8851_v23  ;;  %5767 = vmatpush1.bf16.msra.mxu0 %v8854_v45  ;;  %v8971_v23 = vld [vmem:[#allocation7 + $0x90] ss:$12 sps:$4 sm:$0xff]   ;;  %v8976_v45 = vld [vmem:[#allocation7 + $0xac] ss:$12 sps:$4 sm:$0xff]  }
 0x8a6   : > { %5682 = vmatprep.subr.bf16.mxu1 %v8859_v61  ;;  %5768 = vmatprep.subr.bf16.mxu0 %v8862_v60  ;;  %v8902_v61 = vld [vmem:[#allocation6 + $0x160] ss:$24 sps:$4 sm:$0xff]   ;;  %v8907_v60 = vld [vmem:[#allocation6 + $0x194] ss:$24 sps:$4 sm:$0xff]  }
 0x8a9   : > { %5683 = vmatpush1.bf16.msra.mxu1 %v8857_v22  ;;  %5769 = vmatpush1.bf16.msra.mxu0 %v8860_v53  ;;  %v8974_v22 = vld [vmem:[#allocation7 + $0xa8] ss:$12 sps:$4 sm:$0xff]   ;;  %v8979_v53 = vld [vmem:[#allocation7 + $0xc4] ss:$12 sps:$4 sm:$0xff]  }
 0x8aa   : > { %5684 = vmatprep.subr.bf16.mxu1 %v8865_v15  ;;  %5770 = vmatprep.subr.bf16.mxu0 %v8868_v29  ;;  %v8905_v15 = vld [vmem:[#allocation6 + $0x190] ss:$24 sps:$4 sm:$0xff]   ;;  %v8910_v29 = vld [vmem:[#allocation6 + $0x1c4] ss:$24 sps:$4 sm:$0xff]  }
 0x8ad   : > { %5685 = vmatpush1.bf16.msra.mxu1 %v8863_v40  ;;  %5771 = vmatpush1.bf16.msra.mxu0 %v8866_v13  ;;  %v8977_v40 = vld [vmem:[#allocation7 + $0xc0] ss:$12 sps:$4 sm:$0xff]   ;;  %v8984_v13 = vld [vmem:[#allocation7 + $0xdc] ss:$12 sps:$4 sm:$0xff]  }
 0x8ae   : > { %5686 = vmatprep.subr.bf16.mxu1 %v8871_v10  ;;  %5772 = vmatprep.subr.bf16.mxu0 %v8874_v8  ;;  %v8908_v10 = vld [vmem:[#allocation6 + $0x1c0] ss:$24 sps:$4 sm:$0xff]   ;;  %v8913_v8 = vld [vmem:[#allocation6 + $0x1f4] ss:$24 sps:$4 sm:$0xff]  }
 0x8b1   : > { %5687 = vmatpush1.bf16.msra.mxu1 %v8869_v46  ;;  %5773 = vmatpush1.bf16.msra.mxu0 %v8872_v35  ;;  %v8916_v46 = vld [vmem:[#allocation6 + $0x224] ss:$24 sps:$4 sm:$0xff]  }
 0x8b2   : > { %5688 = vmatprep.subr.bf16.mxu1 %v8877_v9  ;;  %5774 = vmatprep.subr.bf16.mxu0 %v8880_v6  ;;  %v8987_v35 = vld [vmem:[#allocation7 + $0xf0] ss:$12 sps:$4 sm:$0xff]   ;;  %v8994_v9 = vld [vmem:[#allocation7 + $0x10c] ss:$12 sps:$4 sm:$0xff]  }
 0x8b3   : > { %v8914_v6 = vld [vmem:[#allocation6 + $0x220] ss:$24 sps:$4 sm:$0xff]  }
 0x8b5   : > { %5689 = vmatpush1.bf16.msra.mxu1 %v8875_v43  ;;  %5775 = vmatpush1.bf16.msra.mxu0 %v8878_v54  ;;  %v8917_v43 = vld [vmem:[#allocation6 + $0x250] ss:$24 sps:$4 sm:$0xff]   ;;  %v8922_v54 = vld [vmem:[#allocation6 + $0x284] ss:$24 sps:$4 sm:$0xff]  }
 0x8b6   : > { %5803 = vmatprep.subr.bf16.mxu1 %v8883_v2  ;;  %6884 = vmatprep.subr.bf16.mxu0 %v8955_v37  ;;  %v8997_v2 = vld [vmem:[#allocation7 + $0x120] ss:$12 sps:$4 sm:$0xff]   ;;  %v9004_v37 = vld [vmem:[#allocation7 + $0x13c] ss:$12 sps:$4 sm:$0xff]  }
 0x8b8   : > { %5707 = vmatmul.mubr.bf16.vlgmr.msra.gmra.mrb[32].mxu1 %v10230_v25  ;;  %5793 = vmatmul.mubr.bf16.vlgmr.msra.gmra.mrb[20].mxu0 %v10230_v25 }
 0x8b9   : > { %5804 = vmatpush1.bf16.msra.mxu1 %v8881_v4  ;;  %5835 = vmatprep.mubr.bf16.mxu1 %v10204_v24  ;;  %v8962_v24 = vld [vmem:[#allocation7 + $0x48] ss:$12 sps:$4 sm:$0xff]   ;;  %v8920_v4 = vld [vmem:[#allocation6 + $0x280] ss:$24 sps:$4 sm:$0xff]  }
 0x8ba   : > { %5805 = vmatprep.subr.bf16.mxu1 %v8886_v55  ;;  %6885 = vmatpush1.bf16.msra.mxu0 %v8953_v59  ;;  %v8925_v55 = vld [vmem:[#allocation6 + $0x2b4] ss:$24 sps:$4 sm:$0xff]   ;;  %v9002_v59 = vld [vmem:[#allocation7 + $0x138] ss:$12 sps:$4 sm:$0xff]  }
 0x8bb   : > { %6886 = vmatprep.subr.bf16.mxu0 %v8958_v56  ;;  %v8923_v56 = vld [vmem:[#allocation6 + $0x2b0] ss:$24 sps:$4 sm:$0xff]  }
 0x8bd   : > { %5806 = vmatpush1.bf16.msra.mxu1 %v8884_v14  ;;  %v8928_v14 = vld [vmem:[#allocation6 + $0x2e4] ss:$24 sps:$4 sm:$0xff]  }
 0x8be   : > { %5807 = vmatprep.subr.bf16.mxu1 %v8889_v41  ;;  %6887 = vmatpush1.bf16.msra.mxu0 %v8956_v34  ;;  %v8926_v41 = vld [vmem:[#allocation6 + $0x2e0] ss:$24 sps:$4 sm:$0xff]   ;;  %v8931_v34 = vld [vmem:[#allocation6 + $0x314] ss:$24 sps:$4 sm:$0xff]  }
 0x8bf   : > { %6888 = vmatprep.subr.bf16.mxu0 %v8961_v5  ;;  %v8929_v5 = vld [vmem:[#allocation6 + $0x310] ss:$24 sps:$4 sm:$0xff]  }
 0x8c1   : > { %5808 = vmatpush1.bf16.msra.mxu1 %v8887_v33  ;;  %v8934_v33 = vld [vmem:[#allocation6 + $0x344] ss:$24 sps:$4 sm:$0xff]  }
 0x8c2   : > { %5809 = vmatprep.subr.bf16.mxu1 %v8892_v21  ;;  %6889 = vmatpush1.bf16.msra.mxu0 %v8959_v11  ;;  %v8932_v21 = vld [vmem:[#allocation6 + $0x340] ss:$24 sps:$4 sm:$0xff]   ;;  %v8937_v11 = vld [vmem:[#allocation6 + $0x374] ss:$24 sps:$4 sm:$0xff]  }
 0x8c3   : > { %6890 = vmatprep.subr.bf16.mxu0 %v8964_v17  ;;  %v8935_v17 = vld [vmem:[#allocation6 + $0x370] ss:$24 sps:$4 sm:$0xff]  }
 0x8c5   : > { %5810 = vmatpush1.bf16.msra.mxu1 %v8890_v31  ;;  %v8940_v31 = vld [vmem:[#allocation6 + $0x3a4] ss:$24 sps:$4 sm:$0xff]  }
 0x8c6   : > { %5811 = vmatprep.subr.bf16.mxu1 %v8895_v57  ;;  %6891 = vmatpush1.bf16.msra.mxu0 %v8962_v24  ;;  %v8938_v57 = vld [vmem:[#allocation6 + $0x3a0] ss:$24 sps:$4 sm:$0xff]   ;;  %v8943_v24 = vld [vmem:[#allocation6 + $0x3d4] ss:$24 sps:$4 sm:$0xff]  }
 0x8c7   : > { %6892 = vmatprep.subr.bf16.mxu0 %v8967_v7  ;;  %v8941_v7 = vld [vmem:[#allocation6 + $0x3d0] ss:$24 sps:$4 sm:$0xff]  }
 0x8c9   : > { %5812 = vmatpush1.bf16.msra.mxu1 %v8893_v63  ;;  %v8946_v63 = vld [vmem:[#allocation6 + $0x404] ss:$24 sps:$4 sm:$0xff]  }
 0x8ca   : > { %5813 = vmatprep.subr.bf16.mxu1 %v8898_v39  ;;  %6893 = vmatpush1.bf16.msra.mxu0 %v8965_v47  ;;  %v8949_v39 = vld [vmem:[#allocation6 + $0x434] ss:$24 sps:$4 sm:$0xff]   ;;  %v8952_v47 = vld [vmem:[#allocation6 + $0x464] ss:$24 sps:$4 sm:$0xff]  }
 0x8cb   : > { %6894 = vmatprep.subr.bf16.mxu0 %v8970_v12  ;;  %v8950_v12 = vld [vmem:[#allocation6 + $0x460] ss:$24 sps:$4 sm:$0xff]  }
 0x8cd   : > { %5814 = vmatpush1.bf16.msra.mxu1 %v8896_v0  ;;  %v8980_v0 = vld [vmem:[#allocation7 + $0xc8] ss:$12 sps:$4 sm:$0xff]  }
 0x8ce   : > { %5815 = vmatprep.subr.bf16.mxu1 %v8901_v52  ;;  %6895 = vmatpush1.bf16.msra.mxu0 %v8968_v62  ;;  %v9007_v52 = vld [vmem:[#allocation7 + $0x150] ss:$12 sps:$4 sm:$0xff]   ;;  %v9009_v62 = vld [vmem:[#allocation7 + $0x154] ss:$12 sps:$4 sm:$0xff]  }
 0x8cf   : > { %6896 = vmatprep.subr.bf16.mxu0 %v8973_v1  ;;  %v9014_v1 = vld [vmem:[#allocation7 + $0x16c] ss:$12 sps:$4 sm:$0xff]  }
 0x8d1   : > { %5816 = vmatpush1.bf16.msra.mxu1 %v8899_v51  ;;  %v8981_v51 = vld [vmem:[#allocation7 + $0x8] ss:$12 sps:$4 sm:$0xff]  }
 0x8d2   : > { %5817 = vmatprep.subr.bf16.mxu1 %v8904_v36  ;;  %6897 = vmatpush1.bf16.msra.mxu0 %v8971_v23  ;;  %v9012_v36 = vld [vmem:[#allocation7 + $0x168] ss:$12 sps:$4 sm:$0xff]   ;;  %v8985_v23 = vld [vmem:[#allocation7 + $0xe0] ss:$12 sps:$4 sm:$0xff]  }
 0x8d3   : > { %6898 = vmatprep.subr.bf16.mxu0 %v8976_v45  ;;  %v9019_v45 = vld [vmem:[#allocation7 + $0x184] ss:$12 sps:$4 sm:$0xff]  }
 0x8d5   : > { %5818 = vmatpush1.bf16.msra.mxu1 %v8902_v61  ;;  %v8986_v61 = vld [vmem:[#allocation7 + $0x20] ss:$12 sps:$4 sm:$0xff]  }
 0x8d6   : > { %5819 = vmatprep.subr.bf16.mxu1 %v8907_v60  ;;  %6899 = vmatpush1.bf16.msra.mxu0 %v8974_v22  ;;  %v8990_v60 = vld [vmem:[#allocation7 + $0xf8] ss:$12 sps:$4 sm:$0xff]  }
 0x8d7   : > { %6900 = vmatprep.subr.bf16.mxu0 %v8979_v53  ;;  %v8991_v22 = vld [vmem:[#allocation7 + $0x38] ss:$12 sps:$4 sm:$0xff]   ;;  %v8995_v53 = vld [vmem:[#allocation7 + $0x110] ss:$12 sps:$4 sm:$0xff]  }
 0x8d9   : > { %5820 = vmatpush1.bf16.msra.mxu1 %v8905_v15  ;;  %v8996_v15 = vld [vmem:[#allocation7 + $0x50] ss:$12 sps:$4 sm:$0xff]  }
 0x8da   : > { %5821 = vmatprep.subr.bf16.mxu1 %v8910_v29  ;;  %6901 = vmatpush1.bf16.msra.mxu0 %v8977_v40  ;;  %v9000_v29 = vld [vmem:[#allocation7 + $0x128] ss:$12 sps:$4 sm:$0xff]  }
 0x8db   : > { %6902 = vmatprep.subr.bf16.mxu0 %v8984_v13  ;;  %v9001_v40 = vld [vmem:[#allocation7 + $0x68] ss:$12 sps:$4 sm:$0xff]   ;;  %v9005_v13 = vld [vmem:[#allocation7 + $0x140] ss:$12 sps:$4 sm:$0xff]  }
 0x8dd   : > { %5822 = vmatpush1.bf16.msra.mxu1 %v8908_v10  ;;  %v9010_v10 = vld [vmem:[#allocation7 + $0x158] ss:$12 sps:$4 sm:$0xff]  }
 0x8de   : > { %5823 = vmatprep.subr.bf16.mxu1 %v8913_v8  ;;  %6903 = vmatpush1.bf16.msra.mxu0 %v8982_v18  ;;  %v9011_v8 = vld [vmem:[#allocation7 + $0x98] ss:$12 sps:$4 sm:$0xff]   ;;  %v9015_v18 = vld [vmem:[#allocation7 + $0x170] ss:$12 sps:$4 sm:$0xff]  }
 0x8df   : > { %6904 = vmatprep.subr.bf16.mxu0 %v8989_v44  ;;  %v9016_v44 = vld [vmem:[#allocation7 + $0xb0] ss:$12 sps:$4 sm:$0xff]  }
 0x8e1   : > { %5824 = vmatpush1.bf16.msra.mxu1 %v8911_v48  ;;  %v9020_v48 = vld [vmem:[#allocation7 + $0x248] ss:$12 sps:$4 sm:$0xff]  }
 0x8e2   : > { %5825 = vmatprep.subr.bf16.mxu1 %v8916_v46  ;;  %6905 = vmatpush1.bf16.msra.mxu0 %v8987_v35  ;;  %v10241_v46 = vld [vmem:[%s10306_s9] sm:$0x3f] }
 0x8e3   : > { %6906 = vmatprep.subr.bf16.mxu0 %v8994_v9  ;;  %v4884_v35 = vrot.slane %v10241_v46, %v9622_v32  ;;  %v4892_v9 = vrot.slane %v10241_v46, %v10369_v38 }
 0x8e5   : > { %5826 = vmatpush1.bf16.msra.mxu1 %v8914_v6  ;;  %v4888_v6 = vrot.slane %v10241_v46, %v10368_v3 }
 0x8e6   : > { %5827 = vmatprep.subr.bf16.mxu1 %v8919_v16  ;;  %6907 = vmatpush1.bf16.msra.mxu0 %v8992_v20  ;;  %v10370_v16 = vld [vmem:[#allocation19_spill] sm:$0xff] }
 0x8e7   : > { %6908 = vmatprep.subr.bf16.mxu0 %v8999_v50  ;;  %v4896_v20 = vrot.slane %v10241_v46, %v10370_v16  ;;  %v9047_v16 = vld [vmem:[#allocation7 + $0x210] ss:$12 sps:$4 sm:$0xff]  }
 0x8e9   : > { %5828 = vmatpush1.bf16.msra.mxu1 %v8917_v43 }
 0x8ea   : > { %5829 = vmatprep.subr.bf16.mxu1 %v8922_v54  ;;  %6909 = vmatpush1.bf16.msra.mxu0 %v8997_v2 }
 0x8eb   : > { %6910 = vmatprep.subr.bf16.mxu0 %v9004_v37 }
 0x8ed   : > { %5830 = vmatpush1.bf16.msra.mxu1 %v8920_v4 }
 0x8ee   : > { %5831 = vmatprep.subr.bf16.mxu1 %v8925_v55  ;;  %6911 = vmatpush1.bf16.msra.mxu0 %v9002_v59 }
 0x8ef   : > { %6912 = vmatprep.subr.bf16.mxu0 %v9009_v62  ;;  %v9021_v62 = vld [vmem:[#allocation7 + $0x188] ss:$12 sps:$4 sm:$0xff]  }
 0x8f1   : > { %5832 = vmatpush1.bf16.msra.mxu1 %v8923_v56 }
 0x8f2   : > { %5833 = vmatprep.subr.bf16.mxu1 %v8928_v14  ;;  %6913 = vmatpush1.bf16.msra.mxu0 %v9007_v52  ;;  %v9017_v52 = vld [vmem:[#allocation7 + $0x180] ss:$12 sps:$4 sm:$0xff]  }
 0x8f3   : > { %6914 = vmatprep.subr.bf16.mxu0 %v9014_v1  ;;  %v9024_v1 = vld [vmem:[#allocation7 + $0x19c] ss:$12 sps:$4 sm:$0xff]  }
 0x8f5   : > { %5834 = vmatpush1.bf16.msra.mxu1 %v8926_v41 }
 0x8f6   : > { %5846 = vmatprep.subr.bf16.mxu1 %v8931_v34  ;;  %6915 = vmatpush1.bf16.msra.mxu0 %v9012_v36  ;;  %v9022_v36 = vld [vmem:[#allocation7 + $0x198] ss:$12 sps:$4 sm:$0xff]  }
 0x8f7   : > { %6927 = vmatprep.subr.bf16.mxu0 %v9019_v45  ;;  %v9029_v45 = vld [vmem:[#allocation7 + $0x1b4] ss:$12 sps:$4 sm:$0xff]  }
 0x8f8   : > { %5836 = vmatmul.mubr.bf16.vlgmr.msra.gmra.mrb[36].mxu1 %v10208_v42  ;;  %v8944_v42 = vld [vmem:[#allocation6 + $0x400] ss:$24 sps:$4 sm:$0xff]  }
 0x8f9   : > { %5847 = vmatpush1.bf16.msra.mxu1 %v8929_v5  ;;  %5878 = vmatprep.mubr.bf16.mxu1 %v10367_v28  ;;  %v8947_v28 = vld [vmem:[#allocation6 + $0x430] ss:$24 sps:$4 sm:$0xff]  }
 0x8fa   : > { %5848 = vmatprep.subr.bf16.mxu1 %v8934_v33 }
 0x8fd   : > { %5849 = vmatpush1.bf16.msra.mxu1 %v8932_v21 }
 0x8fe   : > { %5850 = vmatprep.subr.bf16.mxu1 %v8937_v11 }
 0x901   : > { %5851 = vmatpush1.bf16.msra.mxu1 %v8935_v17 }
 0x902   : > { %5852 = vmatprep.subr.bf16.mxu1 %v8940_v31 }
 0x905   : > { %5853 = vmatpush1.bf16.msra.mxu1 %v8938_v57 }
 0x906   : > { %5854 = vmatprep.subr.bf16.mxu1 %v8943_v24 }
 0x909   : > { %5855 = vmatpush1.bf16.msra.mxu1 %v8941_v7 }
 0x90a   : > { %5856 = vmatprep.subr.bf16.mxu1 %v8946_v63 }
 0x90d   : > { %5857 = vmatpush1.bf16.msra.mxu1 %v8944_v42 }
 0x90e   : > { %5858 = vmatprep.subr.bf16.mxu1 %v8949_v39 }
 0x911   : > { %5859 = vmatpush1.bf16.msra.mxu1 %v8947_v28 }
 0x912   : > { %5860 = vmatprep.subr.bf16.mxu1 %v8952_v47 }
 0x915   : > { %5861 = vmatpush1.bf16.msra.mxu1 %v8950_v12 }
 0x916   : > { %8054 = vmatprep.subr.bf16.mxu1 %v8980_v0 }
 0x918   : > { %5879 = vmatmul.mubr.bf16.vlgmr.msra.gmra.mrb[36].mxu1 %v10230_v25  ;;  %v9006_v25 = vld [vmem:[#allocation7 + $0x80] ss:$12 sps:$4 sm:$0xff]  }
 0x919   : > { %8055 = vmatpush3.bf16.msra.mxu1 %v8981_v51  ;;  %v9025_v51 = vld [vmem:[#allocation7 + $0x260] ss:$12 sps:$4 sm:$0xff]  }
 0x91a   : > { %8056 = vmatprep.subr.bf16.mxu1 %v8985_v23  ;;  %v9026_v23 = vld [vmem:[#allocation7 + $0x1a0] ss:$12 sps:$4 sm:$0xff]  }
 0x91d   : > { %8057 = vmatpush3.bf16.msra.mxu1 %v8986_v61  ;;  %v9030_v61 = vld [vmem:[#allocation7 + $0x278] ss:$12 sps:$4 sm:$0xff]  }
 0x91e   : > { %8058 = vmatprep.subr.bf16.mxu1 %v8990_v60  ;;  %v9027_v60 = vld [vmem:[#allocation7 + $0x1b0] ss:$12 sps:$4 sm:$0xff]  }
 0x921   : > { %8059 = vmatpush3.bf16.msra.mxu1 %v8991_v22  ;;  %v9031_v22 = vld [vmem:[#allocation7 + $0x1b8] ss:$12 sps:$4 sm:$0xff]  }
 0x922   : > { %8060 = vmatprep.subr.bf16.mxu1 %v8995_v53  ;;  %v9034_v53 = vld [vmem:[#allocation7 + $0x1cc] ss:$12 sps:$4 sm:$0xff]  }
 0x925   : > { %8061 = vmatpush3.bf16.msra.mxu1 %v8996_v15  ;;  %v9035_v15 = vld [vmem:[#allocation7 + $0x290] ss:$12 sps:$4 sm:$0xff]  }
 0x926   : > { %8062 = vmatprep.subr.bf16.mxu1 %v9000_v29  ;;  %v9032_v29 = vld [vmem:[#allocation7 + $0x1c8] ss:$12 sps:$4 sm:$0xff]  }
 0x929   : > { %8063 = vmatpush3.bf16.msra.mxu1 %v9001_v40  ;;  %v9036_v40 = vld [vmem:[#allocation7 + $0x1d0] ss:$12 sps:$4 sm:$0xff]  }
 0x92a   : > { %8064 = vmatprep.subr.bf16.mxu1 %v9005_v13  ;;  %v9039_v13 = vld [vmem:[#allocation7 + $0x1e4] ss:$12 sps:$4 sm:$0xff]  }
 0x92d   : > { %8065 = vmatpush3.bf16.msra.mxu1 %v9006_v25  ;;  %v9040_v25 = vld [vmem:[#allocation7 + $0x2a8] ss:$12 sps:$4 sm:$0xff]  }
 0x92e   : > { %8066 = vmatprep.subr.bf16.mxu1 %v9010_v10  ;;  %v9037_v10 = vld [vmem:[#allocation7 + $0x1e0] ss:$12 sps:$4 sm:$0xff]  }
 0x931   : > { %8067 = vmatpush3.bf16.msra.mxu1 %v9011_v8  ;;  %v9041_v8 = vld [vmem:[#allocation7 + $0x1e8] ss:$12 sps:$4 sm:$0xff]  }
 0x932   : > { %8068 = vmatprep.subr.bf16.mxu1 %v9015_v18  ;;  %v9044_v18 = vld [vmem:[#allocation7 + $0x1fc] ss:$12 sps:$4 sm:$0xff]  }
 0x935   : > { %8069 = vmatpush3.bf16.msra.mxu1 %v9016_v44  ;;  %v9045_v44 = vld [vmem:[#allocation7 + $0x2c0] ss:$12 sps:$4 sm:$0xff]  }
 0x936   : > { %8076 = vmatprep.subr.bf16.mxu1 %v9020_v48  ;;  %v9042_v48 = vld [vmem:[#allocation7 + $0x1f8] ss:$12 sps:$4 sm:$0xff]  }
 0x98b   : > { %v5708_v50 = vpop.f32.mrb[32].mxu1  ;;  %v5794_v43 = vpop.f32.mrb[20].mxu0 }
 0x98c   : > { %v8186_v54 = vadd.f32 %v5708_v50, %v4884_v35  ;;  %v8190_v2 = vadd.f32 %v5794_v43, %v4892_v9  ;;  %v5710_v37 = vpop.f32.mrb[33].mxu1  ;;  %v5796_v4 = vpop.f32.mrb[21].mxu0  ;;  %v9054_v50 = vld [vmem:[#allocation7 + $0x22c] ss:$12 sps:$4 sm:$0xff]   ;;  %v9055_v43 = vld [vmem:[#allocation7 + $0x2f0] ss:$12 sps:$4 sm:$0xff]  }
 0x98d   : > { %v8187_v55 = vadd.f32 %v5710_v37, %v4888_v6  ;;  %v8191_v59 = vadd.f32 %v5796_v4, %v4896_v20  ;;  %v5712_v56 = vpop.f32.mrb[34].mxu1  ;;  %v5798_v14 = vpop.f32.mrb[22].mxu0  ;;  %v9059_v37 = vld [vmem:[#allocation7 + $0x244] ss:$12 sps:$4 sm:$0xff]   ;;  %v9084_v4 = vld [vmem:[#allocation7 + $0x3c8] ss:$12 sps:$4 sm:$0xff]  }
 0x98e   : > { %v8188_v41 = vadd.f32 %v5712_v56, %v4884_v35  ;;  %v8192_v34 = vadd.f32 %v5798_v14, %v4892_v9  ;;  %v5714_v5 = vpop.f32.mrb[35].mxu1  ;;  %v5800_v33 = vpop.f32.mrb[23].mxu0  ;;  %v5889_v17 = vmax.f32 %v8186_v54, 0.0  ;;  %v5891_v31 = vmax.f32 %v8190_v2, 0.0  ;;  %v9046_v35 = vld [vmem:[#allocation7 + $0x200] ss:$12 sps:$4 sm:$0xff]  }
 0x98f   : > { %v8189_v21 = vadd.f32 %v5714_v5, %v4888_v6  ;;  %v8193_v11 = vadd.f32 %v5800_v33, %v4896_v20  ;;  %v5890_v7 = vmax.f32 %v8187_v55, 0.0  ;;  %v5892_v63 = vmax.f32 %v8191_v59, 0.0  ;;  %v9049_v9 = vld [vmem:[#allocation7 + $0x214] ss:$12 sps:$4 sm:$0xff]   ;;  %v9050_v6 = vld [vmem:[#allocation7 + $0x2d8] ss:$12 sps:$4 sm:$0xff]  }
 0x990   : > { %v5895_v57 = vmax.f32 %v8188_v41, 0.0  ;;  %v5897_v24 = vmax.f32 %v8192_v34, 0.0  ;;  %v9051_v20 = vld [vmem:[#allocation7 + $0x218] ss:$12 sps:$4 sm:$0xff]   ;;  %v9052_v54 = vld [vmem:[#allocation7 + $0x228] ss:$12 sps:$4 sm:$0xff]  }
 0x991   : > { %v5896_v42 = vmax.f32 %v8189_v21, 0.0  ;;  %v5898_v39 = vmax.f32 %v8193_v11, 0.0  ;;  %v9056_v2 = vld [vmem:[#allocation7 + $0x230] ss:$12 sps:$4 sm:$0xff]   ;;  %v9057_v55 = vld [vmem:[#allocation7 + $0x240] ss:$12 sps:$4 sm:$0xff]  }
 0x992   : > { %v5901_v28 = vpack.c.bf16 %v5895_v57, %v5889_v17  ;;  %v10251_v47 = vpack.c.bf16 %v5897_v24, %v5891_v31  ;;  %v9085_v59 = vld [vmem:[#allocation7 + $0x308] ss:$12 sps:$4 sm:$0xff]   ;;  %v9089_v14 = vld [vmem:[#allocation7 + $0x3e0] ss:$12 sps:$4 sm:$0xff]   ;;  %v9060_v41 = vld [vmem:[#allocation7 + $0x258] ss:$12 sps:$4 sm:$0xff]  }
 0x993   : > { %v5902_v12 = vpack.c.bf16 %v5896_v42, %v5890_v7  ;;  %v5904_v0 = vpack.c.bf16 %v5898_v39, %v5892_v63  ;;  %v9062_v56 = vld [vmem:[#allocation7 + $0x25c] ss:$12 sps:$4 sm:$0xff]   ;;  %v9090_v34 = vld [vmem:[#allocation7 + $0x320] ss:$12 sps:$4 sm:$0xff]   ;;  %v9094_v33 = vld [vmem:[#allocation7 + $0x3f8] ss:$12 sps:$4 sm:$0xff]  }
 0x994   : > { %v9065_v5 = vld [vmem:[#allocation7 + $0x274] ss:$12 sps:$4 sm:$0xff]   ;;  %v9063_v21 = vld [vmem:[#allocation7 + $0x270] ss:$12 sps:$4 sm:$0xff]   ;;  %v9095_v11 = vld [vmem:[#allocation7 + $0x338] ss:$12 sps:$4 sm:$0xff]  }
 0x995   : > { %6916 = vmatprep.mubr.bf16.mxu0 %v5902_v12  ;;  %7045 = vmatprep.mubr.bf16.mxu1 %v5902_v12  ;;  %v9068_v17 = vld [vmem:[#allocation7 + $0x28c] ss:$12 sps:$4 sm:$0xff]   ;;  %v9099_v31 = vld [vmem:[#allocation7 + $0x410] ss:$12 sps:$4 sm:$0xff]   ;;  %v9066_v57 = vld [vmem:[#allocation7 + $0x288] ss:$12 sps:$4 sm:$0xff]  }
 0x996   : > { %6917 = vmatmul.mubr.bf16.vlgmr.msra.gmra.mrb[24].mxu0 %v5901_v28  ;;  %7046 = vmatmul.mubr.bf16.vlgmr.msra.gmra.mrb[40].mxu1 %v5901_v28  ;;  %v9100_v24 = vld [vmem:[#allocation7 + $0x350] ss:$12 sps:$4 sm:$0xff]   ;;  %v9104_v63 = vld [vmem:[#allocation7 + $0x428] ss:$12 sps:$4 sm:$0xff]   ;;  %v9069_v42 = vld [vmem:[#allocation7 + $0x2a0] ss:$12 sps:$4 sm:$0xff]  }
 0x997   : > { %6928 = vmatpush1.bf16.msra.mxu0 %v9017_v52  ;;  %8077 = vmatpush3.bf16.msra.mxu1 %v9021_v62  ;;  %v9071_v7 = vld [vmem:[#allocation7 + $0x2a4] ss:$12 sps:$4 sm:$0xff]   ;;  %v9105_v39 = vld [vmem:[#allocation7 + $0x368] ss:$12 sps:$4 sm:$0xff]   ;;  %v9109_v12 = vld [vmem:[#allocation7 + $0x440] ss:$12 sps:$4 sm:$0xff]  }
 0x998   : > { %6959 = vmatprep.mubr.bf16.mxu0 %v5904_v0  ;;  %7086 = vmatprep.mubr.bf16.mxu1 %v5904_v0  ;;  %v9074_v28 = vld [vmem:[#allocation7 + $0x2bc] ss:$12 sps:$4 sm:$0xff]   ;;  %v9072_v0 = vld [vmem:[#allocation7 + $0x2b8] ss:$12 sps:$4 sm:$0xff]   ;;  %v9110_v52 = vld [vmem:[#allocation7 + $0x380] ss:$12 sps:$4 sm:$0xff]  }
 0x999   : > { %6929 = vmatprep.subr.bf16.mxu0 %v9024_v1  ;;  %8078 = vmatprep.subr.bf16.mxu1 %v9025_v51  ;;  %v9077_v62 = vld [vmem:[#allocation7 + $0x2d4] ss:$12 sps:$4 sm:$0xff]   ;;  %v9114_v1 = vld [vmem:[#allocation7 + $0x458] ss:$12 sps:$4 sm:$0xff]   ;;  %v9075_v51 = vld [vmem:[#allocation7 + $0x2d0] ss:$12 sps:$4 sm:$0xff]  }
 0x99b   : > { %6930 = vmatpush1.bf16.msra.mxu0 %v9022_v36  ;;  %8079 = vmatpush3.bf16.msra.mxu1 %v9026_v23  ;;  %v9115_v36 = vld [vmem:[#allocation7 + $0x398] ss:$12 sps:$4 sm:$0xff]  }
 0x99c   : > { %6931 = vmatprep.subr.bf16.mxu0 %v9029_v45  ;;  %8080 = vmatprep.subr.bf16.mxu1 %v9030_v61  ;;  %v9080_v23 = vld [vmem:[#allocation7 + $0x2ec] ss:$12 sps:$4 sm:$0xff]   ;;  %v9119_v45 = vld [vmem:[#allocation7 + $0x470] ss:$12 sps:$4 sm:$0xff]   ;;  %v9078_v61 = vld [vmem:[#allocation7 + $0x2e8] ss:$12 sps:$4 sm:$0xff]  }
 0x99f   : > { %6932 = vmatpush1.bf16.msra.mxu0 %v9027_v60  ;;  %8081 = vmatpush3.bf16.msra.mxu1 %v9031_v22  ;;  %v9120_v60 = vld [vmem:[#allocation7 + $0x3b0] ss:$12 sps:$4 sm:$0xff]  }
 0x9a0   : > { %6933 = vmatprep.subr.bf16.mxu0 %v9034_v53  ;;  %8082 = vmatprep.subr.bf16.mxu1 %v9035_v15  ;;  %v9083_v22 = vld [vmem:[#allocation7 + $0x304] ss:$12 sps:$4 sm:$0xff]   ;;  %v9081_v53 = vld [vmem:[#allocation7 + $0x300] ss:$12 sps:$4 sm:$0xff]   ;;  %v9088_v15 = vld [vmem:[#allocation7 + $0x31c] ss:$12 sps:$4 sm:$0xff]  }
 0x9a3   : > { %6934 = vmatpush1.bf16.msra.mxu0 %v9032_v29  ;;  %8083 = vmatpush3.bf16.msra.mxu1 %v9036_v40  ;;  %v9086_v29 = vld [vmem:[#allocation7 + $0x318] ss:$12 sps:$4 sm:$0xff]   ;;  %v9093_v40 = vld [vmem:[#allocation7 + $0x334] ss:$12 sps:$4 sm:$0xff]  }
 0x9a4   : > { %6935 = vmatprep.subr.bf16.mxu0 %v9039_v13  ;;  %8084 = vmatprep.subr.bf16.mxu1 %v9040_v25  ;;  %v9091_v13 = vld [vmem:[#allocation7 + $0x330] ss:$12 sps:$4 sm:$0xff]   ;;  %v9098_v25 = vld [vmem:[#allocation7 + $0x34c] ss:$12 sps:$4 sm:$0xff]  }
 0x9a7   : > { %6936 = vmatpush1.bf16.msra.mxu0 %v9037_v10  ;;  %8085 = vmatpush3.bf16.msra.mxu1 %v9041_v8  ;;  %v9096_v10 = vld [vmem:[#allocation7 + $0x348] ss:$12 sps:$4 sm:$0xff]   ;;  %v9103_v8 = vld [vmem:[#allocation7 + $0x364] ss:$12 sps:$4 sm:$0xff]  }
 0x9a8   : > { %6937 = vmatprep.subr.bf16.mxu0 %v9044_v18  ;;  %8086 = vmatprep.subr.bf16.mxu1 %v9045_v44  ;;  %v9101_v18 = vld [vmem:[#allocation7 + $0x360] ss:$12 sps:$4 sm:$0xff]   ;;  %v9108_v44 = vld [vmem:[#allocation7 + $0x37c] ss:$12 sps:$4 sm:$0xff]  }
 0x9ab   : > { %6938 = vmatpush1.bf16.msra.mxu0 %v9042_v48  ;;  %8087 = vmatpush3.bf16.msra.mxu1 %v9046_v35  ;;  %v9106_v48 = vld [vmem:[#allocation7 + $0x378] ss:$12 sps:$4 sm:$0xff]  }
 0x9ac   : > { %6939 = vmatprep.subr.bf16.mxu0 %v9049_v9  ;;  %8088 = vmatprep.subr.bf16.mxu1 %v9050_v6  ;;  %v9113_v9 = vld [vmem:[#allocation7 + $0x394] ss:$12 sps:$4 sm:$0xff]   ;;  %v10372_v6 = vld [vmem:[#allocation16_spill] sm:$0xff] }
 0x9af   : > { %6940 = vmatpush1.bf16.msra.mxu0 %v9047_v16  ;;  %8089 = vmatpush3.bf16.msra.mxu1 %v9051_v20  ;;  %v4904_v16 = vrot.slane %v10241_v46, %v10372_v6 }
 0x9b0   : > { %6941 = vmatprep.subr.bf16.mxu0 %v9054_v50  ;;  %8090 = vmatprep.subr.bf16.mxu1 %v9055_v43  ;;  %v9111_v50 = vld [vmem:[#allocation7 + $0x390] ss:$12 sps:$4 sm:$0xff]  }
 0x9b3   : > { %6942 = vmatpush1.bf16.msra.mxu0 %v9052_v54  ;;  %8091 = vmatpush3.bf16.msra.mxu1 %v9056_v2  ;;  %v9118_v2 = vld [vmem:[#allocation7 + $0x3ac] ss:$12 sps:$4 sm:$0xff]  }
 0x9b4   : > { %6943 = vmatprep.subr.bf16.mxu0 %v9059_v37  ;;  %8098 = vmatprep.subr.bf16.mxu1 %v9084_v4 }
 0x9b6   : > { %7087 = vmatmul.mubr.bf16.vlgmr.msra.gmra.mrb[44].mxu1 %v10251_v47 }
 0x9b7   : > { %6944 = vmatpush1.bf16.msra.mxu0 %v9057_v55  ;;  %8099 = vmatpush3.bf16.msra.mxu1 %v9085_v59 }
 0x9b8   : > { %6945 = vmatprep.subr.bf16.mxu0 %v9062_v56  ;;  %8100 = vmatprep.subr.bf16.mxu1 %v9089_v14  ;;  %v9116_v14 = vld [vmem:[#allocation7 + $0x3a8] ss:$12 sps:$4 sm:$0xff]  }
 0x9bb   : > { %6946 = vmatpush1.bf16.msra.mxu0 %v9060_v41  ;;  %8101 = vmatpush3.bf16.msra.mxu1 %v9090_v34 }
 0x9bc   : > { %6947 = vmatprep.subr.bf16.mxu0 %v9065_v5  ;;  %8102 = vmatprep.subr.bf16.mxu1 %v9094_v33  ;;  %v9123_v5 = vld [vmem:[#allocation7 + $0x3c4] ss:$12 sps:$4 sm:$0xff]  }
 0x9bf   : > { %6948 = vmatpush1.bf16.msra.mxu0 %v9063_v21  ;;  %8103 = vmatpush3.bf16.msra.mxu1 %v9095_v11 }
 0x9c0   : > { %6949 = vmatprep.subr.bf16.mxu0 %v9068_v17  ;;  %8104 = vmatprep.subr.bf16.mxu1 %v9099_v31  ;;  %v9121_v17 = vld [vmem:[#allocation7 + $0x3c0] ss:$12 sps:$4 sm:$0xff]   ;;  %v9126_v31 = vld [vmem:[#allocation7 + $0x3dc] ss:$12 sps:$4 sm:$0xff]  }
 0x9c3   : > { %6950 = vmatpush1.bf16.msra.mxu0 %v9066_v57  ;;  %8105 = vmatpush3.bf16.msra.mxu1 %v9100_v24  ;;  %v9124_v57 = vld [vmem:[#allocation7 + $0x3d8] ss:$12 sps:$4 sm:$0xff]   ;;  %v9129_v24 = vld [vmem:[#allocation7 + $0x3f4] ss:$12 sps:$4 sm:$0xff]  }
 0x9c4   : > { %6951 = vmatprep.subr.bf16.mxu0 %v9071_v7  ;;  %8106 = vmatprep.subr.bf16.mxu1 %v9104_v63  ;;  %v9127_v7 = vld [vmem:[#allocation7 + $0x3f0] ss:$12 sps:$4 sm:$0xff]   ;;  %v9132_v63 = vld [vmem:[#allocation7 + $0x40c] ss:$12 sps:$4 sm:$0xff]  }
 0x9c7   : > { %6952 = vmatpush1.bf16.msra.mxu0 %v9069_v42  ;;  %8107 = vmatpush3.bf16.msra.mxu1 %v9105_v39  ;;  %v9130_v42 = vld [vmem:[#allocation7 + $0x408] ss:$12 sps:$4 sm:$0xff]   ;;  %v9135_v39 = vld [vmem:[#allocation7 + $0x424] ss:$12 sps:$4 sm:$0xff]  }
 0x9c8   : > { %6953 = vmatprep.subr.bf16.mxu0 %v9074_v28  ;;  %8108 = vmatprep.subr.bf16.mxu1 %v9109_v12  ;;  %v9133_v28 = vld [vmem:[#allocation7 + $0x420] ss:$12 sps:$4 sm:$0xff]   ;;  %v9138_v12 = vld [vmem:[#allocation7 + $0x43c] ss:$12 sps:$4 sm:$0xff]  }
 0x9cb   : > { %6954 = vmatpush1.bf16.msra.mxu0 %v9072_v0  ;;  %8109 = vmatpush3.bf16.msra.mxu1 %v9110_v52  ;;  %v9136_v0 = vld [vmem:[#allocation7 + $0x438] ss:$12 sps:$4 sm:$0xff]   ;;  %v9141_v52 = vld [vmem:[#allocation7 + $0x454] ss:$12 sps:$4 sm:$0xff]  }
 0x9cc   : > { %6955 = vmatprep.subr.bf16.mxu0 %v9077_v62  ;;  %8110 = vmatprep.subr.bf16.mxu1 %v9114_v1  ;;  %v9139_v62 = vld [vmem:[#allocation7 + $0x450] ss:$12 sps:$4 sm:$0xff]   ;;  %v9144_v1 = vld [vmem:[#allocation7 + $0x46c] ss:$12 sps:$4 sm:$0xff]  }
 0x9cf   : > { %6956 = vmatpush1.bf16.msra.mxu0 %v9075_v51  ;;  %8111 = vmatpush3.bf16.msra.mxu1 %v9115_v36  ;;  %v9142_v51 = vld [vmem:[#allocation7 + $0x468] ss:$12 sps:$4 sm:$0xff]  }
 0x9d0   : > { %6957 = vmatprep.subr.bf16.mxu0 %v9080_v23  ;;  %8112 = vmatprep.subr.bf16.mxu1 %v9119_v45 }
 0x9d3   : > { %6958 = vmatpush1.bf16.msra.mxu0 %v9078_v61  ;;  %8113 = vmatpush3.bf16.msra.mxu1 %v9120_v60 }
 0x9d4   : > { %6970 = vmatprep.subr.bf16.mxu0 %v9083_v22 }
 0x9d6   : > { %6960 = vmatmul.mubr.bf16.vlgmr.msra.gmra.mrb[24].mxu0 %v10251_v47  ;;  %v10371_v47 = vld [vmem:[#allocation17_spill] sm:$0xff] }
 0x9d7   : > { %6971 = vmatpush1.bf16.msra.mxu0 %v9081_v53  ;;  %v4900_v35 = vrot.slane %v10241_v46, %v10371_v47  ;;  %v6099_v53 = vld [vmem:[%s10308_s11] sm:$0x7] }
 0x9d8   : > { %6972 = vmatprep.subr.bf16.mxu0 %v9088_v15  ;;  %v6112_v15 = vrot.slane %v6099_v53, %v10369_v38 }
 0x9db   : > { %6973 = vmatpush1.bf16.msra.mxu0 %v9086_v29 }
 0x9dc   : > { %6974 = vmatprep.subr.bf16.mxu0 %v9093_v40 }
 0x9df   : > { %6975 = vmatpush1.bf16.msra.mxu0 %v9091_v13 }
 0x9e0   : > { %6976 = vmatprep.subr.bf16.mxu0 %v9098_v25 }
 0x9e3   : > { %6977 = vmatpush1.bf16.msra.mxu0 %v9096_v10 }
 0x9e4   : > { %6978 = vmatprep.subr.bf16.mxu0 %v9103_v8 }
 0x9e7   : > { %6979 = vmatpush1.bf16.msra.mxu0 %v9101_v18 }
 0x9e8   : > { %6980 = vmatprep.subr.bf16.mxu0 %v9108_v44 }
 0x9eb   : > { %6981 = vmatpush1.bf16.msra.mxu0 %v9106_v48  ;;  %v5880_v20 = vpop.f32.mrb[36].mxu1 }
 0x9ec   : > { %v8194_v43 = vadd.f32 %v5880_v20, %v4900_v35  ;;  %v5882_v54 = vpop.f32.mrb[37].mxu1  ;;  %6982 = vmatprep.subr.bf16.mxu0 %v9113_v9 }
 0x9ed   : > { %v8195_v37 = vadd.f32 %v5882_v54, %v4904_v16  ;;  %v5884_v4 = vpop.f32.mrb[38].mxu1 }
 0x9ee   : > { %v8196_v55 = vadd.f32 %v5884_v4, %v4900_v35  ;;  %v5886_v59 = vpop.f32.mrb[39].mxu1  ;;  %v5893_v41 = vmax.f32 %v8194_v43, 0.0 }
 0x9ef   : > { %v8197_v56 = vadd.f32 %v5886_v59, %v4904_v16  ;;  %6983 = vmatpush1.bf16.msra.mxu0 %v9111_v50  ;;  %v5894_v33 = vmax.f32 %v8195_v37, 0.0  ;;  %v6108_v37 = vrot.slane %v6099_v53, %v10368_v3 }
 0x9f0   : > { %v5899_v34 = vmax.f32 %v8196_v55, 0.0  ;;  %6984 = vmatprep.subr.bf16.mxu0 %v9118_v2  ;;  %v6104_v2 = vrot.slane %v6099_v53, %v9622_v32 }
 0x9f1   : > { %v5900_v46 = vmax.f32 %v8197_v56, 0.0 }
 0x9f2   : > { %v5905_v21 = vpack.c.bf16 %v5899_v34, %v5893_v41 }
 0x9f3   : > { %v5906_v11 = vpack.c.bf16 %v5900_v46, %v5894_v33  ;;  %6985 = vmatpush1.bf16.msra.mxu0 %v9116_v14 }
 0x9f4   : > { %6986 = vmatprep.subr.bf16.mxu0 %v9123_v5 }
 0x9f5   : > { %7002 = vmatprep.mubr.bf16.mxu0 %v5906_v11  ;;  %7127 = vmatprep.mubr.bf16.mxu1 %v5906_v11 }
 0x9f6   : > { %7128 = vmatmul.mubr.bf16.vlgmr.msra.gmra.mrb[48].mxu1 %v5905_v21 }
 0x9f7   : > { %6987 = vmatpush1.bf16.msra.mxu0 %v9121_v17 }
 0x9f8   : > { %6988 = vmatprep.subr.bf16.mxu0 %v9126_v31 }
 0x9fb   : > { %6989 = vmatpush1.bf16.msra.mxu0 %v9124_v57 }
 0x9fc   : > { %6990 = vmatprep.subr.bf16.mxu0 %v9129_v24 }
 0x9ff   : > { %6991 = vmatpush1.bf16.msra.mxu0 %v9127_v7 }
 0xa00   : > { %6992 = vmatprep.subr.bf16.mxu0 %v9132_v63 }
 0xa03   : > { %6993 = vmatpush1.bf16.msra.mxu0 %v9130_v42 }
 0xa04   : > { %6994 = vmatprep.subr.bf16.mxu0 %v9135_v39 }
 0xa07   : > { %6995 = vmatpush1.bf16.msra.mxu0 %v9133_v28 }
 0xa08   : > { %6996 = vmatprep.subr.bf16.mxu0 %v9138_v12 }
 0xa0b   : > { %6997 = vmatpush1.bf16.msra.mxu0 %v9136_v0 }
 0xa0c   : > { %6998 = vmatprep.subr.bf16.mxu0 %v9141_v52 }
 0xa0f   : > { %6999 = vmatpush1.bf16.msra.mxu0 %v9139_v62 }
 0xa10   : > { %7000 = vmatprep.subr.bf16.mxu0 %v9144_v1 }
 0xa13   : > { %7001 = vmatpush1.bf16.msra.mxu0 %v9142_v51 }
 0xa16   : > { %7003 = vmatmul.mubr.bf16.vlgmr.msra.gmra.mrb[24].mxu0 %v5905_v21 }
 0xa69   : > { %v8070_v36 = vpop.f32.mrb[40].mxu1 }
 0xa6a   : > { %v8071_v23 = vpop.f32.mrb[41].mxu1 }
 0xa6b   : > { %v8072_v45 = vadd.f32 %v8071_v23, %v8070_v36  ;;  %v8073_v61 = vpop.f32.mrb[42].mxu1 }
 0xa6c   : > { %v8074_v60 = vpop.f32.mrb[43].mxu1 }
 0xa6d   : > { %v8075_v22 = vadd.f32 %v8074_v60, %v8073_v61  ;;  %v7048_v13 = vadd.f32 %v8072_v45, %v6112_v15 }
 0xa6f   : > { %v7051_v18 = vadd.f32 %v8075_v22, %v6112_v15 }
 0xa89   : > { %v8092_v29 = vpop.f32.mrb[44].mxu1 }
 0xa8a   : > { %v8093_v40 = vpop.f32.mrb[45].mxu1 }
 0xa8b   : > { %v8094_v25 = vadd.f32 %v8093_v40, %v8092_v29  ;;  %v8095_v10 = vpop.f32.mrb[46].mxu1 }
 0xa8c   : > { %v8096_v8 = vpop.f32.mrb[47].mxu1 }
 0xa8d   : > { %v7089_v44 = vadd.f32 %v8094_v25, %v7048_v13  ;;  %v8097_v48 = vadd.f32 %v8096_v8, %v8095_v10 }
 0xa8f   : > { %v7092_v47 = vadd.f32 %v8097_v48, %v7051_v18 }
 0xac9   : > { %v8114_v35 = vpop.f32.mrb[48].mxu1 }
 0xaca   : > { %v8115_v9 = vpop.f32.mrb[49].mxu1 }
 0xacb   : > { %v8116_v6 = vadd.f32 %v8115_v9, %v8114_v35  ;;  %v8117_v16 = vpop.f32.mrb[50].mxu1 }
 0xacc   : > { %v8118_v20 = vpop.f32.mrb[51].mxu1 }
 0xacd   : > { %v7130_v50 = vadd.f32 %v8116_v6, %v7089_v44  ;;  %v8119_v43 = vadd.f32 %v8118_v20, %v8117_v16 }
 0xacf   : > { %v7133_v54 = vadd.f32 %v8119_v43, %v7092_v47  ;;  %v7138_v17 = vadd.f32 %v7130_v50, %v10226_v26  ;;  %v7142_v50 = vld [vmem:[%s10309_s12] sm:$0x7] }
 0xad0   : > { %v7143_v43 = vld [vmem:[%s10373_s23] sm:$0x7] }
 0xad1   : > { %v7141_v57 = vadd.f32 %v7133_v54, %v10224_v19  ;;  %v7202_v54 = vrot.slane %v7142_v50, %v9622_v32 }
 0xad3   : > { %v7151_v42 = vsel %vm4637_vm15, %v7141_v57, 0.0 }
 0xae9   : > { %v7004_v4 = vpop.f32.mrb[24].mxu0 }
 0xaea   : > { %v8198_v55 = vadd.f32 %v7004_v4, %v6104_v2  ;;  %v7006_v59 = vpop.f32.mrb[25].mxu0 }
 0xaeb   : > { %v8199_v56 = vadd.f32 %v7006_v59, %v6108_v37  ;;  %v7008_v14 = vpop.f32.mrb[26].mxu0  ;;  %v7228_v59 = vrot.slane %v7143_v43, %v10368_v3 }
 0xaec   : > { %v7136_v41 = vadd.f32 %v8198_v55, %v10198_v27  ;;  %v8200_v34 = vadd.f32 %v7008_v14, %v6104_v2  ;;  %v7010_v5 = vpop.f32.mrb[27].mxu0  ;;  %v7206_v2 = vrot.slane %v7142_v50, %v10368_v3  ;;  %v7224_v55 = vrot.slane %v7143_v43, %v9622_v32 }
 0xaed   : > { %v7137_v33 = vadd.f32 %v8199_v56, %v10194_v30  ;;  %v8201_v46 = vadd.f32 %v7010_v5, %v6108_v37  ;;  %v7210_v37 = vrot.slane %v7142_v50, %v10369_v38  ;;  %v7232_v56 = vrot.slane %v7143_v43, %v10369_v38 }
 0xaee   : > { %v7139_v21 = vadd.f32 %v8200_v34, %v10200_v49 }
 0xaef   : > { %v7140_v11 = vadd.f32 %v8201_v46, %v10196_v58  ;;  %v7144_v31 = vadd.f32 %v7137_v33, %v7136_v41 }
 0xaf0   : > { %v7148_v24 = vsel %vm4637_vm15, %v7139_v21, 0.0 }
 0xaf1   : > { %v7145_v7 = vadd.f32 %v7144_v31, %v7138_v17  ;;  %v7149_v63 = vsel %vm4637_vm15, %v7140_v11, 0.0 }
 0xaf2   : > { %v7150_v27 = vadd.f32 %v7149_v63, %v7148_v24 }
 0xaf3   : > { %7146 = vadd.xlane.f32.xlu0 %v7145_v7 }
 0xaf4   : > { %v7152_v30 = vadd.f32 %v7151_v42, %v7150_v27 }
 0xaf6   : > { %7153 = vadd.xlane.f32.xlu1 %v7152_v30 }
 0xb80   : > { %v7147_v39 = vpop.xlane.xlu0 %7146 }
 0xb81   : > { %v7155_v49 = vmul.f32 0.0033333334, %v7147_v39 }
 0xb83   : > { %v7154_v28 = vpop.xlane.xlu1 %7153  ;;  %v7157_v58 = vsub.f32 %v7136_v41, %v7155_v49  ;;  %v7158_v12 = vsub.f32 %v7137_v33, %v7155_v49  ;;  %v7159_v26 = vsub.f32 %v7138_v17, %v7155_v49  ;;  %v7180_v25 = vmul.f32 84.0, %v7155_v49 }
 0xb84   : > { %v7156_v0 = vmul.f32 0.0033333334, %v7154_v28 }
 0xb85   : > { %v7163_v52 = vmul.f32 %v7157_v58, %v7157_v58  ;;  %v7164_v19 = vmul.f32 %v7158_v12, %v7158_v12  ;;  %v7165_v36 = vmul.f32 %v7159_v26, %v7159_v26  ;;  %v7182_v10 = vmul.f32 %v7180_v25, %v7155_v49 }
 0xb86   : > { %v7160_v62 = vsub.f32 %v7139_v21, %v7156_v0  ;;  %v7161_v1 = vsub.f32 %v7140_v11, %v7156_v0  ;;  %v7162_v51 = vsub.f32 %v7141_v57, %v7156_v0  ;;  %v7181_v8 = vmul.f32 84.0, %v7156_v0 }
 0xb87   : > { %v7169_v23 = vadd.f32 %v7164_v19, %v7163_v52 }
 0xb88   : > { %v7166_v45 = vmul.f32 %v7160_v62, %v7160_v62  ;;  %v7167_v61 = vmul.f32 %v7161_v1, %v7161_v1  ;;  %v7168_v60 = vmul.f32 %v7162_v51, %v7162_v51  ;;  %v7183_v47 = vmul.f32 %v7181_v8, %v7156_v0 }
 0xb89   : > { %v7170_v22 = vadd.f32 %v7169_v23, %v7165_v36 }
 0xb8a   : > { %v7173_v53 = vsel %vm4637_vm15, %v7166_v45, 0.0  ;;  %v7174_v15 = vsel %vm4637_vm15, %v7167_v61, 0.0  ;;  %v7176_v40 = vsel %vm4637_vm15, %v7168_v60, 0.0 }
 0xb8b   : > { %7171 = vadd.xlane.f32.xlu1 %v7170_v22  ;;  %v7175_v29 = vadd.f32 %v7174_v15, %v7173_v53 }
 0xb8d   : > { %v7177_v13 = vadd.f32 %v7176_v40, %v7175_v29 }
 0xb8f   : > { %7178 = vadd.xlane.f32.xlu0 %v7177_v13 }
 0xc18   : > { %v7172_v18 = vpop.xlane.xlu1 %7171 }
 0xc19   : > { %v7184_v44 = vsub.f32 %v7172_v18, %v7182_v10 }
 0xc1b   : > { %v7186_v48 = vmul.f32 0.0033333334, %v7184_v44 }
 0xc1c   : > { %v7179_v35 = vpop.xlane.xlu0 %7178 }
 0xc1d   : > { %v7188_v9 = vadd.f32 1e-05, %v7186_v48  ;;  %v7185_v6 = vsub.f32 %v7179_v35, %v7183_v47 }
 0xc1f   : > { %9157 = vrsqrt.f32 %v7188_v9  ;;  %v7187_v16 = vmul.f32 0.0033333334, %v7185_v6 }
 0xc21   : > { %v7189_v20 = vadd.f32 1e-05, %v7187_v16 }
 0xc23   : > { %9159 = vrsqrt.f32 %v7189_v20 }
 0xc29   : > { %v9158_v4 = vpop.eup %9157 }
 0xc2a   : > { %v7192_v14 = vmul.f32 %v9158_v4, %v7157_v58  ;;  %v7193_v41 = vmul.f32 %v9158_v4, %v7158_v12  ;;  %v7194_v34 = vmul.f32 %v9158_v4, %v7159_v26 }
 0xc2c   : > { %v7214_v5 = vmul.f32 %v7202_v54, %v7192_v14  ;;  %v7215_v33 = vmul.f32 %v7206_v2, %v7193_v41  ;;  %v7216_v46 = vmul.f32 %v7210_v37, %v7194_v34 }
 0xc2d   : > { %v9160_v21 = vpop.eup %9159 }
 0xc2e   : > { %v7236_v11 = vadd.f32 %v7224_v55, %v7214_v5  ;;  %v7237_v17 = vadd.f32 %v7228_v59, %v7215_v33  ;;  %v7238_v31 = vadd.f32 %v7232_v56, %v7216_v46  ;;  %v7195_v32 = vmul.f32 %v9160_v21, %v7160_v62 }
 0xc2f   : > { %v7196_v57 = vmul.f32 %v9160_v21, %v7161_v1  ;;  %v7197_v3 = vmul.f32 %v9160_v21, %v7162_v51 }
 0xc30   : > { %7242 = vst [vmem:[%s546_s13] sm:$0xff] %v7236_v11  ;;  %7243 = vst [vmem:[%s546_s13 + $0x8] sm:$0xff] %v7237_v17  ;;  %v7217_v38 = vmul.f32 %v7202_v54, %v7195_v32 }
 0xc31   : > { %7244 = vst [vmem:[%s546_s13 + $0x10] sm:$0xff] %v7238_v31  ;;  %v7218_v24 = vmul.f32 %v7206_v2, %v7196_v57  ;;  %v7219_v7 = vmul.f32 %v7210_v37, %v7197_v3 }
 0xc32   : > { %v7239_v63 = vadd.f32 %v7224_v55, %v7217_v38 }
 0xc33   : > { %v7240_v27 = vadd.f32 %v7228_v59, %v7218_v24  ;;  %v7241_v42 = vadd.f32 %v7232_v56, %v7219_v7 }
 0xc34   : > { %7245 = vst [vmem:[%s546_s13 + $0x18] sm:$0x3f] %v7239_v63 }
 0xc35   : > { %7246 = vst [vmem:[%s546_s13 + $0x20] sm:$0x3f] %v7240_v27  ;;  %7247 = vst [vmem:[%s546_s13 + $0x28] sm:$0x3f] %v7241_v42 }
 0xc36 PF: > { %s10375_s16 = sld [smem:[#allocation12_spill]] }
 0xc3c   : > { %s27_s29 = sadd.s32 1, %s10375_s16  }
 0xc3d   : > { %p24_p1 = scmp.ge.s32.totalorder %s27_s29, 4  }
 0xc3f   :  { %26 = sbr.rel (!%p24_p1) target bundleno = 6 (0x6), region = 126 }
 0xc46   :  { %7269 = vsyncpa [#allocation3], 1 }
 0xc47   :  { %7271 = vsyncpa [#allocation3 + $0x1], 1 }
 0xc48   :  { %7272 = vsyncpa [#allocation5], 1 }
 0xc49   :  { %7273 = vsyncpa [#allocation8], 1 }

</bundles_post_ra>
